<compile_context>
chip_gen: v6e
topology: v6e:2x2x1
jax: 0.10.0
libtpu: 0.0.40
codegen_flags: <defaults>
</compile_context>

<pallas_src>
import functools
import math

import jax
import jax.numpy as jnp
import numpy as np
from jax import lax
from jax.experimental import pallas as pl
from jax.experimental.pallas import tpu as pltpu

KSIZE = 7
PAD = 3  # 'same' padding for kernel_size=7


def _round_up(x, m):
    return ((x + m - 1) // m) * m


def _largest_divisor_le(n, cap):
    best = 1
    for d in range(1, min(n, cap) + 1):
        if n % d == 0:
            best = d
    return best


def _pick_chunk(C, nb, hw_pad, value_budget=64 * 1024):
    """Channels per reduction chunk so a chunk value stays ~16 vregs."""
    cap = max(1, value_budget // max(1, nb * hw_pad * 4))
    if C <= cap:
        return C
    divs = [d for d in range(1, cap + 1) if C % d == 0]
    mult8 = [d for d in divs if d % 8 == 0]
    return max(mult8) if mult8 else max(divs)


def spatial_attn_kernel(w_ref, x_ref, o_ref, pad_avg_ref, pad_max_ref, *,
                        NB, C, CC, H, W, HW, PADF):
    # w_ref:     SMEM, flat (2*7*7,) conv weight
    # x_ref:     VMEM, (NB, C, HW) batch block (lane-dense over HW)
    # o_ref:     VMEM, (NB, 1, HW) attention map block (lane-dense)
    # pad_*_ref: VMEM scratch, (NB, HW + 2*PADF) flat zero-padded planes

    # ---- Phase 1: channel mean / max, lane-dense over HW, f32 math ----
    if C <= 8:
        # Tiny C: fully unrolled per-channel accumulation (pure VALU).
        v0 = x_ref[:, 0, :].astype(jnp.float32)           # (NB, HW)
        ssum = v0
        smax = v0
        for c in range(1, C):
            v = x_ref[:, c, :].astype(jnp.float32)
            ssum = ssum + v
            smax = jnp.maximum(smax, v)
    else:
        num_chunks = C // CC
        if num_chunks == 1:
            xb = x_ref[...].astype(jnp.float32)            # (NB, C, HW)
            ssum = jnp.sum(xb, axis=1)                     # (NB, HW)
            smax = jnp.max(xb, axis=1)
        else:
            # Chunked running sum / running max bounds vreg pressure.
            def body(i, carry):
                s, m = carry
                c0 = pl.multiple_of(i * CC, CC)
                chunk = x_ref[:, pl.ds(c0, CC), :].astype(jnp.float32)
                return (s + jnp.sum(chunk, axis=1),
                        jnp.maximum(m, jnp.max(chunk, axis=1)))
            ssum, smax = lax.fori_loop(
                0, num_chunks, body,
                (jnp.zeros((NB, HW), jnp.float32),
                 jnp.full((NB, HW), -jnp.inf, jnp.float32)))
    avg = ssum * jnp.float32(1.0 / C)

    # ---- Phase 2: flat zero-padded planes in VMEM scratch ----
    # Zero only the two PADF-wide halos; interior is overwritten below.
    # (Re)done every step because the batch grid axis is "parallel".
    zhalo = jnp.zeros((NB, PADF), jnp.float32)
    pad_avg_ref[:, :PADF] = zhalo
    pad_avg_ref[:, PADF + HW:] = zhalo
    pad_max_ref[:, :PADF] = zhalo
    pad_max_ref[:, PADF + HW:] = zhalo
    pad_avg_ref[:, PADF:PADF + HW] = avg
    pad_max_ref[:, PADF:PADF + HW] = smax
    planes = (pad_avg_ref[...], pad_max_ref[...])          # each (NB, TOT)
    TOT = HW + 2 * PADF

    # ---- Column-validity predicates (source-side masking) ----
    # A flat shift by s = dy*W + dx wraps columns across row boundaries; for a
    # horizontal offset dx it is exact iff the first dx (dx>0) / last -dx
    # (dx<0) source columns of every row are zeroed first. PADF % W == 0, so
    # the column of padded-lane idx is simply idx mod W.
    idx = lax.broadcasted_iota(jnp.int32, (NB, TOT), 1)
    if W & (W - 1) == 0:
        col = jnp.bitwise_and(idx, W - 1)
    else:
        idxf = idx.astype(jnp.float32)
        col = (idxf - W * jnp.floor((idxf + 0.5) * (1.0 / W))).astype(jnp.int32)
    conds = []
    for kx in range(KSIZE):
        dx = kx - PAD
        if dx > 0:
            conds.append(col >= dx)
        elif dx < 0:
            conds.append(col < W + dx)
        else:
            conds.append(None)

    # ---- Phase 3: 7x7 conv (2 -> 1 ch, no bias) as flat lane shifts ----
    # 4 independent accumulators break the 98-tap serial add chain so the
    # VLIW packer can fill all 4 VALU slots.  All math in f32 (v5e-safe).
    accs = [jnp.zeros((NB, HW), jnp.float32) for _ in range(4)]
    tap = 0
    for c in range(2):
        plane = planes[c]
        for kx in range(KSIZE):
            dx = kx - PAD
            cond = conds[kx]
            masked = plane if cond is None else jnp.where(cond, plane, 0.0)
            for ky in range(KSIZE):
                dy = ky - PAD
                s = dy * W + dx
                window = masked[:, PADF + s:PADF + s + HW]   # (NB, HW)
                wval = w_ref[c * KSIZE * KSIZE + ky * KSIZE + kx]
                accs[tap & 3] = accs[tap & 3] + wval * window
                tap += 1
    acc = (accs[0] + accs[1]) + (accs[2] + accs[3])

    o_ref[:, 0, :] = jax.nn.sigmoid(acc).astype(o_ref.dtype)


def spatial_attention(x, w):
    """x: (N, C, H, W), w: (1, 2, 7, 7) conv weight -> (N, 1, H, W)."""
    N, C, H, W = x.shape
    HW = H * W
    PADF = _round_up(PAD * W + PAD, W)        # flat halo, multiple of W
    TOT = HW + 2 * PADF
    itemsize = jnp.dtype(x.dtype).itemsize

    # --- Batch block size from a VMEM budget; keep the grid length >= 2 ---
    c_pad = _round_up(C, 8)
    hw_pad = _round_up(HW, 128)
    x_budget = 4 * 1024 * 1024                # per x buffer (double-buffered)
    nb_cap = max(1, x_budget // (c_pad * hw_pad * itemsize))
    if N >= 2:
        nb_cap = min(nb_cap, N // 2)          # grid >= 2: pipelining + 2 TCs
    NB = _largest_divisor_le(N, nb_cap)
    CC = _pick_chunk(C, NB, hw_pad)

    x_flat = x.reshape(N, C, HW)              # free for contiguous NCHW
    w_flat = w.reshape(-1).astype(jnp.float32)

    # Explicit scoped-VMEM limit (safe on v5e/v6e/v7x), sized from the blocks.
    x_block = NB * c_pad * hw_pad * itemsize
    o_block = NB * 8 * hw_pad * itemsize
    scratch = 2 * NB * 8 * _round_up(TOT, 128) * 4
    vmem_need = 2 * (x_block + o_block) + scratch
    vmem_limit = int(min(48 << 20, max(vmem_need + (4 << 20), 16 << 20)))

    flops = int(N * HW * (2 * C + 4 * KSIZE * KSIZE))
    cost = pl.CostEstimate(
        flops=flops,
        transcendentals=int(N * HW),
        bytes_accessed=int(x.size * itemsize + N * HW * itemsize + w.size * 4))

    kernel = functools.partial(spatial_attn_kernel, NB=NB, C=C, CC=CC,
                               H=H, W=W, HW=HW, PADF=PADF)
    out = pl.pallas_call(
        kernel,
        out_shape=jax.ShapeDtypeStruct((N, 1, HW), x.dtype),
        grid_spec=pltpu.PrefetchScalarGridSpec(
            num_scalar_prefetch=0,
            grid=(N // NB,),
            in_specs=[
                # conv weight: small, scalar-indexed -> SMEM, untiled
                pl.BlockSpec(memory_space=pltpu.MemorySpace.SMEM),
                # NB batch elements per grid step, lane-dense over HW
                pl.BlockSpec((NB, C, HW), lambda n: (n, 0, 0)),
            ],
            out_specs=pl.BlockSpec((NB, 1, HW), lambda n: (n, 0, 0)),
            scratch_shapes=[
                pltpu.VMEM((NB, TOT), jnp.float32),
                pltpu.VMEM((NB, TOT), jnp.float32),
            ],
        ),
        compiler_params=pltpu.CompilerParams(
            dimension_semantics=("parallel",),
            vmem_limit_bytes=vmem_limit),
        cost_estimate=cost,
    )(w_flat, x_flat)
    return out.reshape(N, 1, H, W)


def reference(x, w):
    """Pure-JAX reference mirroring the PyTorch forward."""
    avg = jnp.mean(x, axis=1, keepdims=True)
    mx = jnp.max(x, axis=1, keepdims=True)
    feat = jnp.concatenate([avg, mx], axis=1)            # (N, 2, H, W)
    out = jax.lax.conv_general_dilated(
        feat, w, window_strides=(1, 1), padding=((PAD, PAD), (PAD, PAD)),
        dimension_numbers=("NCHW", "OIHW", "NCHW"))
    return jax.nn.sigmoid(out)


if __name__ == "__main__":
    key = jax.random.PRNGKey(0)
    key_x, key_w = jax.random.split(key)

    N, C, H, W = 2, 4, 16, 16
    x = jax.random.normal(key_x, (N, C, H, W), dtype=jnp.float32)

    # Deterministic xavier_normal_(gain=0.02) init for the (1, 2, 7, 7) conv.
    fan_in = 2 * KSIZE * KSIZE
    fan_out = 1 * KSIZE * KSIZE
    std = 0.02 * math.sqrt(2.0 / (fan_in + fan_out))
    w = std * jax.random.normal(key_w, (1, 2, KSIZE, KSIZE), dtype=jnp.float32)

    out = jax.block_until_ready(spatial_attention(x, w))
    ref = jax.block_until_ready(reference(x, w))

    assert out.shape == (N, 1, H, W)
    np.testing.assert_allclose(np.asarray(out), np.asarray(ref),
                               rtol=1e-5, atol=1e-5)
    print("KERNEL_OK")
</pallas_src>

<mosaic_0001>
module attributes {stable_mosaic.version = 11 : i64} {
  func.func @spatial_attn_kernel(%arg0: i32, %arg1: memref<98xf32, #tpu.memory_space<smem>>, %arg2: memref<1x4x256xf32, #tpu.memory_space<vmem>>, %arg3: memref<1x1x256xf32, #tpu.memory_space<vmem>>, %arg4: memref<1x384xf32, #tpu.memory_space<vmem>>, %arg5: memref<1x384xf32, #tpu.memory_space<vmem>>) attributes {dimension_semantics = [#tpu.dimension_semantics<parallel>], iteration_bounds = array<i64: 2>, scalar_prefetch = 0 : i64, scratch_operands = 2 : i64, tpu.core_type = #tpu.core_type<tc>, window_params = [{transform_indices = @transform_0, window_bounds = array<i64: 98>}, {transform_indices = @transform_1, window_bounds = array<i64: 1, 4, 256>}, {transform_indices = @transform_2, window_bounds = array<i64: 1, 1, 256>}]} {
    %c0 = arith.constant 0 : index
    %c0_0 = arith.constant 0 : index
    %c0_1 = arith.constant 0 : index
    %0 = vector.load %arg2[%c0, %c0_0, %c0_1] : memref<1x4x256xf32, #tpu.memory_space<vmem>>, vector<1x1x256xf32>
    %1 = vector.shape_cast %0 : vector<1x1x256xf32> to vector<1x256xf32>
    %c0_2 = arith.constant 0 : index
    %c1 = arith.constant 1 : index
    %c0_3 = arith.constant 0 : index
    %2 = vector.load %arg2[%c0_2, %c1, %c0_3] : memref<1x4x256xf32, #tpu.memory_space<vmem>>, vector<1x1x256xf32>
    %3 = vector.shape_cast %2 : vector<1x1x256xf32> to vector<1x256xf32>
    %4 = arith.addf %1, %3 : vector<1x256xf32>
    %5 = arith.maximumf %1, %3 : vector<1x256xf32>
    %c0_4 = arith.constant 0 : index
    %c2 = arith.constant 2 : index
    %c0_5 = arith.constant 0 : index
    %6 = vector.load %arg2[%c0_4, %c2, %c0_5] : memref<1x4x256xf32, #tpu.memory_space<vmem>>, vector<1x1x256xf32>
    %7 = vector.shape_cast %6 : vector<1x1x256xf32> to vector<1x256xf32>
    %8 = arith.addf %4, %7 : vector<1x256xf32>
    %9 = arith.maximumf %5, %7 : vector<1x256xf32>
    %c0_6 = arith.constant 0 : index
    %c3 = arith.constant 3 : index
    %c0_7 = arith.constant 0 : index
    %10 = vector.load %arg2[%c0_6, %c3, %c0_7] : memref<1x4x256xf32, #tpu.memory_space<vmem>>, vector<1x1x256xf32>
    %11 = vector.shape_cast %10 : vector<1x1x256xf32> to vector<1x256xf32>
    %12 = arith.addf %8, %11 : vector<1x256xf32>
    %13 = arith.maximumf %9, %11 : vector<1x256xf32>
    %cst = arith.constant 2.500000e-01 : f32
    %14 = vector.broadcast %cst : f32 to vector<1x256xf32>
    %15 = arith.mulf %12, %14 : vector<1x256xf32>
    %cst_8 = arith.constant 0.000000e+00 : f32
    %16 = vector.broadcast %cst_8 : f32 to vector<1x64xf32>
    %c0_9 = arith.constant 0 : index
    %c0_10 = arith.constant 0 : index
    %17 = vector.load %arg4[%c0_9, %c0_10] : memref<1x384xf32, #tpu.memory_space<vmem>>, vector<1x64xf32>
    tpu.vector_store %arg4[%c0_9, %c0_10], %16 {strides = array<i32>} : memref<1x384xf32, #tpu.memory_space<vmem>>, vector<1x64xf32>,
    %c0_11 = arith.constant 0 : index
    %c320 = arith.constant 320 : index
    %18 = vector.load %arg4[%c0_11, %c320] : memref<1x384xf32, #tpu.memory_space<vmem>>, vector<1x64xf32>
    tpu.vector_store %arg4[%c0_11, %c320], %16 {strides = array<i32>} : memref<1x384xf32, #tpu.memory_space<vmem>>, vector<1x64xf32>,
    %c0_12 = arith.constant 0 : index
    %c0_13 = arith.constant 0 : index
    %19 = vector.load %arg5[%c0_12, %c0_13] : memref<1x384xf32, #tpu.memory_space<vmem>>, vector<1x64xf32>
    tpu.vector_store %arg5[%c0_12, %c0_13], %16 {strides = array<i32>} : memref<1x384xf32, #tpu.memory_space<vmem>>, vector<1x64xf32>,
    %c0_14 = arith.constant 0 : index
    %c320_15 = arith.constant 320 : index
    %20 = vector.load %arg5[%c0_14, %c320_15] : memref<1x384xf32, #tpu.memory_space<vmem>>, vector<1x64xf32>
    tpu.vector_store %arg5[%c0_14, %c320_15], %16 {strides = array<i32>} : memref<1x384xf32, #tpu.memory_space<vmem>>, vector<1x64xf32>,
    %c0_16 = arith.constant 0 : index
    %c64 = arith.constant 64 : index
    %21 = vector.load %arg4[%c0_16, %c64] : memref<1x384xf32, #tpu.memory_space<vmem>>, vector<1x256xf32>
    tpu.vector_store %arg4[%c0_16, %c64], %15 {strides = array<i32>} : memref<1x384xf32, #tpu.memory_space<vmem>>, vector<1x256xf32>,
    %c0_17 = arith.constant 0 : index
    %c64_18 = arith.constant 64 : index
    %22 = vector.load %arg5[%c0_17, %c64_18] : memref<1x384xf32, #tpu.memory_space<vmem>>, vector<1x256xf32>
    tpu.vector_store %arg5[%c0_17, %c64_18], %13 {strides = array<i32>} : memref<1x384xf32, #tpu.memory_space<vmem>>, vector<1x256xf32>,
    %c0_19 = arith.constant 0 : index
    %c0_20 = arith.constant 0 : index
    %23 = vector.load %arg4[%c0_19, %c0_20] : memref<1x384xf32, #tpu.memory_space<vmem>>, vector<1x384xf32>
    %c0_21 = arith.constant 0 : index
    %c0_22 = arith.constant 0 : index
    %24 = vector.load %arg5[%c0_21, %c0_22] : memref<1x384xf32, #tpu.memory_space<vmem>>, vector<1x384xf32>
    %25 = tpu.iota {dimensions = array<i32: 1>} : vector<1x384xi32>
    %c15_i32 = arith.constant 15 : i32
    %26 = vector.broadcast %c15_i32 : i32 to vector<1x384xi32>
    %27 = arith.andi %25, %26 : vector<1x384xi32>
    %c13_i32 = arith.constant 13 : i32
    %28 = vector.broadcast %c13_i32 : i32 to vector<1x384xi32>
    %29 = arith.cmpi slt, %27, %28 : vector<1x384xi32>
    %c14_i32 = arith.constant 14 : i32
    %30 = vector.broadcast %c14_i32 : i32 to vector<1x384xi32>
    %31 = arith.cmpi slt, %27, %30 : vector<1x384xi32>
    %c15_i32_23 = arith.constant 15 : i32
    %32 = vector.broadcast %c15_i32_23 : i32 to vector<1x384xi32>
    %33 = arith.cmpi slt, %27, %32 : vector<1x384xi32>
    %c1_i32 = arith.constant 1 : i32
    %34 = vector.broadcast %c1_i32 : i32 to vector<1x384xi32>
    %35 = arith.cmpi sge, %27, %34 : vector<1x384xi32>
    %c2_i32 = arith.constant 2 : i32
    %36 = vector.broadcast %c2_i32 : i32 to vector<1x384xi32>
    %37 = arith.cmpi sge, %27, %36 : vector<1x384xi32>
    %c3_i32 = arith.constant 3 : i32
    %38 = vector.broadcast %c3_i32 : i32 to vector<1x384xi32>
    %39 = arith.cmpi sge, %27, %38 : vector<1x384xi32>
    %cst_24 = arith.constant 0.000000e+00 : f32
    %40 = vector.broadcast %cst_24 : f32 to vector<1x256xf32>
    %cst_25 = arith.constant 0.000000e+00 : f32
    %41 = vector.broadcast %cst_25 : f32 to vector<1x256xf32>
    %cst_26 = arith.constant 0.000000e+00 : f32
    %42 = vector.broadcast %cst_26 : f32 to vector<1x256xf32>
    %cst_27 = arith.constant 0.000000e+00 : f32
    %43 = vector.broadcast %cst_27 : f32 to vector<1x256xf32>
    %cst_28 = arith.constant 0.000000e+00 : f32
    %44 = vector.broadcast %cst_28 : f32 to vector<1x384xf32>
    %45 = arith.select %29, %23, %44 : vector<1x384xi1>, vector<1x384xf32>
    %46 = vector.extract_strided_slice %45 {offsets = [0, 13], sizes = [1, 256], strides = [1, 1]} : vector<1x384xf32> to vector<1x256xf32>
    %c0_29 = arith.constant 0 : index
    %47 = memref.load %arg1[%c0_29] : memref<98xf32, #tpu.memory_space<smem>>
    %48 = vector.broadcast %47 : f32 to vector<1x256xf32>
    %49 = arith.mulf %48, %46 : vector<1x256xf32>
    %50 = arith.addf %40, %49 : vector<1x256xf32>
    %51 = vector.extract_strided_slice %45 {offsets = [0, 29], sizes = [1, 256], strides = [1, 1]} : vector<1x384xf32> to vector<1x256xf32>
    %c7 = arith.constant 7 : index
    %52 = memref.load %arg1[%c7] : memref<98xf32, #tpu.memory_space<smem>>
    %53 = vector.broadcast %52 : f32 to vector<1x256xf32>
    %54 = arith.mulf %53, %51 : vector<1x256xf32>
    %55 = arith.addf %41, %54 : vector<1x256xf32>
    %56 = vector.extract_strided_slice %45 {offsets = [0, 45], sizes = [1, 256], strides = [1, 1]} : vector<1x384xf32> to vector<1x256xf32>
    %c14 = arith.constant 14 : index
    %57 = memref.load %arg1[%c14] : memref<98xf32, #tpu.memory_space<smem>>
    %58 = vector.broadcast %57 : f32 to vector<1x256xf32>
    %59 = arith.mulf %58, %56 : vector<1x256xf32>
    %60 = arith.addf %42, %59 : vector<1x256xf32>
    %61 = vector.extract_strided_slice %45 {offsets = [0, 61], sizes = [1, 256], strides = [1, 1]} : vector<1x384xf32> to vector<1x256xf32>
    %c21 = arith.constant 21 : index
    %62 = memref.load %arg1[%c21] : memref<98xf32, #tpu.memory_space<smem>>
    %63 = vector.broadcast %62 : f32 to vector<1x256xf32>
    %64 = arith.mulf %63, %61 : vector<1x256xf32>
    %65 = arith.addf %43, %64 : vector<1x256xf32>
    %66 = vector.extract_strided_slice %45 {offsets = [0, 77], sizes = [1, 256], strides = [1, 1]} : vector<1x384xf32> to vector<1x256xf32>
    %c28 = arith.constant 28 : index
    %67 = memref.load %arg1[%c28] : memref<98xf32, #tpu.memory_space<smem>>
    %68 = vector.broadcast %67 : f32 to vector<1x256xf32>
    %69 = arith.mulf %68, %66 : vector<1x256xf32>
    %70 = arith.addf %50, %69 : vector<1x256xf32>
    %71 = vector.extract_strided_slice %45 {offsets = [0, 93], sizes = [1, 256], strides = [1, 1]} : vector<1x384xf32> to vector<1x256xf32>
    %c35 = arith.constant 35 : index
    %72 = memref.load %arg1[%c35] : memref<98xf32, #tpu.memory_space<smem>>
    %73 = vector.broadcast %72 : f32 to vector<1x256xf32>
    %74 = arith.mulf %73, %71 : vector<1x256xf32>
    %75 = arith.addf %55, %74 : vector<1x256xf32>
    %76 = vector.extract_strided_slice %45 {offsets = [0, 109], sizes = [1, 256], strides = [1, 1]} : vector<1x384xf32> to vector<1x256xf32>
    %c42 = arith.constant 42 : index
    %77 = memref.load %arg1[%c42] : memref<98xf32, #tpu.memory_space<smem>>
    %78 = vector.broadcast %77 : f32 to vector<1x256xf32>
    %79 = arith.mulf %78, %76 : vector<1x256xf32>
    %80 = arith.addf %60, %79 : vector<1x256xf32>
    %cst_30 = arith.constant 0.000000e+00 : f32
    %81 = vector.broadcast %cst_30 : f32 to vector<1x384xf32>
    %82 = arith.select %31, %23, %81 : vector<1x384xi1>, vector<1x384xf32>
    %83 = vector.extract_strided_slice %82 {offsets = [0, 14], sizes = [1, 256], strides = [1, 1]} : vector<1x384xf32> to vector<1x256xf32>
    %c1_31 = arith.constant 1 : index
    %84 = memref.load %arg1[%c1_31] : memref<98xf32, #tpu.memory_space<smem>>
    %85 = vector.broadcast %84 : f32 to vector<1x256xf32>
    %86 = arith.mulf %85, %83 : vector<1x256xf32>
    %87 = arith.addf %65, %86 : vector<1x256xf32>
    %88 = vector.extract_strided_slice %82 {offsets = [0, 30], sizes = [1, 256], strides = [1, 1]} : vector<1x384xf32> to vector<1x256xf32>
    %c8 = arith.constant 8 : index
    %89 = memref.load %arg1[%c8] : memref<98xf32, #tpu.memory_space<smem>>
    %90 = vector.broadcast %89 : f32 to vector<1x256xf32>
    %91 = arith.mulf %90, %88 : vector<1x256xf32>
    %92 = arith.addf %70, %91 : vector<1x256xf32>
    %93 = vector.extract_strided_slice %82 {offsets = [0, 46], sizes = [1, 256], strides = [1, 1]} : vector<1x384xf32> to vector<1x256xf32>
    %c15 = arith.constant 15 : index
    %94 = memref.load %arg1[%c15] : memref<98xf32, #tpu.memory_space<smem>>
    %95 = vector.broadcast %94 : f32 to vector<1x256xf32>
    %96 = arith.mulf %95, %93 : vector<1x256xf32>
    %97 = arith.addf %75, %96 : vector<1x256xf32>
    %98 = vector.extract_strided_slice %82 {offsets = [0, 62], sizes = [1, 256], strides = [1, 1]} : vector<1x384xf32> to vector<1x256xf32>
    %c22 = arith.constant 22 : index
    %99 = memref.load %arg1[%c22] : memref<98xf32, #tpu.memory_space<smem>>
    %100 = vector.broadcast %99 : f32 to vector<1x256xf32>
    %101 = arith.mulf %100, %98 : vector<1x256xf32>
    %102 = arith.addf %80, %101 : vector<1x256xf32>
    %103 = vector.extract_strided_slice %82 {offsets = [0, 78], sizes = [1, 256], strides = [1, 1]} : vector<1x384xf32> to vector<1x256xf32>
    %c29 = arith.constant 29 : index
    %104 = memref.load %arg1[%c29] : memref<98xf32, #tpu.memory_space<smem>>
    %105 = vector.broadcast %104 : f32 to vector<1x256xf32>
    %106 = arith.mulf %105, %103 : vector<1x256xf32>
    %107 = arith.addf %87, %106 : vector<1x256xf32>
    %108 = vector.extract_strided_slice %82 {offsets = [0, 94], sizes = [1, 256], strides = [1, 1]} : vector<1x384xf32> to vector<1x256xf32>
    %c36 = arith.constant 36 : index
    %109 = memref.load %arg1[%c36] : memref<98xf32, #tpu.memory_space<smem>>
    %110 = vector.broadcast %109 : f32 to vector<1x256xf32>
    %111 = arith.mulf %110, %108 : vector<1x256xf32>
    %112 = arith.addf %92, %111 : vector<1x256xf32>
    %113 = vector.extract_strided_slice %82 {offsets = [0, 110], sizes = [1, 256], strides = [1, 1]} : vector<1x384xf32> to vector<1x256xf32>
    %c43 = arith.constant 43 : index
    %114 = memref.load %arg1[%c43] : memref<98xf32, #tpu.memory_space<smem>>
    %115 = vector.broadcast %114 : f32 to vector<1x256xf32>
    %116 = arith.mulf %115, %113 : vector<1x256xf32>
    %117 = arith.addf %97, %116 : vector<1x256xf32>
    %cst_32 = arith.constant 0.000000e+00 : f32
    %118 = vector.broadcast %cst_32 : f32 to vector<1x384xf32>
    %119 = arith.select %33, %23, %118 : vector<1x384xi1>, vector<1x384xf32>
    %120 = vector.extract_strided_slice %119 {offsets = [0, 15], sizes = [1, 256], strides = [1, 1]} : vector<1x384xf32> to vector<1x256xf32>
    %c2_33 = arith.constant 2 : index
    %121 = memref.load %arg1[%c2_33] : memref<98xf32, #tpu.memory_space<smem>>
    %122 = vector.broadcast %121 : f32 to vector<1x256xf32>
    %123 = arith.mulf %122, %120 : vector<1x256xf32>
    %124 = arith.addf %102, %123 : vector<1x256xf32>
    %125 = vector.extract_strided_slice %119 {offsets = [0, 31], sizes = [1, 256], strides = [1, 1]} : vector<1x384xf32> to vector<1x256xf32>
    %c9 = arith.constant 9 : index
    %126 = memref.load %arg1[%c9] : memref<98xf32, #tpu.memory_space<smem>>
    %127 = vector.broadcast %126 : f32 to vector<1x256xf32>
    %128 = arith.mulf %127, %125 : vector<1x256xf32>
    %129 = arith.addf %107, %128 : vector<1x256xf32>
    %130 = vector.extract_strided_slice %119 {offsets = [0, 47], sizes = [1, 256], strides = [1, 1]} : vector<1x384xf32> to vector<1x256xf32>
    %c16 = arith.constant 16 : index
    %131 = memref.load %arg1[%c16] : memref<98xf32, #tpu.memory_space<smem>>
    %132 = vector.broadcast %131 : f32 to vector<1x256xf32>
    %133 = arith.mulf %132, %130 : vector<1x256xf32>
    %134 = arith.addf %112, %133 : vector<1x256xf32>
    %135 = vector.extract_strided_slice %119 {offsets = [0, 63], sizes = [1, 256], strides = [1, 1]} : vector<1x384xf32> to vector<1x256xf32>
    %c23 = arith.constant 23 : index
    %136 = memref.load %arg1[%c23] : memref<98xf32, #tpu.memory_space<smem>>
    %137 = vector.broadcast %136 : f32 to vector<1x256xf32>
    %138 = arith.mulf %137, %135 : vector<1x256xf32>
    %139 = arith.addf %117, %138 : vector<1x256xf32>
    %140 = vector.extract_strided_slice %119 {offsets = [0, 79], sizes = [1, 256], strides = [1, 1]} : vector<1x384xf32> to vector<1x256xf32>
    %c30 = arith.constant 30 : index
    %141 = memref.load %arg1[%c30] : memref<98xf32, #tpu.memory_space<smem>>
    %142 = vector.broadcast %141 : f32 to vector<1x256xf32>
    %143 = arith.mulf %142, %140 : vector<1x256xf32>
    %144 = arith.addf %124, %143 : vector<1x256xf32>
    %145 = vector.extract_strided_slice %119 {offsets = [0, 95], sizes = [1, 256], strides = [1, 1]} : vector<1x384xf32> to vector<1x256xf32>
    %c37 = arith.constant 37 : index
    %146 = memref.load %arg1[%c37] : memref<98xf32, #tpu.memory_space<smem>>
    %147 = vector.broadcast %146 : f32 to vector<1x256xf32>
    %148 = arith.mulf %147, %145 : vector<1x256xf32>
    %149 = arith.addf %129, %148 : vector<1x256xf32>
    %150 = vector.extract_strided_slice %119 {offsets = [0, 111], sizes = [1, 256], strides = [1, 1]} : vector<1x384xf32> to vector<1x256xf32>
    %c44 = arith.constant 44 : index
    %151 = memref.load %arg1[%c44] : memref<98xf32, #tpu.memory_space<smem>>
    %152 = vector.broadcast %151 : f32 to vector<1x256xf32>
    %153 = arith.mulf %152, %150 : vector<1x256xf32>
    %154 = arith.addf %134, %153 : vector<1x256xf32>
    %155 = vector.extract_strided_slice %23 {offsets = [0, 16], sizes = [1, 256], strides = [1, 1]} : vector<1x384xf32> to vector<1x256xf32>
    %c3_34 = arith.constant 3 : index
    %156 = memref.load %arg1[%c3_34] : memref<98xf32, #tpu.memory_space<smem>>
    %157 = vector.broadcast %156 : f32 to vector<1x256xf32>
    %158 = arith.mulf %157, %155 : vector<1x256xf32>
    %159 = arith.addf %139, %158 : vector<1x256xf32>
    %160 = vector.extract_strided_slice %23 {offsets = [0, 32], sizes = [1, 256], strides = [1, 1]} : vector<1x384xf32> to vector<1x256xf32>
    %c10 = arith.constant 10 : index
    %161 = memref.load %arg1[%c10] : memref<98xf32, #tpu.memory_space<smem>>
    %162 = vector.broadcast %161 : f32 to vector<1x256xf32>
    %163 = arith.mulf %162, %160 : vector<1x256xf32>
    %164 = arith.addf %144, %163 : vector<1x256xf32>
    %165 = vector.extract_strided_slice %23 {offsets = [0, 48], sizes = [1, 256], strides = [1, 1]} : vector<1x384xf32> to vector<1x256xf32>
    %c17 = arith.constant 17 : index
    %166 = memref.load %arg1[%c17] : memref<98xf32, #tpu.memory_space<smem>>
    %167 = vector.broadcast %166 : f32 to vector<1x256xf32>
    %168 = arith.mulf %167, %165 : vector<1x256xf32>
    %169 = arith.addf %149, %168 : vector<1x256xf32>
    %170 = vector.extract_strided_slice %23 {offsets = [0, 64], sizes = [1, 256], strides = [1, 1]} : vector<1x384xf32> to vector<1x256xf32>
    %c24 = arith.constant 24 : index
    %171 = memref.load %arg1[%c24] : memref<98xf32, #tpu.memory_space<smem>>
    %172 = vector.broadcast %171 : f32 to vector<1x256xf32>
    %173 = arith.mulf %172, %170 : vector<1x256xf32>
    %174 = arith.addf %154, %173 : vector<1x256xf32>
    %175 = vector.extract_strided_slice %23 {offsets = [0, 80], sizes = [1, 256], strides = [1, 1]} : vector<1x384xf32> to vector<1x256xf32>
    %c31 = arith.constant 31 : index
    %176 = memref.load %arg1[%c31] : memref<98xf32, #tpu.memory_space<smem>>
    %177 = vector.broadcast %176 : f32 to vector<1x256xf32>
    %178 = arith.mulf %177, %175 : vector<1x256xf32>
    %179 = arith.addf %159, %178 : vector<1x256xf32>
    %180 = vector.extract_strided_slice %23 {offsets = [0, 96], sizes = [1, 256], strides = [1, 1]} : vector<1x384xf32> to vector<1x256xf32>
    %c38 = arith.constant 38 : index
    %181 = memref.load %arg1[%c38] : memref<98xf32, #tpu.memory_space<smem>>
    %182 = vector.broadcast %181 : f32 to vector<1x256xf32>
    %183 = arith.mulf %182, %180 : vector<1x256xf32>
    %184 = arith.addf %164, %183 : vector<1x256xf32>
    %185 = vector.extract_strided_slice %23 {offsets = [0, 112], sizes = [1, 256], strides = [1, 1]} : vector<1x384xf32> to vector<1x256xf32>
    %c45 = arith.constant 45 : index
    %186 = memref.load %arg1[%c45] : memref<98xf32, #tpu.memory_space<smem>>
    %187 = vector.broadcast %186 : f32 to vector<1x256xf32>
    %188 = arith.mulf %187, %185 : vector<1x256xf32>
    %189 = arith.addf %169, %188 : vector<1x256xf32>
    %cst_35 = arith.constant 0.000000e+00 : f32
    %190 = vector.broadcast %cst_35 : f32 to vector<1x384xf32>
    %191 = arith.select %35, %23, %190 : vector<1x384xi1>, vector<1x384xf32>
    %192 = vector.extract_strided_slice %191 {offsets = [0, 17], sizes = [1, 256], strides = [1, 1]} : vector<1x384xf32> to vector<1x256xf32>
    %c4 = arith.constant 4 : index
    %193 = memref.load %arg1[%c4] : memref<98xf32, #tpu.memory_space<smem>>
    %194 = vector.broadcast %193 : f32 to vector<1x256xf32>
    %195 = arith.mulf %194, %192 : vector<1x256xf32>
    %196 = arith.addf %174, %195 : vector<1x256xf32>
    %197 = vector.extract_strided_slice %191 {offsets = [0, 33], sizes = [1, 256], strides = [1, 1]} : vector<1x384xf32> to vector<1x256xf32>
    %c11 = arith.constant 11 : index
    %198 = memref.load %arg1[%c11] : memref<98xf32, #tpu.memory_space<smem>>
    %199 = vector.broadcast %198 : f32 to vector<1x256xf32>
    %200 = arith.mulf %199, %197 : vector<1x256xf32>
    %201 = arith.addf %179, %200 : vector<1x256xf32>
    %202 = vector.extract_strided_slice %191 {offsets = [0, 49], sizes = [1, 256], strides = [1, 1]} : vector<1x384xf32> to vector<1x256xf32>
    %c18 = arith.constant 18 : index
    %203 = memref.load %arg1[%c18] : memref<98xf32, #tpu.memory_space<smem>>
    %204 = vector.broadcast %203 : f32 to vector<1x256xf32>
    %205 = arith.mulf %204, %202 : vector<1x256xf32>
    %206 = arith.addf %184, %205 : vector<1x256xf32>
    %207 = vector.extract_strided_slice %191 {offsets = [0, 65], sizes = [1, 256], strides = [1, 1]} : vector<1x384xf32> to vector<1x256xf32>
    %c25 = arith.constant 25 : index
    %208 = memref.load %arg1[%c25] : memref<98xf32, #tpu.memory_space<smem>>
    %209 = vector.broadcast %208 : f32 to vector<1x256xf32>
    %210 = arith.mulf %209, %207 : vector<1x256xf32>
    %211 = arith.addf %189, %210 : vector<1x256xf32>
    %212 = vector.extract_strided_slice %191 {offsets = [0, 81], sizes = [1, 256], strides = [1, 1]} : vector<1x384xf32> to vector<1x256xf32>
    %c32 = arith.constant 32 : index
    %213 = memref.load %arg1[%c32] : memref<98xf32, #tpu.memory_space<smem>>
    %214 = vector.broadcast %213 : f32 to vector<1x256xf32>
    %215 = arith.mulf %214, %212 : vector<1x256xf32>
    %216 = arith.addf %196, %215 : vector<1x256xf32>
    %217 = vector.extract_strided_slice %191 {offsets = [0, 97], sizes = [1, 256], strides = [1, 1]} : vector<1x384xf32> to vector<1x256xf32>
    %c39 = arith.constant 39 : index
    %218 = memref.load %arg1[%c39] : memref<98xf32, #tpu.memory_space<smem>>
    %219 = vector.broadcast %218 : f32 to vector<1x256xf32>
    %220 = arith.mulf %219, %217 : vector<1x256xf32>
    %221 = arith.addf %201, %220 : vector<1x256xf32>
    %222 = vector.extract_strided_slice %191 {offsets = [0, 113], sizes = [1, 256], strides = [1, 1]} : vector<1x384xf32> to vector<1x256xf32>
    %c46 = arith.constant 46 : index
    %223 = memref.load %arg1[%c46] : memref<98xf32, #tpu.memory_space<smem>>
    %224 = vector.broadcast %223 : f32 to vector<1x256xf32>
    %225 = arith.mulf %224, %222 : vector<1x256xf32>
    %226 = arith.addf %206, %225 : vector<1x256xf32>
    %cst_36 = arith.constant 0.000000e+00 : f32
    %227 = vector.broadcast %cst_36 : f32 to vector<1x384xf32>
    %228 = arith.select %37, %23, %227 : vector<1x384xi1>, vector<1x384xf32>
    %229 = vector.extract_strided_slice %228 {offsets = [0, 18], sizes = [1, 256], strides = [1, 1]} : vector<1x384xf32> to vector<1x256xf32>
    %c5 = arith.constant 5 : index
    %230 = memref.load %arg1[%c5] : memref<98xf32, #tpu.memory_space<smem>>
    %231 = vector.broadcast %230 : f32 to vector<1x256xf32>
    %232 = arith.mulf %231, %229 : vector<1x256xf32>
    %233 = arith.addf %211, %232 : vector<1x256xf32>
    %234 = vector.extract_strided_slice %228 {offsets = [0, 34], sizes = [1, 256], strides = [1, 1]} : vector<1x384xf32> to vector<1x256xf32>
    %c12 = arith.constant 12 : index
    %235 = memref.load %arg1[%c12] : memref<98xf32, #tpu.memory_space<smem>>
    %236 = vector.broadcast %235 : f32 to vector<1x256xf32>
    %237 = arith.mulf %236, %234 : vector<1x256xf32>
    %238 = arith.addf %216, %237 : vector<1x256xf32>
    %239 = vector.extract_strided_slice %228 {offsets = [0, 50], sizes = [1, 256], strides = [1, 1]} : vector<1x384xf32> to vector<1x256xf32>
    %c19 = arith.constant 19 : index
    %240 = memref.load %arg1[%c19] : memref<98xf32, #tpu.memory_space<smem>>
    %241 = vector.broadcast %240 : f32 to vector<1x256xf32>
    %242 = arith.mulf %241, %239 : vector<1x256xf32>
    %243 = arith.addf %221, %242 : vector<1x256xf32>
    %244 = vector.extract_strided_slice %228 {offsets = [0, 66], sizes = [1, 256], strides = [1, 1]} : vector<1x384xf32> to vector<1x256xf32>
    %c26 = arith.constant 26 : index
    %245 = memref.load %arg1[%c26] : memref<98xf32, #tpu.memory_space<smem>>
    %246 = vector.broadcast %245 : f32 to vector<1x256xf32>
    %247 = arith.mulf %246, %244 : vector<1x256xf32>
    %248 = arith.addf %226, %247 : vector<1x256xf32>
    %249 = vector.extract_strided_slice %228 {offsets = [0, 82], sizes = [1, 256], strides = [1, 1]} : vector<1x384xf32> to vector<1x256xf32>
    %c33 = arith.constant 33 : index
    %250 = memref.load %arg1[%c33] : memref<98xf32, #tpu.memory_space<smem>>
    %251 = vector.broadcast %250 : f32 to vector<1x256xf32>
    %252 = arith.mulf %251, %249 : vector<1x256xf32>
    %253 = arith.addf %233, %252 : vector<1x256xf32>
    %254 = vector.extract_strided_slice %228 {offsets = [0, 98], sizes = [1, 256], strides = [1, 1]} : vector<1x384xf32> to vector<1x256xf32>
    %c40 = arith.constant 40 : index
    %255 = memref.load %arg1[%c40] : memref<98xf32, #tpu.memory_space<smem>>
    %256 = vector.broadcast %255 : f32 to vector<1x256xf32>
    %257 = arith.mulf %256, %254 : vector<1x256xf32>
    %258 = arith.addf %238, %257 : vector<1x256xf32>
    %259 = vector.extract_strided_slice %228 {offsets = [0, 114], sizes = [1, 256], strides = [1, 1]} : vector<1x384xf32> to vector<1x256xf32>
    %c47 = arith.constant 47 : index
    %260 = memref.load %arg1[%c47] : memref<98xf32, #tpu.memory_space<smem>>
    %261 = vector.broadcast %260 : f32 to vector<1x256xf32>
    %262 = arith.mulf %261, %259 : vector<1x256xf32>
    %263 = arith.addf %243, %262 : vector<1x256xf32>
    %cst_37 = arith.constant 0.000000e+00 : f32
    %264 = vector.broadcast %cst_37 : f32 to vector<1x384xf32>
    %265 = arith.select %39, %23, %264 : vector<1x384xi1>, vector<1x384xf32>
    %266 = vector.extract_strided_slice %265 {offsets = [0, 19], sizes = [1, 256], strides = [1, 1]} : vector<1x384xf32> to vector<1x256xf32>
    %c6 = arith.constant 6 : index
    %267 = memref.load %arg1[%c6] : memref<98xf32, #tpu.memory_space<smem>>
    %268 = vector.broadcast %267 : f32 to vector<1x256xf32>
    %269 = arith.mulf %268, %266 : vector<1x256xf32>
    %270 = arith.addf %248, %269 : vector<1x256xf32>
    %271 = vector.extract_strided_slice %265 {offsets = [0, 35], sizes = [1, 256], strides = [1, 1]} : vector<1x384xf32> to vector<1x256xf32>
    %c13 = arith.constant 13 : index
    %272 = memref.load %arg1[%c13] : memref<98xf32, #tpu.memory_space<smem>>
    %273 = vector.broadcast %272 : f32 to vector<1x256xf32>
    %274 = arith.mulf %273, %271 : vector<1x256xf32>
    %275 = arith.addf %253, %274 : vector<1x256xf32>
    %276 = vector.extract_strided_slice %265 {offsets = [0, 51], sizes = [1, 256], strides = [1, 1]} : vector<1x384xf32> to vector<1x256xf32>
    %c20 = arith.constant 20 : index
    %277 = memref.load %arg1[%c20] : memref<98xf32, #tpu.memory_space<smem>>
    %278 = vector.broadcast %277 : f32 to vector<1x256xf32>
    %279 = arith.mulf %278, %276 : vector<1x256xf32>
    %280 = arith.addf %258, %279 : vector<1x256xf32>
    %281 = vector.extract_strided_slice %265 {offsets = [0, 67], sizes = [1, 256], strides = [1, 1]} : vector<1x384xf32> to vector<1x256xf32>
    %c27 = arith.constant 27 : index
    %282 = memref.load %arg1[%c27] : memref<98xf32, #tpu.memory_space<smem>>
    %283 = vector.broadcast %282 : f32 to vector<1x256xf32>
    %284 = arith.mulf %283, %281 : vector<1x256xf32>
    %285 = arith.addf %263, %284 : vector<1x256xf32>
    %286 = vector.extract_strided_slice %265 {offsets = [0, 83], sizes = [1, 256], strides = [1, 1]} : vector<1x384xf32> to vector<1x256xf32>
    %c34 = arith.constant 34 : index
    %287 = memref.load %arg1[%c34] : memref<98xf32, #tpu.memory_space<smem>>
    %288 = vector.broadcast %287 : f32 to vector<1x256xf32>
    %289 = arith.mulf %288, %286 : vector<1x256xf32>
    %290 = arith.addf %270, %289 : vector<1x256xf32>
    %291 = vector.extract_strided_slice %265 {offsets = [0, 99], sizes = [1, 256], strides = [1, 1]} : vector<1x384xf32> to vector<1x256xf32>
    %c41 = arith.constant 41 : index
    %292 = memref.load %arg1[%c41] : memref<98xf32, #tpu.memory_space<smem>>
    %293 = vector.broadcast %292 : f32 to vector<1x256xf32>
    %294 = arith.mulf %293, %291 : vector<1x256xf32>
    %295 = arith.addf %275, %294 : vector<1x256xf32>
    %296 = vector.extract_strided_slice %265 {offsets = [0, 115], sizes = [1, 256], strides = [1, 1]} : vector<1x384xf32> to vector<1x256xf32>
    %c48 = arith.constant 48 : index
    %297 = memref.load %arg1[%c48] : memref<98xf32, #tpu.memory_space<smem>>
    %298 = vector.broadcast %297 : f32 to vector<1x256xf32>
    %299 = arith.mulf %298, %296 : vector<1x256xf32>
    %300 = arith.addf %280, %299 : vector<1x256xf32>
    %cst_38 = arith.constant 0.000000e+00 : f32
    %301 = vector.broadcast %cst_38 : f32 to vector<1x384xf32>
    %302 = arith.select %29, %24, %301 : vector<1x384xi1>, vector<1x384xf32>
    %303 = vector.extract_strided_slice %302 {offsets = [0, 13], sizes = [1, 256], strides = [1, 1]} : vector<1x384xf32> to vector<1x256xf32>
    %c49 = arith.constant 49 : index
    %304 = memref.load %arg1[%c49] : memref<98xf32, #tpu.memory_space<smem>>
    %305 = vector.broadcast %304 : f32 to vector<1x256xf32>
    %306 = arith.mulf %305, %303 : vector<1x256xf32>
    %307 = arith.addf %285, %306 : vector<1x256xf32>
    %308 = vector.extract_strided_slice %302 {offsets = [0, 29], sizes = [1, 256], strides = [1, 1]} : vector<1x384xf32> to vector<1x256xf32>
    %c56 = arith.constant 56 : index
    %309 = memref.load %arg1[%c56] : memref<98xf32, #tpu.memory_space<smem>>
    %310 = vector.broadcast %309 : f32 to vector<1x256xf32>
    %311 = arith.mulf %310, %308 : vector<1x256xf32>
    %312 = arith.addf %290, %311 : vector<1x256xf32>
    %313 = vector.extract_strided_slice %302 {offsets = [0, 45], sizes = [1, 256], strides = [1, 1]} : vector<1x384xf32> to vector<1x256xf32>
    %c63 = arith.constant 63 : index
    %314 = memref.load %arg1[%c63] : memref<98xf32, #tpu.memory_space<smem>>
    %315 = vector.broadcast %314 : f32 to vector<1x256xf32>
    %316 = arith.mulf %315, %313 : vector<1x256xf32>
    %317 = arith.addf %295, %316 : vector<1x256xf32>
    %318 = vector.extract_strided_slice %302 {offsets = [0, 61], sizes = [1, 256], strides = [1, 1]} : vector<1x384xf32> to vector<1x256xf32>
    %c70 = arith.constant 70 : index
    %319 = memref.load %arg1[%c70] : memref<98xf32, #tpu.memory_space<smem>>
    %320 = vector.broadcast %319 : f32 to vector<1x256xf32>
    %321 = arith.mulf %320, %318 : vector<1x256xf32>
    %322 = arith.addf %300, %321 : vector<1x256xf32>
    %323 = vector.extract_strided_slice %302 {offsets = [0, 77], sizes = [1, 256], strides = [1, 1]} : vector<1x384xf32> to vector<1x256xf32>
    %c77 = arith.constant 77 : index
    %324 = memref.load %arg1[%c77] : memref<98xf32, #tpu.memory_space<smem>>
    %325 = vector.broadcast %324 : f32 to vector<1x256xf32>
    %326 = arith.mulf %325, %323 : vector<1x256xf32>
    %327 = arith.addf %307, %326 : vector<1x256xf32>
    %328 = vector.extract_strided_slice %302 {offsets = [0, 93], sizes = [1, 256], strides = [1, 1]} : vector<1x384xf32> to vector<1x256xf32>
    %c84 = arith.constant 84 : index
    %329 = memref.load %arg1[%c84] : memref<98xf32, #tpu.memory_space<smem>>
    %330 = vector.broadcast %329 : f32 to vector<1x256xf32>
    %331 = arith.mulf %330, %328 : vector<1x256xf32>
    %332 = arith.addf %312, %331 : vector<1x256xf32>
    %333 = vector.extract_strided_slice %302 {offsets = [0, 109], sizes = [1, 256], strides = [1, 1]} : vector<1x384xf32> to vector<1x256xf32>
    %c91 = arith.constant 91 : index
    %334 = memref.load %arg1[%c91] : memref<98xf32, #tpu.memory_space<smem>>
    %335 = vector.broadcast %334 : f32 to vector<1x256xf32>
    %336 = arith.mulf %335, %333 : vector<1x256xf32>
    %337 = arith.addf %317, %336 : vector<1x256xf32>
    %cst_39 = arith.constant 0.000000e+00 : f32
    %338 = vector.broadcast %cst_39 : f32 to vector<1x384xf32>
    %339 = arith.select %31, %24, %338 : vector<1x384xi1>, vector<1x384xf32>
    %340 = vector.extract_strided_slice %339 {offsets = [0, 14], sizes = [1, 256], strides = [1, 1]} : vector<1x384xf32> to vector<1x256xf32>
    %c50 = arith.constant 50 : index
    %341 = memref.load %arg1[%c50] : memref<98xf32, #tpu.memory_space<smem>>
    %342 = vector.broadcast %341 : f32 to vector<1x256xf32>
    %343 = arith.mulf %342, %340 : vector<1x256xf32>
    %344 = arith.addf %322, %343 : vector<1x256xf32>
    %345 = vector.extract_strided_slice %339 {offsets = [0, 30], sizes = [1, 256], strides = [1, 1]} : vector<1x384xf32> to vector<1x256xf32>
    %c57 = arith.constant 57 : index
    %346 = memref.load %arg1[%c57] : memref<98xf32, #tpu.memory_space<smem>>
    %347 = vector.broadcast %346 : f32 to vector<1x256xf32>
    %348 = arith.mulf %347, %345 : vector<1x256xf32>
    %349 = arith.addf %327, %348 : vector<1x256xf32>
    %350 = vector.extract_strided_slice %339 {offsets = [0, 46], sizes = [1, 256], strides = [1, 1]} : vector<1x384xf32> to vector<1x256xf32>
    %c64_40 = arith.constant 64 : index
    %351 = memref.load %arg1[%c64_40] : memref<98xf32, #tpu.memory_space<smem>>
    %352 = vector.broadcast %351 : f32 to vector<1x256xf32>
    %353 = arith.mulf %352, %350 : vector<1x256xf32>
    %354 = arith.addf %332, %353 : vector<1x256xf32>
    %355 = vector.extract_strided_slice %339 {offsets = [0, 62], sizes = [1, 256], strides = [1, 1]} : vector<1x384xf32> to vector<1x256xf32>
    %c71 = arith.constant 71 : index
    %356 = memref.load %arg1[%c71] : memref<98xf32, #tpu.memory_space<smem>>
    %357 = vector.broadcast %356 : f32 to vector<1x256xf32>
    %358 = arith.mulf %357, %355 : vector<1x256xf32>
    %359 = arith.addf %337, %358 : vector<1x256xf32>
    %360 = vector.extract_strided_slice %339 {offsets = [0, 78], sizes = [1, 256], strides = [1, 1]} : vector<1x384xf32> to vector<1x256xf32>
    %c78 = arith.constant 78 : index
    %361 = memref.load %arg1[%c78] : memref<98xf32, #tpu.memory_space<smem>>
    %362 = vector.broadcast %361 : f32 to vector<1x256xf32>
    %363 = arith.mulf %362, %360 : vector<1x256xf32>
    %364 = arith.addf %344, %363 : vector<1x256xf32>
    %365 = vector.extract_strided_slice %339 {offsets = [0, 94], sizes = [1, 256], strides = [1, 1]} : vector<1x384xf32> to vector<1x256xf32>
    %c85 = arith.constant 85 : index
    %366 = memref.load %arg1[%c85] : memref<98xf32, #tpu.memory_space<smem>>
    %367 = vector.broadcast %366 : f32 to vector<1x256xf32>
    %368 = arith.mulf %367, %365 : vector<1x256xf32>
    %369 = arith.addf %349, %368 : vector<1x256xf32>
    %370 = vector.extract_strided_slice %339 {offsets = [0, 110], sizes = [1, 256], strides = [1, 1]} : vector<1x384xf32> to vector<1x256xf32>
    %c92 = arith.constant 92 : index
    %371 = memref.load %arg1[%c92] : memref<98xf32, #tpu.memory_space<smem>>
    %372 = vector.broadcast %371 : f32 to vector<1x256xf32>
    %373 = arith.mulf %372, %370 : vector<1x256xf32>
    %374 = arith.addf %354, %373 : vector<1x256xf32>
    %cst_41 = arith.constant 0.000000e+00 : f32
    %375 = vector.broadcast %cst_41 : f32 to vector<1x384xf32>
    %376 = arith.select %33, %24, %375 : vector<1x384xi1>, vector<1x384xf32>
    %377 = vector.extract_strided_slice %376 {offsets = [0, 15], sizes = [1, 256], strides = [1, 1]} : vector<1x384xf32> to vector<1x256xf32>
    %c51 = arith.constant 51 : index
    %378 = memref.load %arg1[%c51] : memref<98xf32, #tpu.memory_space<smem>>
    %379 = vector.broadcast %378 : f32 to vector<1x256xf32>
    %380 = arith.mulf %379, %377 : vector<1x256xf32>
    %381 = arith.addf %359, %380 : vector<1x256xf32>
    %382 = vector.extract_strided_slice %376 {offsets = [0, 31], sizes = [1, 256], strides = [1, 1]} : vector<1x384xf32> to vector<1x256xf32>
    %c58 = arith.constant 58 : index
    %383 = memref.load %arg1[%c58] : memref<98xf32, #tpu.memory_space<smem>>
    %384 = vector.broadcast %383 : f32 to vector<1x256xf32>
    %385 = arith.mulf %384, %382 : vector<1x256xf32>
    %386 = arith.addf %364, %385 : vector<1x256xf32>
    %387 = vector.extract_strided_slice %376 {offsets = [0, 47], sizes = [1, 256], strides = [1, 1]} : vector<1x384xf32> to vector<1x256xf32>
    %c65 = arith.constant 65 : index
    %388 = memref.load %arg1[%c65] : memref<98xf32, #tpu.memory_space<smem>>
    %389 = vector.broadcast %388 : f32 to vector<1x256xf32>
    %390 = arith.mulf %389, %387 : vector<1x256xf32>
    %391 = arith.addf %369, %390 : vector<1x256xf32>
    %392 = vector.extract_strided_slice %376 {offsets = [0, 63], sizes = [1, 256], strides = [1, 1]} : vector<1x384xf32> to vector<1x256xf32>
    %c72 = arith.constant 72 : index
    %393 = memref.load %arg1[%c72] : memref<98xf32, #tpu.memory_space<smem>>
    %394 = vector.broadcast %393 : f32 to vector<1x256xf32>
    %395 = arith.mulf %394, %392 : vector<1x256xf32>
    %396 = arith.addf %374, %395 : vector<1x256xf32>
    %397 = vector.extract_strided_slice %376 {offsets = [0, 79], sizes = [1, 256], strides = [1, 1]} : vector<1x384xf32> to vector<1x256xf32>
    %c79 = arith.constant 79 : index
    %398 = memref.load %arg1[%c79] : memref<98xf32, #tpu.memory_space<smem>>
    %399 = vector.broadcast %398 : f32 to vector<1x256xf32>
    %400 = arith.mulf %399, %397 : vector<1x256xf32>
    %401 = arith.addf %381, %400 : vector<1x256xf32>
    %402 = vector.extract_strided_slice %376 {offsets = [0, 95], sizes = [1, 256], strides = [1, 1]} : vector<1x384xf32> to vector<1x256xf32>
    %c86 = arith.constant 86 : index
    %403 = memref.load %arg1[%c86] : memref<98xf32, #tpu.memory_space<smem>>
    %404 = vector.broadcast %403 : f32 to vector<1x256xf32>
    %405 = arith.mulf %404, %402 : vector<1x256xf32>
    %406 = arith.addf %386, %405 : vector<1x256xf32>
    %407 = vector.extract_strided_slice %376 {offsets = [0, 111], sizes = [1, 256], strides = [1, 1]} : vector<1x384xf32> to vector<1x256xf32>
    %c93 = arith.constant 93 : index
    %408 = memref.load %arg1[%c93] : memref<98xf32, #tpu.memory_space<smem>>
    %409 = vector.broadcast %408 : f32 to vector<1x256xf32>
    %410 = arith.mulf %409, %407 : vector<1x256xf32>
    %411 = arith.addf %391, %410 : vector<1x256xf32>
    %412 = vector.extract_strided_slice %24 {offsets = [0, 16], sizes = [1, 256], strides = [1, 1]} : vector<1x384xf32> to vector<1x256xf32>
    %c52 = arith.constant 52 : index
    %413 = memref.load %arg1[%c52] : memref<98xf32, #tpu.memory_space<smem>>
    %414 = vector.broadcast %413 : f32 to vector<1x256xf32>
    %415 = arith.mulf %414, %412 : vector<1x256xf32>
    %416 = arith.addf %396, %415 : vector<1x256xf32>
    %417 = vector.extract_strided_slice %24 {offsets = [0, 32], sizes = [1, 256], strides = [1, 1]} : vector<1x384xf32> to vector<1x256xf32>
    %c59 = arith.constant 59 : index
    %418 = memref.load %arg1[%c59] : memref<98xf32, #tpu.memory_space<smem>>
    %419 = vector.broadcast %418 : f32 to vector<1x256xf32>
    %420 = arith.mulf %419, %417 : vector<1x256xf32>
    %421 = arith.addf %401, %420 : vector<1x256xf32>
    %422 = vector.extract_strided_slice %24 {offsets = [0, 48], sizes = [1, 256], strides = [1, 1]} : vector<1x384xf32> to vector<1x256xf32>
    %c66 = arith.constant 66 : index
    %423 = memref.load %arg1[%c66] : memref<98xf32, #tpu.memory_space<smem>>
    %424 = vector.broadcast %423 : f32 to vector<1x256xf32>
    %425 = arith.mulf %424, %422 : vector<1x256xf32>
    %426 = arith.addf %406, %425 : vector<1x256xf32>
    %427 = vector.extract_strided_slice %24 {offsets = [0, 64], sizes = [1, 256], strides = [1, 1]} : vector<1x384xf32> to vector<1x256xf32>
    %c73 = arith.constant 73 : index
    %428 = memref.load %arg1[%c73] : memref<98xf32, #tpu.memory_space<smem>>
    %429 = vector.broadcast %428 : f32 to vector<1x256xf32>
    %430 = arith.mulf %429, %427 : vector<1x256xf32>
    %431 = arith.addf %411, %430 : vector<1x256xf32>
    %432 = vector.extract_strided_slice %24 {offsets = [0, 80], sizes = [1, 256], strides = [1, 1]} : vector<1x384xf32> to vector<1x256xf32>
    %c80 = arith.constant 80 : index
    %433 = memref.load %arg1[%c80] : memref<98xf32, #tpu.memory_space<smem>>
    %434 = vector.broadcast %433 : f32 to vector<1x256xf32>
    %435 = arith.mulf %434, %432 : vector<1x256xf32>
    %436 = arith.addf %416, %435 : vector<1x256xf32>
    %437 = vector.extract_strided_slice %24 {offsets = [0, 96], sizes = [1, 256], strides = [1, 1]} : vector<1x384xf32> to vector<1x256xf32>
    %c87 = arith.constant 87 : index
    %438 = memref.load %arg1[%c87] : memref<98xf32, #tpu.memory_space<smem>>
    %439 = vector.broadcast %438 : f32 to vector<1x256xf32>
    %440 = arith.mulf %439, %437 : vector<1x256xf32>
    %441 = arith.addf %421, %440 : vector<1x256xf32>
    %442 = vector.extract_strided_slice %24 {offsets = [0, 112], sizes = [1, 256], strides = [1, 1]} : vector<1x384xf32> to vector<1x256xf32>
    %c94 = arith.constant 94 : index
    %443 = memref.load %arg1[%c94] : memref<98xf32, #tpu.memory_space<smem>>
    %444 = vector.broadcast %443 : f32 to vector<1x256xf32>
    %445 = arith.mulf %444, %442 : vector<1x256xf32>
    %446 = arith.addf %426, %445 : vector<1x256xf32>
    %cst_42 = arith.constant 0.000000e+00 : f32
    %447 = vector.broadcast %cst_42 : f32 to vector<1x384xf32>
    %448 = arith.select %35, %24, %447 : vector<1x384xi1>, vector<1x384xf32>
    %449 = vector.extract_strided_slice %448 {offsets = [0, 17], sizes = [1, 256], strides = [1, 1]} : vector<1x384xf32> to vector<1x256xf32>
    %c53 = arith.constant 53 : index
    %450 = memref.load %arg1[%c53] : memref<98xf32, #tpu.memory_space<smem>>
    %451 = vector.broadcast %450 : f32 to vector<1x256xf32>
    %452 = arith.mulf %451, %449 : vector<1x256xf32>
    %453 = arith.addf %431, %452 : vector<1x256xf32>
    %454 = vector.extract_strided_slice %448 {offsets = [0, 33], sizes = [1, 256], strides = [1, 1]} : vector<1x384xf32> to vector<1x256xf32>
    %c60 = arith.constant 60 : index
    %455 = memref.load %arg1[%c60] : memref<98xf32, #tpu.memory_space<smem>>
    %456 = vector.broadcast %455 : f32 to vector<1x256xf32>
    %457 = arith.mulf %456, %454 : vector<1x256xf32>
    %458 = arith.addf %436, %457 : vector<1x256xf32>
    %459 = vector.extract_strided_slice %448 {offsets = [0, 49], sizes = [1, 256], strides = [1, 1]} : vector<1x384xf32> to vector<1x256xf32>
    %c67 = arith.constant 67 : index
    %460 = memref.load %arg1[%c67] : memref<98xf32, #tpu.memory_space<smem>>
    %461 = vector.broadcast %460 : f32 to vector<1x256xf32>
    %462 = arith.mulf %461, %459 : vector<1x256xf32>
    %463 = arith.addf %441, %462 : vector<1x256xf32>
    %464 = vector.extract_strided_slice %448 {offsets = [0, 65], sizes = [1, 256], strides = [1, 1]} : vector<1x384xf32> to vector<1x256xf32>
    %c74 = arith.constant 74 : index
    %465 = memref.load %arg1[%c74] : memref<98xf32, #tpu.memory_space<smem>>
    %466 = vector.broadcast %465 : f32 to vector<1x256xf32>
    %467 = arith.mulf %466, %464 : vector<1x256xf32>
    %468 = arith.addf %446, %467 : vector<1x256xf32>
    %469 = vector.extract_strided_slice %448 {offsets = [0, 81], sizes = [1, 256], strides = [1, 1]} : vector<1x384xf32> to vector<1x256xf32>
    %c81 = arith.constant 81 : index
    %470 = memref.load %arg1[%c81] : memref<98xf32, #tpu.memory_space<smem>>
    %471 = vector.broadcast %470 : f32 to vector<1x256xf32>
    %472 = arith.mulf %471, %469 : vector<1x256xf32>
    %473 = arith.addf %453, %472 : vector<1x256xf32>
    %474 = vector.extract_strided_slice %448 {offsets = [0, 97], sizes = [1, 256], strides = [1, 1]} : vector<1x384xf32> to vector<1x256xf32>
    %c88 = arith.constant 88 : index
    %475 = memref.load %arg1[%c88] : memref<98xf32, #tpu.memory_space<smem>>
    %476 = vector.broadcast %475 : f32 to vector<1x256xf32>
    %477 = arith.mulf %476, %474 : vector<1x256xf32>
    %478 = arith.addf %458, %477 : vector<1x256xf32>
    %479 = vector.extract_strided_slice %448 {offsets = [0, 113], sizes = [1, 256], strides = [1, 1]} : vector<1x384xf32> to vector<1x256xf32>
    %c95 = arith.constant 95 : index
    %480 = memref.load %arg1[%c95] : memref<98xf32, #tpu.memory_space<smem>>
    %481 = vector.broadcast %480 : f32 to vector<1x256xf32>
    %482 = arith.mulf %481, %479 : vector<1x256xf32>
    %483 = arith.addf %463, %482 : vector<1x256xf32>
    %cst_43 = arith.constant 0.000000e+00 : f32
    %484 = vector.broadcast %cst_43 : f32 to vector<1x384xf32>
    %485 = arith.select %37, %24, %484 : vector<1x384xi1>, vector<1x384xf32>
    %486 = vector.extract_strided_slice %485 {offsets = [0, 18], sizes = [1, 256], strides = [1, 1]} : vector<1x384xf32> to vector<1x256xf32>
    %c54 = arith.constant 54 : index
    %487 = memref.load %arg1[%c54] : memref<98xf32, #tpu.memory_space<smem>>
    %488 = vector.broadcast %487 : f32 to vector<1x256xf32>
    %489 = arith.mulf %488, %486 : vector<1x256xf32>
    %490 = arith.addf %468, %489 : vector<1x256xf32>
    %491 = vector.extract_strided_slice %485 {offsets = [0, 34], sizes = [1, 256], strides = [1, 1]} : vector<1x384xf32> to vector<1x256xf32>
    %c61 = arith.constant 61 : index
    %492 = memref.load %arg1[%c61] : memref<98xf32, #tpu.memory_space<smem>>
    %493 = vector.broadcast %492 : f32 to vector<1x256xf32>
    %494 = arith.mulf %493, %491 : vector<1x256xf32>
    %495 = arith.addf %473, %494 : vector<1x256xf32>
    %496 = vector.extract_strided_slice %485 {offsets = [0, 50], sizes = [1, 256], strides = [1, 1]} : vector<1x384xf32> to vector<1x256xf32>
    %c68 = arith.constant 68 : index
    %497 = memref.load %arg1[%c68] : memref<98xf32, #tpu.memory_space<smem>>
    %498 = vector.broadcast %497 : f32 to vector<1x256xf32>
    %499 = arith.mulf %498, %496 : vector<1x256xf32>
    %500 = arith.addf %478, %499 : vector<1x256xf32>
    %501 = vector.extract_strided_slice %485 {offsets = [0, 66], sizes = [1, 256], strides = [1, 1]} : vector<1x384xf32> to vector<1x256xf32>
    %c75 = arith.constant 75 : index
    %502 = memref.load %arg1[%c75] : memref<98xf32, #tpu.memory_space<smem>>
    %503 = vector.broadcast %502 : f32 to vector<1x256xf32>
    %504 = arith.mulf %503, %501 : vector<1x256xf32>
    %505 = arith.addf %483, %504 : vector<1x256xf32>
    %506 = vector.extract_strided_slice %485 {offsets = [0, 82], sizes = [1, 256], strides = [1, 1]} : vector<1x384xf32> to vector<1x256xf32>
    %c82 = arith.constant 82 : index
    %507 = memref.load %arg1[%c82] : memref<98xf32, #tpu.memory_space<smem>>
    %508 = vector.broadcast %507 : f32 to vector<1x256xf32>
    %509 = arith.mulf %508, %506 : vector<1x256xf32>
    %510 = arith.addf %490, %509 : vector<1x256xf32>
    %511 = vector.extract_strided_slice %485 {offsets = [0, 98], sizes = [1, 256], strides = [1, 1]} : vector<1x384xf32> to vector<1x256xf32>
    %c89 = arith.constant 89 : index
    %512 = memref.load %arg1[%c89] : memref<98xf32, #tpu.memory_space<smem>>
    %513 = vector.broadcast %512 : f32 to vector<1x256xf32>
    %514 = arith.mulf %513, %511 : vector<1x256xf32>
    %515 = arith.addf %495, %514 : vector<1x256xf32>
    %516 = vector.extract_strided_slice %485 {offsets = [0, 114], sizes = [1, 256], strides = [1, 1]} : vector<1x384xf32> to vector<1x256xf32>
    %c96 = arith.constant 96 : index
    %517 = memref.load %arg1[%c96] : memref<98xf32, #tpu.memory_space<smem>>
    %518 = vector.broadcast %517 : f32 to vector<1x256xf32>
    %519 = arith.mulf %518, %516 : vector<1x256xf32>
    %520 = arith.addf %500, %519 : vector<1x256xf32>
    %cst_44 = arith.constant 0.000000e+00 : f32
    %521 = vector.broadcast %cst_44 : f32 to vector<1x384xf32>
    %522 = arith.select %39, %24, %521 : vector<1x384xi1>, vector<1x384xf32>
    %523 = vector.extract_strided_slice %522 {offsets = [0, 19], sizes = [1, 256], strides = [1, 1]} : vector<1x384xf32> to vector<1x256xf32>
    %c55 = arith.constant 55 : index
    %524 = memref.load %arg1[%c55] : memref<98xf32, #tpu.memory_space<smem>>
    %525 = vector.broadcast %524 : f32 to vector<1x256xf32>
    %526 = arith.mulf %525, %523 : vector<1x256xf32>
    %527 = arith.addf %505, %526 : vector<1x256xf32>
    %528 = vector.extract_strided_slice %522 {offsets = [0, 35], sizes = [1, 256], strides = [1, 1]} : vector<1x384xf32> to vector<1x256xf32>
    %c62 = arith.constant 62 : index
    %529 = memref.load %arg1[%c62] : memref<98xf32, #tpu.memory_space<smem>>
    %530 = vector.broadcast %529 : f32 to vector<1x256xf32>
    %531 = arith.mulf %530, %528 : vector<1x256xf32>
    %532 = arith.addf %510, %531 : vector<1x256xf32>
    %533 = vector.extract_strided_slice %522 {offsets = [0, 51], sizes = [1, 256], strides = [1, 1]} : vector<1x384xf32> to vector<1x256xf32>
    %c69 = arith.constant 69 : index
    %534 = memref.load %arg1[%c69] : memref<98xf32, #tpu.memory_space<smem>>
    %535 = vector.broadcast %534 : f32 to vector<1x256xf32>
    %536 = arith.mulf %535, %533 : vector<1x256xf32>
    %537 = arith.addf %515, %536 : vector<1x256xf32>
    %538 = vector.extract_strided_slice %522 {offsets = [0, 67], sizes = [1, 256], strides = [1, 1]} : vector<1x384xf32> to vector<1x256xf32>
    %c76 = arith.constant 76 : index
    %539 = memref.load %arg1[%c76] : memref<98xf32, #tpu.memory_space<smem>>
    %540 = vector.broadcast %539 : f32 to vector<1x256xf32>
    %541 = arith.mulf %540, %538 : vector<1x256xf32>
    %542 = arith.addf %520, %541 : vector<1x256xf32>
    %543 = vector.extract_strided_slice %522 {offsets = [0, 83], sizes = [1, 256], strides = [1, 1]} : vector<1x384xf32> to vector<1x256xf32>
    %c83 = arith.constant 83 : index
    %544 = memref.load %arg1[%c83] : memref<98xf32, #tpu.memory_space<smem>>
    %545 = vector.broadcast %544 : f32 to vector<1x256xf32>
    %546 = arith.mulf %545, %543 : vector<1x256xf32>
    %547 = arith.addf %527, %546 : vector<1x256xf32>
    %548 = vector.extract_strided_slice %522 {offsets = [0, 99], sizes = [1, 256], strides = [1, 1]} : vector<1x384xf32> to vector<1x256xf32>
    %c90 = arith.constant 90 : index
    %549 = memref.load %arg1[%c90] : memref<98xf32, #tpu.memory_space<smem>>
    %550 = vector.broadcast %549 : f32 to vector<1x256xf32>
    %551 = arith.mulf %550, %548 : vector<1x256xf32>
    %552 = arith.addf %532, %551 : vector<1x256xf32>
    %553 = vector.extract_strided_slice %522 {offsets = [0, 115], sizes = [1, 256], strides = [1, 1]} : vector<1x384xf32> to vector<1x256xf32>
    %c97 = arith.constant 97 : index
    %554 = memref.load %arg1[%c97] : memref<98xf32, #tpu.memory_space<smem>>
    %555 = vector.broadcast %554 : f32 to vector<1x256xf32>
    %556 = arith.mulf %555, %553 : vector<1x256xf32>
    %557 = arith.addf %537, %556 : vector<1x256xf32>
    %558 = arith.addf %552, %557 : vector<1x256xf32>
    %559 = arith.addf %542, %547 : vector<1x256xf32>
    %560 = arith.addf %558, %559 : vector<1x256xf32>
    %561 = arith.negf %560 : vector<1x256xf32>
    %562 = math.exp %561 : vector<1x256xf32>
    %cst_45 = arith.constant 1.000000e+00 : f32
    %563 = vector.broadcast %cst_45 : f32 to vector<1x256xf32>
    %564 = arith.addf %563, %562 : vector<1x256xf32>
    %565 = arith.divf %563, %564 : vector<1x256xf32>
    %c0_46 = arith.constant 0 : index
    %c0_47 = arith.constant 0 : index
    %c0_48 = arith.constant 0 : index
    %566 = vector.load %arg3[%c0_46, %c0_47, %c0_48] : memref<1x1x256xf32, #tpu.memory_space<vmem>>, vector<1x1x256xf32>
    %567 = vector.shape_cast %566 : vector<1x1x256xf32> to vector<1x256xf32>
    %568 = vector.shape_cast %565 : vector<1x256xf32> to vector<1x1x256xf32>
    tpu.vector_store %arg3[%c0_46, %c0_47, %c0_48], %568 {strides = array<i32>} : memref<1x1x256xf32, #tpu.memory_space<vmem>>, vector<1x1x256xf32>,
    return
  }
  func.func @transform_0(%arg0: i32) -> i32 {
    %c0_i32 = arith.constant 0 : i32
    %c0_i32_0 = arith.constant 0 : i32
    return %c0_i32 : i32
  }
  func.func @transform_1(%arg0: i32) -> (i32, i32, i32) {
    %c0_i32 = arith.constant 0 : i32
    %c0_i32_0 = arith.constant 0 : i32
    %c0_i32_1 = arith.constant 0 : i32
    return %arg0, %c0_i32, %c0_i32_0 : i32, i32, i32
  }
  func.func @transform_2(%arg0: i32) -> (i32, i32, i32) {
    %c0_i32 = arith.constant 0 : i32
    %c0_i32_0 = arith.constant 0 : i32
    %c0_i32_1 = arith.constant 0 : i32
    return %arg0, %c0_i32, %c0_i32_0 : i32, i32, i32
  }
}

</mosaic_0001>

<bundles_post_ra>
// kernel: tpu_custom_call.1
= control target key start
LH: loop header
LB: loop body
LE: loop exit
PB: predicated region body
PF: predicated region fallthrough
CT: control target
= control target key end

     0   :  { %7 = vsyncpa [#allocation7], 0  ;;  %s5081_s0 = inlined_call_operand.hbm [shape: f32[98], index: 0, kind: input, shape index: {}]   ;;  %s5082_s1 = inlined_call_operand.hbm [shape: f32[2,4,256], index: 1, kind: input, shape index: {}]   ;;  %s5083_s2 = inlined_call_operand.hbm [shape: f32[2,1,256], index: 2, kind: output, shape index: {}]  }
   0x1   :  { %8 = vsyncpa [#allocation5], 0 }
   0x2   :  { %10 = vsyncpa [#allocation5 + $0x1], 0 }
   0x3   :  { %11 = vsyncpa [#allocation6], 0 }
   0x4   :  { %13 = vsyncpa [#allocation6 + $0x1], 0  ;;  %s3133_s9 = smov 0   ;;  %s3135_s10 = smov 0  }
   0x5   :  { %s3137_s11 = smov 0   ;;  %s3139_s12 = smov 0  }
   0x6 LB: > { %s3154_s13 = sadd.s32 4294967295, %s3081_s12   ;;  %s2750_s14 = sadd.s32 4294967294, %s3081_s12   ;;  %s3081_s12 = sphi %s3139_s12, %s5342_s12   ;;  %s3077_s11 = sphi %s3137_s11, %s5341_s11   ;;  %s3073_s10 = sphi %s3135_s10, %s5340_s10   ;;  %s3069_s9 = sphi %s3133_s9, %s5339_s9  }
   0x7   : > { %p60_p0 = scmp.ne.s32.totalorder %s3073_s10, %s3069_s9  ;;  %p5084_p1 = scmp.eq.s32.totalorder %s3154_s13, 0 }
   0x8   : > { %p84_p2 = scmp.eq.s32.totalorder %s3154_s13, 1  ;;  %p90_p3 = scmp.eq.s32.totalorder %s2750_s14, 1 }
   0x9   : > { %p3163_p4 = por %p5084_p1, %p60_p0  ;;  %p2751_p5 = scmp.ge.s32.totalorder %s3081_s12, 1 }
   0xa   : > { %p3168_p6 = por %p90_p3, %p60_p0  ;;  %p97_p7 = scmp.lt.s32.totalorder %s3081_s12, 3 }
   0xb   : > { %s5163_s15 = scalar_select %p3163_p4, 1, 0 }
   0xc   : > { %s5164_s16 = scalar_select %p3168_p6, 1, 0 }
   0xd   : > { %p3173_p8 = pnand %p2751_p5, %p97_p7  ;;  %s3179_s18 = sadd.s32 1, %s3081_s12  }
   0xe   : > { %s44_s19 = ssub.s32 %s3081_s12, %s3179_s18  ;;  %s47_s20 = sadd.s32 1, %s3077_s11 }
   0xf   : > { %s5165_s17 = scalar_select %p3173_p8, 1, 0 }
  0x10   : > { %p2879_p10 = pneg %p3173_p8  ;;  %p45_p12 = scmp.eq.s32.totalorder %s44_s19, 0 }
  0x11   : > { %p54_p13 = scmp.ne.s32.totalorder %s3077_s11, %s3073_s10  ;;  %p55_p0 = scmp.eq.s32.totalorder %s3081_s12, 0 }
  0x12   : > { %p2880_p11 = pnand %p2879_p10, %p5084_p1  ;;  %p2892_p3 = scmp.lt.s32.totalorder %s3081_s12, 2 }
  0x13   : > { %s3083_s21 = smov [#allocation4]   ;;  %p56_p5 = por %p55_p0, %p54_p13 }
  0x14   : > { %2882 = dma.hbm_to_smem (!%p2880_p11), %s5081_s0, 16, %s3083_s21, [#allocation7]  }
  0x15   : > { %s3196_s24 = scalar_select %p45_p12, %s3077_s11, %s47_s20  }
  0x16   : > { %p3200_p7 = por %p84_p2, %p54_p13  ;;  %s119_s26 = sand.u32 1, %s3077_s11  }
  0x17   : > { %s2869_s27 = sshll.u32 %s3081_s12, 7  ;;  %s2754_s28 = sshll.u32 %s119_s26, 3 }
  0x18   : > { %s5166_s25 = scalar_select %p3200_p7, 1, 0 }
  0x19   : > { %s3209_s3 = scalar_lea.hbm %s5082_s1, %s2869_s27  ;;  %s123_s4 = scalar_lea.vmem [#allocation8], %s2754_s28 }
  0x1a   : > { %s131_s5 = sshll.u32 %s123_s4, 4  ;;  %p3211_p10 = pnand %p2892_p3, %p56_p5  ;;  %s132_s5 = int_to_ptr.vmem [resolvable:$true] %s131_s5 }
  0x1b   : > { %s120_s7 = scalar_lea.sflag [#allocation5], %s119_s26  ;;  %s2985_s8 = scalar_lea.hbm %s3209_s3, 128 }
  0x1c   : > { %p2986_p2 = scmp.ne.s32.totalorder %s3209_s3, %s2985_s8  ;;  %p2987_p11 = pneg %p3211_p10 }
  0x1d   : > { %s2990_s20 = scalar_lea.hbm %s5082_s1, 256  ;;  %p2991_p0 = scmp.lt.s32.totalorder %s3209_s3, %s5082_s1 }
  0x1e   : > { %p2988_p12 = pnand %p2987_p11, %p2986_p2  ;;  %p2992_p3 = scmp.lt.s32.totalorder %s2990_s20, %s2985_s8 }
  0x20   : > { %p2989_p13 = pneg %p2988_p12  ;;  %p2993_p5 = por %p2992_p3, %p2991_p0 }
  0x22   : > { %p2994_p9 = pnand %p2993_p5, %p2989_p13 }
  0x24   : > { %2997 = shalt.err (!%p2994_p9)
}
  0x25   : > { %s2998_s23 = scalar_lea.vmem %s132_s5, 128  ;;  %s3084_s26 = smov [#allocation8]  }
  0x26   : > { %p2999_p1 = scmp.ne.s32.totalorder %s132_s5, %s2998_s23  ;;  %s3003_s27 = sshll.u32 %s3084_s26, 4  ;;  %s3004_s27 = int_to_ptr.vmem [resolvable:$false] %s3003_s27 }
  0x27   : > { %s3005_s28 = scalar_lea.vmem %s3004_s27, 256  ;;  %p3006_p2 = scmp.lt.s32.totalorder %s132_s5, %s3004_s27 }
  0x28   : > { %p3001_p6 = pnand %p2999_p1, %p2987_p11  ;;  %p3007_p12 = scmp.lt.s32.totalorder %s3005_s28, %s2998_s23 }
  0x2a   : > { %p3002_p7 = pneg %p3001_p6  ;;  %p3008_p4 = por %p3007_p12, %p3006_p2 }
  0x2c   : > { %p3009_p8 = pnand %p3008_p4, %p3002_p7 }
  0x2e   : > { %3012 = shalt.err (!%p3009_p8)
}
  0x2f   : > { %2886 = dma.hbm_to_vmem [thread:$0]  (!%p3211_p10), %s3209_s3, 128, %s132_s5, %s120_s7  }
  0x30   : > { %p5168_p13 = scmp.ne.s32.totalorder %s5165_s17, 0 }
  0x32   : > { %140 = sbr.rel (%p5168_p13) target bundleno = 1112 (0x458), region = 28 }
  0x37   : > { %p5169_p9 = scmp.eq.s32.totalorder %s3154_s13, 0 }
  0x39   : > { %3056 = dma.done.wait (%p5169_p9), [#allocation7], 16   ;;  %p5170_p1 = pmov %p5169_p9 }
  0x3a   : > { %s3236_s29 = sand.u32 1, %s3073_s10   ;;  %p5171_p4 = scmp.ne.s32.totalorder %s5163_s15, 0 }
  0x3b   : > { %3058 = vsyncadd (%p5170_p1), [#allocation7], 4294967280  ;;  %s2759_s30 = sshll.u32 %s3236_s29, 3  ;;  %s147_s4 = scalar_lea.sflag [#allocation5], %s3236_s29 }
  0x3c   : > { %s150_s6 = scalar_lea.vmem [#allocation8], %s2759_s30 }
  0x3d   : > { %3060 = dma.done.wait (%p5171_p4), %s147_s4, 128  }
  0x3e   : > { %3062 = vsyncadd (%p5171_p4), %s147_s4, 4294967168 }
  0x3f   : > { %155 = sfence }
  0x40   : > { %v172_v0 = vld [vmem:[%s150_s6] ss:$4 sm:$0x3]  ;;  %v2761_v1 = vld [vmem:[%s150_s6 + $0x1] ss:$4 sm:$0x3]  ;;  %v5088_v2 = vlaneseq }
  0x41   : > { %v176_v3 = vmax.f32 %v172_v0, %v2761_v1  ;;  %v2762_v4 = vld [vmem:[%s150_s6 + $0x2] ss:$4 sm:$0x3]  ;;  %v2763_v5 = vld [vmem:[%s150_s6 + $0x3] ss:$4 sm:$0x3]  ;;  %v175_v6 = vadd.f32 %v2761_v1, %v172_v0 }
  0x42   : > { %vm188_vm0 = vcmp.lt.s32.totalorder %v5088_v2, 64  ;;  %vm3246_vm1 = vcmp.ge.s32.totalorder %v5088_v2, 64  ;;  %vm192_vm2 = vcmp.lt.s32.totalorder %v5088_v2, 128  ;;  %v3085_v10 = vmov 0.0   ;;  %s3086_s15 = smov 64   ;;  %s2784_s17 = sld [smem:[#allocation4 + $0x3]] }
  0x43   : > { %v180_v8 = vmax.f32 %v176_v3, %v2762_v4  ;;  %v179_v9 = vadd.f32 %v2762_v4, %v175_v6  ;;  %vm193_vm3 = vmand %vm3246_vm1, %vm192_vm2  ;;  %195 = vst.msk [vmem:[#allocation3] sm:$0x1] %vm188_vm0, %v3085_v10  ;;  %vm204_vm4 = vcmp.lt.s32.totalorder %v5088_v2, 320  ;;  %vm201_vm5 = vcmask 523264   ;;  %s2785_s3 = sld [smem:[#allocation4 + $0xa]]  ;;  %s3087_s8 = smov 13  }
  0x44   : > { %190 = vst.msk [vmem:[#allocation2] sm:$0x1] %vm188_vm0, %v3085_v10  ;;  %vm205_vm6 = vmand %vm3246_vm1, %vm204_vm4  ;;  %v3261_v20 = vshrl.u32 %v5088_v2, 7  ;;  %s2786_s5 = sld [smem:[#allocation4 + $0x11]]  ;;  %v217_v34 = vand.u32 127, %v5088_v2  ;;  %s3088_s20 = smov 77  }
  0x45   : > { %196 = vst.msk [vmem:[#allocation3 + $0x2] sm:$0x1] %vm193_vm3, %v3085_v10  ;;  %194 = vst.msk [vmem:[#allocation2 + $0x2] sm:$0x1] %vm193_vm3, %v3085_v10  ;;  %v184_v11 = vmax.f32 %v180_v8, %v2763_v5  ;;  %v183_v12 = vadd.f32 %v2763_v5, %v179_v9  ;;  %s2787_s7 = sld [smem:[#allocation4 + $0x18]]  ;;  %s3089_s6 = smov 47  }
  0x46   : > { %5174 = vst [vmem:[#allocation13_spill] sm:$0xff] %v3261_v20  ;;  %v3266_v24 = vsub.s32 0, %v3261_v20  ;;  %v3269_v25 = vsub.s32 1, %v3261_v20  ;;  %v3276_v30 = vsub.s32 2, %v3261_v20  ;;  %s2788_s14 = sld [smem:[#allocation4 + $0x1f]]  ;;  %v219_v39 = vadd.s32 256, %v217_v34 }
  0x47   : > { %208 = vrot.lane.b32.xlu0 %v184_v11, %s3086_s15  ;;  %v185_v13 = vmul.f32 0.25, %v183_v12  ;;  %s3293_s19 = sld [smem:[#allocation4 + $0x26]]  ;;  %v218_v43 = vadd.s32 128, %v217_v34  ;;  %v3299_v45 = vand.u32 15, %v217_v34  ;;  %p5336_p8 = scmp.ne.s32.totalorder %s5166_s25, 0 }
  0x48   : > { %v677_v21 = vstv %s2784_s17  ;;  %5175 = vst [vmem:[#allocation14_spill] sm:$0xff] %v3266_v24  ;;  %5176 = vst [vmem:[#allocation15_spill] sm:$0xff] %v3269_v25  ;;  %v3297_v44 = vand.u32 15, %v219_v39  ;;  %s2790_s21 = sld [smem:[#allocation4 + $0x2d]] }
  0x49   : > { %v708_v23 = vstv %s2785_s3  ;;  %5177 = vst [vmem:[#allocation16_spill] sm:$0xff] %v3276_v30  ;;  %v3311_v51 = vand.u32 15, %v218_v43  ;;  %vm232_vm7 = vcmp.ge.s32.totalorder %v3299_v45, 1  ;;  %s2767_s22 = sld [smem:[#allocation4 + $0x1c]]  ;;  %vm235_vm11 = vcmp.ge.s32.totalorder %v3299_v45, 2  ;;  %s3090_s3 = smov 111  }
  0x4a   : > { %v738_v33 = vstv %s2786_s5  ;;  %vm234_vm8 = vcmp.ge.s32.totalorder %v3297_v44, 1  ;;  %s2768_s23 = sld [smem:[#allocation4 + $0x23]]  ;;  %vm225_vm12 = vcmp.lt.s32.totalorder %v3297_v44, 13  ;;  %vm237_vm13 = vcmp.ge.s32.totalorder %v3297_v44, 2 }
  0x4b   : > { %198 = vrot.lane.b32.xlu0 %v185_v13, %s3086_s15  ;;  %v768_v38 = vstv %s2787_s7  ;;  %vm233_vm9 = vcmp.ge.s32.totalorder %v3311_v51, 1  ;;  %vm236_vm10 = vcmp.ge.s32.totalorder %v3311_v51, 2  ;;  %s2769_s26 = sld [smem:[#allocation4 + $0x2a]]  ;;  %vm238_vm14 = vcmp.ge.s32.totalorder %v3299_v45, 3 }
  0x4c   : > { %v799_v49 = vstv %s2788_s14  ;;  %vm224_vm15 = vcmp.lt.s32.totalorder %v3311_v51, 13  ;;  %vm223_vm0 = vcmp.lt.s32.totalorder %v3299_v45, 13  ;;  %vm240_vm1 = vcmp.ge.s32.totalorder %v3297_v44, 3  ;;  %s2770_s27 = sld [smem:[#allocation4 + $0x1]] }
  0x4d   : > { %v829_v57 = vstv %s3293_s19  ;;  %vm239_vm2 = vcmp.ge.s32.totalorder %v3311_v51, 3  ;;  %s2813_s28 = sld [smem:[#allocation4 + $0x38]]  ;;  %vm227_vm3 = vcmp.lt.s32.totalorder %v3311_v51, 14  ;;  %vm226_vm4 = vcmp.lt.s32.totalorder %v3299_v45, 14 }
  0x4e   : > { %v859_v5 = vstv %s2790_s21  ;;  %s2771_s30 = sld [smem:[#allocation4 + $0x8]]  ;;  %s3091_s21 = smov 30  }
  0x4f   : > { %v293_v13 = vstv %s2767_s22  ;;  %s2772_s4 = sld [smem:[#allocation4 + $0xf]] }
  0x50   : > { %s2773_s17 = sld [smem:[#allocation4 + $0x16]] }
  0x51   : > { %s2774_s5 = sld [smem:[#allocation4 + $0x1d]] }
  0x52   : > { %s2776_s7 = sld [smem:[#allocation4 + $0x2b]] }
  0x53   : > { %s2778_s14 = sld [smem:[#allocation4 + $0x9]] }
  0x54   : > { %v385_v43 = vstv %s2771_s30  ;;  %s2779_s19 = sld [smem:[#allocation4 + $0x10]] }
  0x55   : > { %s2780_s22 = sld [smem:[#allocation4 + $0x17]] }
  0x56   : > { %s2791_s30 = sld [smem:[#allocation4 + $0x4]] }
  0xb9   : > { %v209_v14 = vpop.permute.xlu0 %208 }
  0xba   : > { %v210_v15 = vrot.slane %v209_v14, 7 }
  0xbc   : > { %v211_v16 = vsel %vm201_vm5, %v210_v15, %v209_v14 }
  0xbd   : > { %213 = vst.msk [vmem:[#allocation3] sm:$0x7] %vm205_vm6, %v211_v16  ;;  %v199_v17 = vpop.permute.xlu0 %198 }
  0xbe   : > { %v200_v18 = vrot.slane %v199_v17, 7 }
  0xc0   : > { %v202_v19 = vsel %vm201_vm5, %v200_v18, %v199_v17  ;;  %v315_v17 = vstv %s2768_s23  ;;  %s2781_s23 = sld [smem:[#allocation4 + $0x1e]] }
  0xc1   : > { %206 = vst.msk [vmem:[#allocation2] sm:$0x7] %vm205_vm6, %v202_v19  ;;  %vm228_vm6 = vcmp.lt.s32.totalorder %v3297_v44, 14 }
  0xc4   : > { %v215_v60 = vld [vmem:[#allocation3] sm:$0x7] }
  0xc5   : > { %v3350_v0 = vrot.slane %v215_v60, %v3269_v25  ;;  %v3437_v34 = vrot.slane %v215_v60, %v3266_v24 }
  0xc7   : > { %v3360_v6 = vsel %vm236_vm10, %v3350_v0, 0.0  ;;  %v3456_v39 = vsel %vm239_vm2, %v3350_v0, 0.0 }
  0xc8   : > { %v3263_v22 = vld [vmem:[#allocation2] sm:$0x7]  ;;  %5178 = vst [vmem:[#allocation17_spill] sm:$0xff] %v3360_v6  ;;  %5182 = vst [vmem:[#allocation21_spill] sm:$0xff] %v3456_v39 }
  0xc9   : > { %v678_v26 = vmul.f32 %v677_v21, %v3263_v22  ;;  %v709_v29 = vmul.f32 %v708_v23, %v3263_v22  ;;  %v739_v37 = vmul.f32 %v738_v33, %v3263_v22  ;;  %v769_v42 = vmul.f32 %v768_v38, %v3263_v22 }
  0xca   : > { %v3305_v48 = vrot.slane %v3263_v22, %v3266_v24  ;;  %v3309_v50 = vrot.slane %v3263_v22, %v3276_v30  ;;  %v3317_v52 = vrot.slane %v3263_v22, %v3269_v25  ;;  %v800_v55 = vmul.f32 %v799_v49, %v3263_v22 }
  0xcb   : > { %v687_v27 = vrot.slane %v678_v26, %v3269_v25  ;;  %v683_v28 = vrot.slane %v678_v26, %v3266_v24  ;;  %v714_v31 = vrot.slane %v709_v29, %v3266_v24  ;;  %v691_v32 = vrot.slane %v678_v26, %v3276_v30 }
  0xcc   : > { %v722_v35 = vrot.slane %v709_v29, %v3276_v30  ;;  %v718_v36 = vrot.slane %v709_v29, %v3269_v25  ;;  %v748_v40 = vrot.slane %v739_v37, %v3269_v25  ;;  %v744_v41 = vrot.slane %v739_v37, %v3266_v24 }
  0xcd   : > { %694 = vrot.lane.b32.xlu0 %v687_v27, %s3087_s8  ;;  %692 = vrot.lane.b32.xlu1 %v683_v28, %s3087_s8  ;;  %v774_v46 = vrot.slane %v769_v42, %v3266_v24  ;;  %v752_v47 = vrot.slane %v739_v37, %v3276_v30  ;;  %v782_v53 = vrot.slane %v769_v42, %v3276_v30  ;;  %v3327_v56 = vsel %vm232_vm7, %v3305_v48, 0.0 }
  0xce   : > { %v778_v54 = vrot.slane %v769_v42, %v3269_v25  ;;  %v3333_v58 = vsel %vm234_vm8, %v3309_v50, 0.0  ;;  %v3341_v59 = vsel %vm233_vm9, %v3317_v52, 0.0  ;;  %v809_v61 = vrot.slane %v800_v55, %v3269_v25 }
  0xcf   : > { %v805_v62 = vrot.slane %v800_v55, %v3266_v24  ;;  %v830_v63 = vmul.f32 %v829_v57, %v3263_v22  ;;  %v3353_v1 = vsel %vm236_vm10, %v3317_v52, 0.0  ;;  %v813_v4 = vrot.slane %v800_v55, %v3276_v30 }
  0xd0   : > { %v3367_v7 = vsel %vm235_vm11, %v3305_v48, 0.0  ;;  %v3373_v10 = vmul.f32 %v859_v5, %v3263_v22  ;;  %v3378_v11 = vsel %vm237_vm13, %v3309_v50, 0.0  ;;  %v3383_v12 = vsel %vm225_vm12, %v3309_v50, 0.0 }
  0xd1   : > { %723 = vrot.lane.b32.xlu0 %v714_v31, %s3087_s8  ;;  %696 = vrot.lane.b32.xlu1 %v691_v32, %s3087_s8  ;;  %v835_v3 = vrot.slane %v830_v63, %v3266_v24  ;;  %v843_v8 = vrot.slane %v830_v63, %v3276_v30  ;;  %v839_v9 = vrot.slane %v830_v63, %v3269_v25  ;;  %v3391_v14 = vsel %vm238_vm14, %v3305_v48, 0.0 }
  0xd2   : > { %5179 = vst [vmem:[#allocation18_spill] sm:$0xff] %v3383_v12  ;;  %v865_v15 = vrot.slane %v3373_v10, %v3266_v24  ;;  %v296_v16 = vmul.f32 %v293_v13, %v3383_v12  ;;  %v3402_v18 = vsel %vm224_vm15, %v3317_v52, 0.0  ;;  %v3407_v19 = vsel %vm223_vm0, %v3305_v48, 0.0 }
  0xd3   : > { %5180 = vst [vmem:[#allocation19_spill] sm:$0xff] %v3402_v18  ;;  %v3412_v21 = vsel %vm240_vm1, %v3309_v50, 0.0  ;;  %v3420_v22 = vsel %vm239_vm2, %v3317_v52, 0.0  ;;  %v317_v23 = vmul.f32 %v315_v17, %v3402_v18  ;;  %v294_v26 = vmul.f32 %v293_v13, %v3407_v19 }
  0xd4   : > { %v337_v27 = vstv %s2769_s26  ;;  %v295_v29 = vmul.f32 %v293_v13, %v3402_v18  ;;  %v3429_v31 = vrot.slane %v215_v60, %v3276_v30  ;;  %v316_v33 = vmul.f32 %v315_v17, %v3407_v19  ;;  %s3092_s26 = smov 94  }
  0xd5   : > { %727 = vrot.lane.b32.xlu0 %v722_v35, %s3087_s8  ;;  %725 = vrot.lane.b32.xlu1 %v718_v36, %s3087_s8  ;;  %v338_v28 = vmul.f32 %v337_v27, %v3407_v19  ;;  %v340_v32 = vmul.f32 %v337_v27, %v3383_v12  ;;  %v3442_v35 = vsel %vm227_vm3, %v3317_v52, 0.0  ;;  %v362_v36 = vstv %s2770_s27  ;;  %s2782_s27 = sld [smem:[#allocation4 + $0x25]] }
  0xd6   : > { %v3447_v37 = vsel %vm225_vm12, %v3429_v31, 0.0  ;;  %v3451_v38 = vstv %s2813_s28  ;;  %v318_v42 = vmul.f32 %v315_v17, %v3383_v12  ;;  %v3479_v49 = vsel %vm240_vm1, %v3429_v31, 0.0  ;;  %s2783_s28 = sld [smem:[#allocation4 + $0x2c]] }
  0xd7   : > { %5181 = vst [vmem:[#allocation20_spill] sm:$0xff] %v3447_v37  ;;  %5185 = vst [vmem:[#allocation24_spill] sm:$0xff] %v3479_v49  ;;  %v339_v57 = vmul.f32 %v337_v27, %v3402_v18  ;;  %v3497_v60 = vsel %vm228_vm6, %v3309_v50, 0.0  ;;  %v408_v63 = vstv %s2772_s4  ;;  %v430_v5 = vstv %s2773_s17  ;;  %s2792_s4 = sld [smem:[#allocation4 + $0xb]]  ;;  %s3093_s17 = smov 124  }
  0xd8   : > { %v433_v13 = vmul.f32 %v430_v5, %v3497_v60  ;;  %vm229_vm10 = vcmp.lt.s32.totalorder %v3299_v45, 15  ;;  %vm231_vm12 = vcmp.lt.s32.totalorder %v3297_v44, 15  ;;  %vm5109_vm1 = vcmask 244736  }
  0xd9   : > { %755 = vrot.lane.b32.xlu0 %v748_v40, %s3087_s8  ;;  %753 = vrot.lane.b32.xlu1 %v744_v41, %s3087_s8  ;;  %v3462_v40 = vsel %vm224_vm15, %v3350_v0, 0.0  ;;  %v364_v41 = vmul.f32 %v362_v36, %v3442_v35  ;;  %vm398_vm15 = vcmask 908288   ;;  %vm579_vm2 = vcmask 769024  }
  0xda   : > { %5183 = vst [vmem:[#allocation22_spill] sm:$0xff] %v3462_v40 }
  0xdd   : > { %783 = vrot.lane.b32.xlu0 %v774_v46, %s3088_s20  ;;  %757 = vrot.lane.b32.xlu1 %v752_v47, %s3087_s8  ;;  %v3469_v46 = vsel %vm226_vm4, %v3305_v48, 0.0  ;;  %v3474_v47 = vsel %vm238_vm14, %v3437_v34, 0.0  ;;  %s2777_s8 = sld [smem:[#allocation4 + $0x2]]  ;;  %vm230_vm14 = vcmp.lt.s32.totalorder %v3311_v51, 15 }
  0xde   : > { %5184 = vst [vmem:[#allocation23_spill] sm:$0xff] %v3474_v47  ;;  %v386_v55 = vmul.f32 %v385_v43, %v3469_v46 }
  0xe1   : > { %787 = vrot.lane.b32.xlu0 %v782_v53, %s3088_s20  ;;  %785 = vrot.lane.b32.xlu1 %v778_v54, %s3088_s20  ;;  %v3483_v53 = vmul.f32 %v3451_v38, %v3447_v37  ;;  %v3489_v54 = vmul.f32 %v3451_v38, %v3462_v40 }
  0xe3   : > { %5186 = vst [vmem:[#allocation25_spill] sm:$0xff] %v3483_v53  ;;  %5187 = vst [vmem:[#allocation26_spill] sm:$0xff] %v3489_v54 }
  0xe5   : > { %816 = vrot.lane.b32.xlu0 %v809_v61, %s3088_s20  ;;  %814 = vrot.lane.b32.xlu1 %v805_v62, %s3088_s20  ;;  %v388_v61 = vmul.f32 %v385_v43, %v3497_v60  ;;  %v363_v62 = vmul.f32 %v362_v36, %v3469_v46 }
  0xe9   : > { %844 = vrot.lane.b32.xlu0 %v835_v3, %s3088_s20  ;;  %818 = vrot.lane.b32.xlu1 %v813_v4, %s3088_s20  ;;  %v410_v3 = vmul.f32 %v408_v63, %v3442_v35  ;;  %v365_v4 = vmul.f32 %v362_v36, %v3497_v60 }
  0xed   : > { %848 = vrot.lane.b32.xlu0 %v843_v8, %s3088_s20  ;;  %846 = vrot.lane.b32.xlu1 %v839_v9, %s3088_s20  ;;  %v431_v8 = vmul.f32 %v430_v5, %v3469_v46  ;;  %v387_v9 = vmul.f32 %v385_v43, %v3442_v35  ;;  %v521_v43 = vstv %s2777_s8  ;;  %s260_s8 = sld [smem:[#allocation4]] }
  0xf1   : > { %874 = vrot.lane.b32.xlu1 %v865_v15, %s3088_s20  ;;  %304 = vrot.lane.b32.xlu0 %v296_v16, %s3086_s15  ;;  %v409_v15 = vmul.f32 %v408_v63, %v3469_v46  ;;  %v452_v16 = vstv %s2774_s5  ;;  %s2796_s5 = sld [smem:[#allocation4 + $0x27]] }
  0xf2   : > { %v454_v17 = vmul.f32 %v452_v16, %v3442_v35 }
  0xf5   : > { %324 = vrot.lane.b32.xlu0 %v317_v23, %s3086_s15  ;;  %300 = vrot.lane.b32.xlu1 %v294_v26, %s3086_s15  ;;  %v411_v23 = vmul.f32 %v408_v63, %v3497_v60  ;;  %v544_v63 = vstv %s2778_s14  ;;  %s2798_s14 = sld [smem:[#allocation4 + $0x5]] }
  0xf9   : > { %344 = vrot.lane.b32.xlu0 %v338_v28, %s3086_s15  ;;  %302 = vrot.lane.b32.xlu1 %v295_v29, %s3086_s15  ;;  %v432_v28 = vmul.f32 %v430_v5, %v3442_v35 }
  0xfd   : > { %348 = vrot.lane.b32.xlu0 %v340_v32, %s3086_s15  ;;  %322 = vrot.lane.b32.xlu1 %v316_v33, %s3086_s15  ;;  %v453_v32 = vmul.f32 %v452_v16, %v3469_v46  ;;  %v496_v33 = vstv %s2776_s7  ;;  %s3094_s7 = smov 60  }
  0xfe   : > { %v498_v36 = vmul.f32 %v496_v33, %v3442_v35 }
 0x101   : > { %371 = vrot.lane.b32.xlu0 %v364_v41, %s3089_s6  ;;  %326 = vrot.lane.b32.xlu1 %v318_v42, %s3086_s15  ;;  %v455_v41 = vmul.f32 %v452_v16, %v3497_v60  ;;  %v3535_v42 = vsel %vm229_vm10, %v3305_v48, 0.0 }
 0x105   : > { %392 = vrot.lane.b32.xlu0 %v386_v55, %s3090_s3  ;;  %346 = vrot.lane.b32.xlu1 %v339_v57, %s3086_s15  ;;  %s2775_s15 = sld [smem:[#allocation4 + $0x24]]  ;;  %v522_v55 = vmul.f32 %v521_v43, %v3535_v42 }
 0x109   : > { %396 = vrot.lane.b32.xlu0 %v388_v61, %s3090_s3  ;;  %369 = vrot.lane.b32.xlu1 %v363_v62, %s3089_s6  ;;  %v3545_v61 = vsel %vm231_vm12, %v3309_v50, 0.0  ;;  %v497_v62 = vmul.f32 %v496_v33, %v3469_v46 }
 0x10a   : > { %v524_v48 = vmul.f32 %v521_v43, %v3545_v61 }
 0x10b   : > { %v474_v26 = vstv %s2775_s15  ;;  %s2797_s15 = sld [smem:[#allocation4 + $0x2e]] }
 0x10c   : > { %v475_v27 = vmul.f32 %v474_v26, %v3469_v46  ;;  %v477_v29 = vmul.f32 %v474_v26, %v3497_v60  ;;  %v476_v57 = vmul.f32 %v474_v26, %v3442_v35  ;;  %v3555_v35 = vsel %vm230_vm14, %v3317_v52, 0.0 }
 0x10d   : > { %417 = vrot.lane.b32.xlu0 %v410_v3, %s3090_s3  ;;  %373 = vrot.lane.b32.xlu1 %v365_v4, %s3089_s6  ;;  %v546_v50 = vmul.f32 %v544_v63, %v3555_v35  ;;  %v499_v3 = vmul.f32 %v496_v33, %v3497_v60  ;;  %v566_v4 = vstv %s2779_s19  ;;  %v523_v52 = vmul.f32 %v521_v43, %v3555_v35  ;;  %s2764_s19 = sld [smem:[#allocation4 + $0x7]] }
 0x10e   : > { %v567_v46 = vmul.f32 %v566_v4, %v3535_v42  ;;  %v569_v5 = vmul.f32 %v566_v4, %v3545_v61  ;;  %v545_v60 = vmul.f32 %v544_v63, %v3535_v42  ;;  %v568_v26 = vmul.f32 %v566_v4, %v3555_v35 }
 0x10f   : > { %v633_v33 = vstv %s2782_s27  ;;  %s2801_s27 = sld [smem:[#allocation4 + $0x1a]] }
 0x110   : > { %v635_v43 = vmul.f32 %v633_v33, %v3555_v35 }
 0x111   : > { %437 = vrot.lane.b32.xlu0 %v431_v8, %s3090_s3  ;;  %394 = vrot.lane.b32.xlu1 %v387_v9, %s3090_s3  ;;  %v589_v8 = vstv %s2780_s22  ;;  %s3712_s22 = sld [smem:[#allocation4 + $0xe]] }
 0x112   : > { %v591_v9 = vmul.f32 %v589_v8, %v3555_v35 }
 0x115   : > { %441 = vrot.lane.b32.xlu0 %v433_v13, %s3090_s3  ;;  %415 = vrot.lane.b32.xlu1 %v409_v15, %s3090_s3  ;;  %v547_v13 = vmul.f32 %v544_v63, %v3545_v61  ;;  %v611_v15 = vstv %s2781_s23  ;;  %s2800_s23 = sld [smem:[#allocation4 + $0x13]] }
 0x119   : > { %461 = vrot.lane.b32.xlu0 %v454_v17, %s3090_s3  ;;  %419 = vrot.lane.b32.xlu1 %v411_v23, %s3090_s3  ;;  %v612_v23 = vmul.f32 %v611_v15, %v3535_v42 }
 0x11d   : > { %481 = vrot.lane.b32.xlu0 %v475_v27, %s3089_s6  ;;  %439 = vrot.lane.b32.xlu1 %v432_v28, %s3090_s3 }
 0x121   : > { %485 = vrot.lane.b32.xlu0 %v477_v29, %s3089_s6  ;;  %459 = vrot.lane.b32.xlu1 %v453_v32, %s3090_s3  ;;  %v614_v29 = vmul.f32 %v611_v15, %v3545_v61  ;;  %v590_v32 = vmul.f32 %v589_v8, %v3535_v42 }
 0x125   : > { %505 = vrot.lane.b32.xlu0 %v498_v36, %s3089_s6  ;;  %463 = vrot.lane.b32.xlu1 %v455_v41, %s3090_s3  ;;  %s2794_s3 = sld [smem:[#allocation4 + $0x19]] }
 0x129   : > { %528 = vrot.lane.b32.xlu0 %v522_v55, %s3091_s21  ;;  %483 = vrot.lane.b32.xlu1 %v476_v57, %s3089_s6  ;;  %v592_v55 = vmul.f32 %v589_v8, %v3545_v61  ;;  %v655_v57 = vstv %s2783_s28  ;;  %v869_v8 = vrot.slane %v3373_v10, %v3269_v25  ;;  %s3096_s28 = smov 107   ;;  %v1119_v25 = vstv %s2801_s27  ;;  %s2822_s27 = sld [smem:[#allocation4 + $0x47]] }
 0x12a   : > { %v656_v63 = vmul.f32 %v655_v57, %v3535_v42 }
 0x12d   : > { %532 = vrot.lane.b32.xlu0 %v524_v48, %s3091_s21  ;;  %503 = vrot.lane.b32.xlu1 %v497_v62, %s3089_s6 }
 0x131   : > { %553 = vrot.lane.b32.xlu0 %v546_v50, %s3091_s21  ;;  %507 = vrot.lane.b32.xlu1 %v499_v3, %s3089_s6  ;;  %v613_v50 = vmul.f32 %v611_v15, %v3555_v35  ;;  %s2793_s6 = sld [smem:[#allocation4 + $0x12]] }
 0x135   : > { %573 = vrot.lane.b32.xlu0 %v567_v46, %s3092_s26  ;;  %530 = vrot.lane.b32.xlu1 %v523_v52, %s3091_s21  ;;  %v658_v46 = vmul.f32 %v655_v57, %v3545_v61  ;;  %v634_v52 = vmul.f32 %v633_v33, %v3535_v42 }
 0x139   : > { %577 = vrot.lane.b32.xlu0 %v569_v5, %s3092_s26  ;;  %551 = vrot.lane.b32.xlu1 %v545_v60, %s3091_s21 }
 0x13d   : > { %598 = vrot.lane.b32.xlu0 %v591_v9, %s3092_s26  ;;  %555 = vrot.lane.b32.xlu1 %v547_v13, %s3091_s21  ;;  %v636_v9 = vmul.f32 %v633_v33, %v3545_v61  ;;  %v892_v13 = vstv %s2791_s30  ;;  %v873_v33 = vrot.slane %v3373_v10, %v3276_v30  ;;  %s2802_s30 = sld [smem:[#allocation4 + $0x21]] }
 0x13f   : > { %v3575_v16 = vpop.permute.xlu0 %694  ;;  %v3577_v17 = vpop.permute.xlu1 %692 }
 0x141   : > { %618 = vrot.lane.b32.xlu0 %v612_v23, %s3092_s26  ;;  %575 = vrot.lane.b32.xlu1 %v568_v26, %s3092_s26  ;;  %v893_v23 = vmul.f32 %v892_v13, %v3327_v56  ;;  %v657_v26 = vmul.f32 %v655_v57, %v3555_v35 }
 0x143   : > { %v3583_v27 = vpop.permute.xlu0 %723  ;;  %v3585_v28 = vpop.permute.xlu1 %696 }
 0x145   : > { %622 = vrot.lane.b32.xlu0 %v614_v29, %s3092_s26  ;;  %596 = vrot.lane.b32.xlu1 %v590_v32, %s3092_s26  ;;  %v895_v32 = vmul.f32 %v892_v13, %v3333_v58 }
 0x147   : > { %v3591_v36 = vpop.permute.xlu0 %727  ;;  %v3593_v41 = vpop.permute.xlu1 %725 }
 0x149   : > { %642 = vrot.lane.b32.xlu0 %v635_v43, %s3092_s26  ;;  %600 = vrot.lane.b32.xlu1 %v592_v55, %s3092_s26  ;;  %v915_v43 = vstv %s2792_s4  ;;  %s2803_s4 = sld [smem:[#allocation4 + $0x28]] }
 0x14a   : > { %v917_v57 = vmul.f32 %v915_v43, %v3341_v59 }
 0x14b   : > { %v3599_v48 = vpop.permute.xlu0 %755  ;;  %v3601_v62 = vpop.permute.xlu1 %753 }
 0x14c   : > { %5188 = vst [vmem:[#allocation27_spill] sm:$0xff] %v3599_v48  ;;  %5189 = vst [vmem:[#allocation28_spill] sm:$0xff] %v3601_v62  ;;  %v1004_v48 = vstv %s2796_s5  ;;  %v1026_v62 = vstv %s2797_s15  ;;  %s3097_s5 = smov 26   ;;  %s2808_s15 = sld [smem:[#allocation4 + $0x1b]] }
 0x14d   : > { %662 = vrot.lane.b32.xlu0 %v656_v63, %s3091_s21  ;;  %620 = vrot.lane.b32.xlu1 %v613_v50, %s3092_s26  ;;  %v894_v63 = vmul.f32 %v892_v13, %v3341_v59  ;;  %v937_v50 = vstv %s2793_s6  ;;  %v1007_v53 = vmul.f32 %v1004_v48, %v3333_v58  ;;  %v1028_v47 = vmul.f32 %v1026_v62, %v3341_v59  ;;  %s2804_s6 = sld [smem:[#allocation4 + $0x2f]] }
 0x14f   : > { %v3607_v3 = vpop.permute.xlu0 %783  ;;  %v3609_v4 = vpop.permute.xlu1 %757 }
 0x150   : > { %5190 = vst [vmem:[#allocation29_spill] sm:$0xff] %v3609_v4 }
 0x151   : > { %666 = vrot.lane.b32.xlu0 %v658_v46, %s3091_s21  ;;  %640 = vrot.lane.b32.xlu1 %v634_v52, %s3092_s26  ;;  %v938_v52 = vmul.f32 %v937_v50, %v3327_v56 }
 0x153   : > { %v3615_v5 = vpop.permute.xlu0 %787  ;;  %v3617_v60 = vpop.permute.xlu1 %785 }
 0x154   : > { %5191 = vst [vmem:[#allocation30_spill] sm:$0xff] %v3615_v5 }
 0x155   : > { %876 = vrot.lane.b32.xlu0 %v869_v8, %s3088_s20  ;;  %644 = vrot.lane.b32.xlu1 %v636_v9, %s3092_s26  ;;  %v916_v8 = vmul.f32 %v915_v43, %v3327_v56  ;;  %s3095_s26 = smov 43  }
 0x157   : > { %v3624_v42 = vpop.permute.xlu0 %816  ;;  %v3626_v15 = vpop.permute.xlu1 %814 }
 0x159   : > { %899 = vrot.lane.b32.xlu0 %v893_v23, %s3093_s17  ;;  %664 = vrot.lane.b32.xlu1 %v657_v26, %s3091_s21  ;;  %v940_v23 = vmul.f32 %v937_v50, %v3333_v58  ;;  %v918_v26 = vmul.f32 %v915_v43, %v3333_v58  ;;  %s2799_s21 = sld [smem:[#allocation4 + $0xc]] }
 0x15b   : > { %v3632_v61 = vpop.permute.xlu0 %844  ;;  %v3634_v29 = vpop.permute.xlu1 %818 }
 0x15c   : > { %5192 = vst [vmem:[#allocation31_spill] sm:$0xff] %v3634_v29 }
 0x15d   : > { %903 = vrot.lane.b32.xlu0 %v895_v32, %s3093_s17  ;;  %878 = vrot.lane.b32.xlu1 %v873_v33, %s3088_s20  ;;  %s2795_s20 = sld [smem:[#allocation4 + $0x20]]  ;;  %v959_v32 = vstv %s2794_s3 }
 0x15e   : > { %s2806_s3 = sld [smem:[#allocation4 + $0xd]] }
 0x15f   : > { %v3641_v35 = vpop.permute.xlu0 %848  ;;  %v3643_v55 = vpop.permute.xlu1 %846  ;;  %v1074_v6 = vstv %s2799_s21  ;;  %s2812_s21 = sld [smem:[#allocation4 + $0x31]] }
 0x161   : > { %924 = vrot.lane.b32.xlu0 %v917_v57, %s3093_s17  ;;  %901 = vrot.lane.b32.xlu1 %v894_v63, %s3093_s17  ;;  %v961_v63 = vmul.f32 %v959_v32, %v3341_v59 }
 0x163   : > { %v3649_v10 = vpop.permute.xlu1 %874  ;;  %v3651_v46 = vpop.permute.xlu0 %304 }
 0x164   : > { %5193 = vst [vmem:[#allocation32_spill] sm:$0xff] %v3649_v10  ;;  %5194 = vst [vmem:[#allocation33_spill] sm:$0xff] %v3651_v46 }
 0x165   : > { %944 = vrot.lane.b32.xlu0 %v938_v52, %s3093_s17  ;;  %922 = vrot.lane.b32.xlu1 %v916_v8, %s3093_s17  ;;  %v939_v52 = vmul.f32 %v937_v50, %v3341_v59  ;;  %v981_v8 = vstv %s2795_s20  ;;  %s2807_s20 = sld [smem:[#allocation4 + $0x14]] }
 0x167   : > { %v3657_v9 = vpop.permute.xlu0 %324  ;;  %v301_v13 = vpop.permute.xlu1 %300 }
 0x169   : > { %948 = vrot.lane.b32.xlu0 %v940_v23, %s3093_s17  ;;  %926 = vrot.lane.b32.xlu1 %v918_v26, %s3093_s17  ;;  %v982_v23 = vmul.f32 %v981_v8, %v3327_v56  ;;  %v960_v26 = vmul.f32 %v959_v32, %v3327_v56 }
 0x16b   : > { %v3663_v33 = vpop.permute.xlu0 %344  ;;  %v303_v57 = vpop.permute.xlu1 %302 }
 0x16c   : > { %v307_v49 = vsel %vm201_vm5, %v303_v57, %v3651_v46 }
 0x16d   : > { %968 = vrot.lane.b32.xlu0 %v961_v63, %s3093_s17  ;;  %946 = vrot.lane.b32.xlu1 %v939_v52, %s3093_s17  ;;  %v984_v63 = vmul.f32 %v981_v8, %v3333_v58  ;;  %v962_v52 = vmul.f32 %v959_v32, %v3333_v58 }
 0x16f   : > { %v3669_v2 = vpop.permute.xlu0 %348  ;;  %v323_v43 = vpop.permute.xlu1 %322 }
 0x171   : > { %988 = vrot.lane.b32.xlu0 %v982_v23, %s3094_s7  ;;  %966 = vrot.lane.b32.xlu1 %v960_v26, %s3093_s17  ;;  %v1006_v23 = vmul.f32 %v1004_v48, %v3341_v59  ;;  %v983_v26 = vmul.f32 %v981_v8, %v3341_v59  ;;  %v3697_v8 = vstv %s260_s8  ;;  %s3098_s8 = smov 90  }
 0x172   : > { %5198 = vst [vmem:[#allocation37_spill] sm:$0xff] %v3697_v8 }
 0x173   : > { %v3675_v50 = vpop.permute.xlu0 %371  ;;  %v3677_v20 = vpop.permute.xlu1 %326 }
 0x174   : > { %5195 = vst [vmem:[#allocation34_spill] sm:$0xff] %v3675_v50  ;;  %v1005_v50 = vmul.f32 %v1004_v48, %v3327_v56 }
 0x175   : > { %992 = vrot.lane.b32.xlu0 %v984_v63, %s3094_s7  ;;  %970 = vrot.lane.b32.xlu1 %v962_v52, %s3093_s17  ;;  %v1027_v52 = vmul.f32 %v1026_v62, %v3327_v56  ;;  %v1051_v56 = vstv %s2798_s14  ;;  %s2805_s17 = sld [smem:[#allocation4 + $0x6]] }
 0x176   : > { %v1053_v46 = vmul.f32 %v1051_v56, %v3353_v1  ;;  %s2810_s14 = sld [smem:[#allocation4 + $0x29]] }
 0x177   : > { %v393_v4 = vpop.permute.xlu0 %392  ;;  %v3683_v10 = vpop.permute.xlu1 %346 }
 0x179   : > { %1013 = vrot.lane.b32.xlu0 %v1006_v23, %s3094_s7  ;;  %990 = vrot.lane.b32.xlu1 %v983_v26, %s3094_s7  ;;  %v1029_v26 = vmul.f32 %v1026_v62, %v3333_v58  ;;  %v3714_v58 = vstv %s2764_s19  ;;  %s2811_s19 = sld [smem:[#allocation4 + $0x30]] }
 0x17b   : > { %v3689_v32 = vpop.permute.xlu0 %396  ;;  %v3691_v63 = vpop.permute.xlu1 %369 }
 0x17c   : > { %5196 = vst [vmem:[#allocation35_spill] sm:$0xff] %v3689_v32  ;;  %5197 = vst [vmem:[#allocation36_spill] sm:$0xff] %v3691_v63  ;;  %v306_v63 = vsel %vm201_vm5, %v301_v13, %v303_v57 }
 0x17d   : > { %1033 = vrot.lane.b32.xlu0 %v1027_v52, %s3094_s7  ;;  %1011 = vrot.lane.b32.xlu1 %v1005_v50, %s3094_s7  ;;  %v263_v52 = vmul.f32 %v3697_v8, %v3402_v18  ;;  %v262_v50 = vmul.f32 %v3697_v8, %v3407_v19  ;;  %v328_v8 = vsel %vm201_vm5, %v323_v43, %v3657_v9 }
 0x17e   : > { %v1075_v43 = vmul.f32 %v1074_v6, %v3367_v7 }
 0x17f   : > { %v418_v54 = vpop.permute.xlu0 %417  ;;  %v3699_v23 = vpop.permute.xlu1 %373  ;;  %v311_v48 = vadd.f32 %v306_v63, %v262_v50  ;;  %v312_v13 = vadd.f32 %v307_v49, %v263_v52  ;;  %v270_v63 = vmul.f32 %v3714_v58, %v3407_v19  ;;  %v1052_v50 = vmul.f32 %v1051_v56, %v3367_v7 }
 0x180   : > { %5199 = vst [vmem:[#allocation38_spill] sm:$0xff] %v3699_v23 }
 0x181   : > { %1037 = vrot.lane.b32.xlu0 %v1029_v26, %s3094_s7  ;;  %1015 = vrot.lane.b32.xlu1 %v1007_v53, %s3094_s7  ;;  %v333_v59 = vadd.f32 %v328_v8, %v270_v63  ;;  %v1054_v63 = vmul.f32 %v1051_v56, %v3378_v11 }
 0x183   : > { %v438_v23 = vpop.permute.xlu0 %437  ;;  %v395_v57 = vpop.permute.xlu1 %394 }
 0x184   : > { %v399_v26 = vsel %vm398_vm15, %v393_v4, %v395_v57  ;;  %v400_v53 = vsel %vm398_vm15, %v395_v57, %v3689_v32 }
 0x185   : > { %v3725_v49 = vadd.f32 %v399_v26, %v311_v48  ;;  %v3727_v52 = vadd.f32 %v400_v53, %v312_v13  ;;  %1060 = vrot.lane.b32.xlu0 %v1053_v46, %s3095_s26  ;;  %1035 = vrot.lane.b32.xlu1 %v1028_v47, %s3094_s7  ;;  %v329_v48 = vsel %vm201_vm5, %v3657_v9, %v3677_v20  ;;  %v3746_v47 = vstv %s3712_s22  ;;  %s2809_s7 = sld [smem:[#allocation4 + $0x22]] }
 0x186   : > { %v271_v46 = vmul.f32 %v3714_v58, %v3402_v18  ;;  %v1077_v9 = vmul.f32 %v1074_v6, %v3378_v11  ;;  %s2814_s22 = sld [smem:[#allocation4 + $0x3f]] }
 0x187   : > { %v3731_v62 = vpop.permute.xlu0 %441  ;;  %v416_v4 = vpop.permute.xlu1 %415 }
 0x188   : > { %v421_v13 = vsel %vm398_vm15, %v416_v4, %v418_v54  ;;  %v334_v8 = vadd.f32 %v329_v48, %v271_v46  ;;  %v351_v4 = vsel %vm201_vm5, %v3683_v10, %v3669_v2  ;;  %v279_v48 = vmul.f32 %v3746_v47, %v3402_v18 }
 0x189   : > { %v3741_v57 = vadd.f32 %v421_v13, %v333_v59  ;;  %1081 = vrot.lane.b32.xlu0 %v1075_v43, %s3096_s28  ;;  %1058 = vrot.lane.b32.xlu1 %v1052_v50, %s3095_s26  ;;  %v350_v59 = vsel %vm201_vm5, %v3663_v33, %v3683_v10  ;;  %v1097_v50 = vstv %s2800_s23  ;;  %v278_v13 = vmul.f32 %v3746_v47, %v3407_v19  ;;  %s2818_s23 = sld [smem:[#allocation4 + $0x5b]] }
 0x18a   : > { %v356_v56 = vadd.f32 %v351_v4, %v279_v48  ;;  %v1099_v10 = vmul.f32 %v1097_v50, %v3353_v1  ;;  %v1100_v4 = vmul.f32 %v1097_v50, %v3378_v11  ;;  %vm5107_vm5 = vcmask 384000  }
 0x18b   : > { %v3748_v26 = vpop.permute.xlu0 %461  ;;  %v3750_v53 = vpop.permute.xlu1 %419  ;;  %v355_v33 = vadd.f32 %v350_v59, %v278_v13 }
 0x18c   : > { %5200 = vst [vmem:[#allocation39_spill] sm:$0xff] %v3748_v26  ;;  %v422_v43 = vsel %vm398_vm15, %v418_v54, %v3750_v53  ;;  %v1076_v54 = vmul.f32 %v1074_v6, %v3353_v1  ;;  %v1120_v6 = vmul.f32 %v1119_v25, %v3367_v7 }
 0x18d   : > { %v427_v46 = vadd.f32 %v422_v43, %v334_v8  ;;  %1085 = vrot.lane.b32.xlu0 %v1077_v9, %s3096_s28  ;;  %1062 = vrot.lane.b32.xlu1 %v1054_v63, %s3095_s26  ;;  %v1141_v43 = vstv %s2802_s30  ;;  %s3100_s30 = smov 80  }
 0x18f   : > { %v482_v32 = vpop.permute.xlu0 %481  ;;  %v440_v26 = vpop.permute.xlu1 %439 }
 0x190   : > { %v443_v39 = vsel %vm398_vm15, %v438_v23, %v440_v26  ;;  %v444_v18 = vsel %vm398_vm15, %v440_v26, %v3731_v62  ;;  %v1098_v23 = vmul.f32 %v1097_v50, %v3367_v7 }
 0x191   : > { %v3773_v8 = vadd.f32 %v443_v39, %v355_v33  ;;  %v449_v9 = vadd.f32 %v444_v18, %v356_v56  ;;  %1106 = vrot.lane.b32.xlu0 %v1099_v10, %s3096_s28  ;;  %1083 = vrot.lane.b32.xlu1 %v1076_v54, %s3096_s28  ;;  %v1122_v18 = vmul.f32 %v1119_v25, %v3378_v11 }
 0x192   : > { %v1143_v33 = vmul.f32 %v1141_v43, %v3353_v1  ;;  %v1121_v56 = vmul.f32 %v1119_v25, %v3353_v1 }
 0x193   : > { %v3777_v63 = vpop.permute.xlu0 %485  ;;  %v3779_v59 = vpop.permute.xlu1 %459 }
 0x194   : > { %5201 = vst [vmem:[#allocation40_spill] sm:$0xff] %v3777_v63 }
 0x195   : > { %1126 = vrot.lane.b32.xlu0 %v1120_v6, %s3096_s28  ;;  %1104 = vrot.lane.b32.xlu1 %v1098_v23, %s3096_s28  ;;  %v1163_v6 = vstv %s2803_s4  ;;  %s2830_s4 = sld [smem:[#allocation4 + $0x4f]] }
 0x196   : > { %v1164_v25 = vmul.f32 %v1163_v6, %v3367_v7 }
 0x197   : > { %v506_v39 = vpop.permute.xlu0 %505  ;;  %v3785_v26 = vpop.permute.xlu1 %463 }
 0x198   : > { %5202 = vst [vmem:[#allocation41_spill] sm:$0xff] %v3785_v26 }
 0x199   : > { %1130 = vrot.lane.b32.xlu0 %v1122_v18, %s3096_s28  ;;  %1108 = vrot.lane.b32.xlu1 %v1100_v4, %s3096_s28 }
 0x19b   : > { %v3791_v48 = vpop.permute.xlu0 %528  ;;  %v484_v13 = vpop.permute.xlu1 %483 }
 0x19c   : > { %v487_v10 = vsel %vm5107_vm5, %v482_v32, %v484_v13  ;;  %v488_v54 = vsel %vm5107_vm5, %v484_v13, %v3777_v63  ;;  %v1142_v32 = vmul.f32 %v1141_v43, %v3367_v7 }
 0x19d   : > { %v3799_v50 = vadd.f32 %v487_v10, %v3725_v49  ;;  %v3802_v23 = vadd.f32 %v488_v54, %v3727_v52  ;;  %1150 = vrot.lane.b32.xlu0 %v1143_v33, %s3096_s28  ;;  %1128 = vrot.lane.b32.xlu1 %v1121_v56, %s3096_s28  ;;  %v280_v49 = vmul.f32 %v3746_v47, %v3383_v12 }
 0x19e   : > { %v1166_v56 = vmul.f32 %v1163_v6, %v3378_v11  ;;  %v1144_v10 = vmul.f32 %v1141_v43, %v3378_v11  ;;  %v1165_v43 = vmul.f32 %v1163_v6, %v3353_v1 }
 0x19f   : > { %v533_v18 = vpop.permute.xlu0 %532  ;;  %v504_v4 = vpop.permute.xlu1 %503 }
 0x1a0   : > { %v509_v13 = vsel %vm5107_vm5, %v504_v4, %v506_v39  ;;  %v357_v4 = vadd.f32 %v3669_v2, %v280_v49 }
 0x1a1   : > { %v3810_v63 = vadd.f32 %v509_v13, %v3741_v57  ;;  %1170 = vrot.lane.b32.xlu0 %v1164_v25, %s3095_s26  ;;  %1148 = vrot.lane.b32.xlu1 %v1142_v32, %s3096_s28  ;;  %v1185_v57 = vstv %s2804_s6  ;;  %s2834_s6 = sld [smem:[#allocation4 + $0x3b]] }
 0x1a2   : > { %v450_v47 = vadd.f32 %v3731_v62, %v357_v4  ;;  %v1187_v26 = vmul.f32 %v1185_v57, %v3353_v1  ;;  %v1186_v6 = vmul.f32 %v1185_v57, %v3367_v7  ;;  %v1233_v4 = vstv %s2806_s3  ;;  %s3102_s3 = smov 46  }
 0x1a3   : > { %v3816_v52 = vpop.permute.xlu0 %553  ;;  %v3818_v33 = vpop.permute.xlu1 %507 }
 0x1a4   : > { %v510_v54 = vsel %vm5107_vm5, %v506_v39, %v3818_v33  ;;  %vm5108_vm5 = vcmask 105472  }
 0x1a5   : > { %v3825_v25 = vadd.f32 %v510_v54, %v427_v46  ;;  %1174 = vrot.lane.b32.xlu0 %v1166_v56, %s3095_s26  ;;  %1152 = vrot.lane.b32.xlu1 %v1144_v10, %s3096_s28  ;;  %v1210_v46 = vstv %s2805_s17  ;;  %v1188_v54 = vmul.f32 %v1185_v57, %v3378_v11  ;;  %v1255_v57 = vstv %s2807_s20  ;;  %s2826_s28 = sld [smem:[#allocation4 + $0x33]]  ;;  %s3101_s17 = smov 127  }
 0x1a6   : > { %v1211_v1 = vmul.f32 %v1210_v46, %v3391_v14  ;;  %s2838_s20 = sld [smem:[#allocation4 + $0x57]] }
 0x1a7   : > { %v574_v32 = vpop.permute.xlu0 %573  ;;  %v531_v13 = vpop.permute.xlu1 %530 }
 0x1a8   : > { %v535_v39 = vsel %vm5109_vm1, %v3791_v48, %v531_v13  ;;  %v536_v2 = vsel %vm5109_vm1, %v531_v13, %v533_v18  ;;  %v1235_v13 = vmul.f32 %v1233_v4, %v3420_v22 }
 0x1a9   : > { %v3835_v49 = vadd.f32 %v535_v39, %v449_v9  ;;  %v542_v56 = vadd.f32 %v536_v2, %v450_v47  ;;  %1194 = vrot.lane.b32.xlu0 %v1187_v26, %s3095_s26  ;;  %1172 = vrot.lane.b32.xlu1 %v1165_v43, %s3095_s26  ;;  %v1213_v26 = vmul.f32 %v1210_v46, %v3412_v21 }
 0x1aa   : > { %v1212_v43 = vmul.f32 %v1210_v46, %v3420_v22  ;;  %v272_v39 = vmul.f32 %v3714_v58, %v3383_v12 }
 0x1ab   : > { %v3839_v62 = vpop.permute.xlu0 %577  ;;  %v3841_v10 = vpop.permute.xlu1 %551 }
 0x1ac   : > { %5203 = vst [vmem:[#allocation42_spill] sm:$0xff] %v3839_v62  ;;  %v335_v46 = vadd.f32 %v3677_v20, %v272_v39  ;;  %v1258_v39 = vmul.f32 %v1255_v57, %v3412_v21 }
 0x1ad   : > { %1217 = vrot.lane.b32.xlu0 %v1211_v1, %s3097_s5  ;;  %1192 = vrot.lane.b32.xlu1 %v1186_v6, %s3095_s26 }
 0x1af   : > { %v599_v9 = vpop.permute.xlu0 %598  ;;  %v3847_v18 = vpop.permute.xlu1 %555 }
 0x1b1   : > { %1221 = vrot.lane.b32.xlu0 %v1213_v26, %s3097_s5  ;;  %1196 = vrot.lane.b32.xlu1 %v1188_v54, %s3095_s26  ;;  %v1234_v54 = vmul.f32 %v1233_v4, %v3391_v14  ;;  %s3099_s26 = smov 16  }
 0x1b3   : > { %v619_v7 = vpop.permute.xlu0 %618  ;;  %v576_v47 = vpop.permute.xlu1 %575 }
 0x1b4   : > { %v580_v2 = vsel %vm579_vm2, %v574_v32, %v576_v47  ;;  %v581_v11 = vsel %vm579_vm2, %v576_v47, %v3839_v62  ;;  %v1256_v32 = vmul.f32 %v1255_v57, %v3391_v14  ;;  %v428_v47 = vadd.f32 %v3750_v53, %v335_v46 }
 0x1b5   : > { %v3861_v1 = vadd.f32 %v580_v2, %v3799_v50  ;;  %v3864_v6 = vadd.f32 %v581_v11, %v3802_v23  ;;  %1242 = vrot.lane.b32.xlu0 %v1235_v13, %s3097_s5  ;;  %1219 = vrot.lane.b32.xlu1 %v1212_v43, %s3097_s5  ;;  %v730_v23 = vsel %vm5108_vm5, %v3593_v41, %v3591_v36  ;;  %v1278_v46 = vstv %s2808_s15  ;;  %s2842_s15 = sld [smem:[#allocation4 + $0x43]] }
 0x1b6   : > { %v516_v20 = vadd.f32 %v3818_v33, %v428_v47  ;;  %v1236_v11 = vmul.f32 %v1233_v4, %v3412_v21  ;;  %v699_v33 = vsel %vm5108_vm5, %v3577_v17, %v3575_v16 }
 0x1b7   : > { %v623_v58 = vpop.permute.xlu0 %622  ;;  %v597_v26 = vpop.permute.xlu1 %596 }
 0x1b8   : > { %v631_v50 = vadd.f32 %v623_v58, %v542_v56  ;;  %v602_v2 = vsel %vm579_vm2, %v597_v26, %v599_v9  ;;  %v700_v26 = vsel %vm5108_vm5, %v3575_v16, %v3585_v28  ;;  %v1280_v28 = vmul.f32 %v1278_v46, %v3420_v22 }
 0x1b9   : > { %v3877_v13 = vadd.f32 %v602_v2, %v3810_v63  ;;  %1262 = vrot.lane.b32.xlu0 %v1256_v32, %s3098_s8  ;;  %1240 = vrot.lane.b32.xlu1 %v1234_v54, %s3097_s5 }
 0x1ba   : > { %v3882_v43 = vadd.f32 %v730_v23, %v631_v50 }
 0x1bb   : > { %v3884_v53 = vpop.permute.xlu0 %642  ;;  %v601_v56 = vpop.permute.xlu1 %600 }
 0x1bc   : > { %v603_v36 = vsel %vm579_vm2, %v599_v9, %v601_v56  ;;  %v609_v63 = vadd.f32 %v601_v56, %v516_v20  ;;  %v540_v9 = vadd.f32 %v3791_v48, %v3773_v8  ;;  %v1300_v20 = vstv %s2809_s7  ;;  %s3104_s7 = smov 29  }
 0x1bd   : > { %v608_v32 = vadd.f32 %v603_v36, %v3825_v25  ;;  %1266 = vrot.lane.b32.xlu0 %v1258_v39, %s3098_s8  ;;  %1244 = vrot.lane.b32.xlu1 %v1236_v11, %s3097_s5  ;;  %v1257_v25 = vmul.f32 %v1255_v57, %v3420_v22  ;;  %v729_v8 = vsel %vm5108_vm5, %v3583_v27, %v3593_v41  ;;  %vm789_vm5 = vcmask 629760  }
 0x1be   : > { %v3898_v54 = vadd.f32 %v700_v26, %v609_v63  ;;  %v1279_v39 = vmul.f32 %v1278_v46, %v3391_v14  ;;  %v1303_v41 = vmul.f32 %v1300_v20, %v3412_v21  ;;  %v1281_v36 = vmul.f32 %v1278_v46, %v3412_v21 }
 0x1bf   : > { %v3902_v4 = vadd.f32 %v699_v33, %v608_v32  ;;  %v663_v47 = vpop.permute.xlu0 %662  ;;  %v621_v50 = vpop.permute.xlu1 %620  ;;  %v1322_v63 = vstv %s2810_s14  ;;  %s3105_s14 = smov 93  }
 0x1c0   : > { %5204 = vst [vmem:[#allocation43_spill] sm:$0xff] %v3898_v54  ;;  %v624_v2 = vsel %vm579_vm2, %v619_v7, %v621_v50  ;;  %v625_v23 = vsel %vm579_vm2, %v621_v50, %v623_v58  ;;  %v1301_v58 = vmul.f32 %v1300_v20, %v3391_v14  ;;  %v1324_v33 = vmul.f32 %v1322_v63, %v3420_v22 }
 0x1c1   : > { %v3908_v16 = vadd.f32 %v624_v2, %v540_v9  ;;  %v630_v56 = vadd.f32 %v625_v23, %v3835_v49  ;;  %1287 = vrot.lane.b32.xlu0 %v1280_v28, %s3098_s8  ;;  %1264 = vrot.lane.b32.xlu1 %v1257_v25, %s3098_s8  ;;  %v1302_v9 = vmul.f32 %v1300_v20, %v3420_v22  ;;  %v1344_v25 = vstv %s2811_s19  ;;  %s2850_s19 = sld [smem:[#allocation4 + $0x4b]] }
 0x1c2   : > { %v1323_v20 = vmul.f32 %v1322_v63, %v3391_v14  ;;  %v2119_v54 = vstv %s2842_s15  ;;  %s2817_s15 = sld [smem:[#allocation4 + $0x54]] }
 0x1c3   : > { %v3916_v48 = vadd.f32 %v729_v8, %v630_v56  ;;  %v3918_v57 = vpop.permute.xlu0 %666  ;;  %v3920_v7 = vpop.permute.xlu1 %640  ;;  %v1347_v8 = vmul.f32 %v1344_v25, %v3412_v21 }
 0x1c4   : > { %5205 = vst [vmem:[#allocation44_spill] sm:$0xff] %v3918_v57 }
 0x1c5   : > { %1307 = vrot.lane.b32.xlu0 %v1301_v58, %s3098_s8  ;;  %1285 = vrot.lane.b32.xlu1 %v1279_v39, %s3098_s8  ;;  %v704_v58 = vadd.f32 %v3577_v17, %v3877_v13  ;;  %v820_v17 = vsel %vm789_vm5, %v3626_v15, %v3624_v42  ;;  %v821_v15 = vsel %vm789_vm5, %v3624_v42, %v3634_v29 }
 0x1c7   : > { %v3926_v49 = vpop.permute.xlu0 %876  ;;  %v3928_v11 = vpop.permute.xlu1 %644 }
 0x1c9   : > { %1311 = vrot.lane.b32.xlu0 %v1303_v41, %s3098_s8  ;;  %1289 = vrot.lane.b32.xlu1 %v1281_v36, %s3098_s8 }
 0x1cb   : > { %v900_v26 = vpop.permute.xlu0 %899  ;;  %v665_v32 = vpop.permute.xlu1 %664 }
 0x1cc   : > { %v668_v50 = vsel %vm5109_vm1, %v663_v47, %v665_v32  ;;  %v669_v28 = vsel %vm5109_vm1, %v665_v32, %v3918_v57  ;;  %v1345_v47 = vmul.f32 %v1344_v25, %v3391_v14  ;;  %vm905_vm1 = vcmask 1014784  }
 0x1cd   : > { %v673_v46 = vadd.f32 %v668_v50, %v3861_v1  ;;  %v674_v2 = vadd.f32 %v669_v28, %v3864_v6  ;;  %1331 = vrot.lane.b32.xlu0 %v1324_v33, %s3098_s8  ;;  %1309 = vrot.lane.b32.xlu1 %v1302_v9, %s3098_s8  ;;  %v790_v1 = vsel %vm789_vm5, %v3607_v3, %v3617_v60  ;;  %v1385_v9 = vstv %s2812_s21  ;;  %s3106_s21 = smov 12  }
 0x1ce   : > { %v791_v6 = vsel %vm789_vm5, %v3617_v60, %v3615_v5  ;;  %v1325_v32 = vmul.f32 %v1322_v63, %v3412_v21  ;;  %v825_v63 = vadd.f32 %v820_v17, %v704_v58  ;;  %v1346_v28 = vmul.f32 %v1344_v25, %v3420_v22 }
 0x1cf   : > { %v3943_v23 = vpop.permute.xlu0 %903  ;;  %v3945_v56 = vpop.permute.xlu1 %878  ;;  %v796_v14 = vadd.f32 %v791_v6, %v674_v2  ;;  %v795_v36 = vadd.f32 %v790_v1, %v673_v46  ;;  %v3978_v46 = vsel %vm223_vm0, %v3437_v34, 0.0  ;;  %v734_v22 = vadd.f32 %v3583_v27, %v3908_v16 }
 0x1d0   : > { %5206 = vst [vmem:[#allocation45_spill] sm:$0xff] %v3943_v23  ;;  %5207 = vst [vmem:[#allocation46_spill] sm:$0xff] %v3945_v56  ;;  %v1409_v6 = vmul.f32 %v3451_v38, %v3978_v46  ;;  %v850_v27 = vsel %vm789_vm5, %v3632_v61, %v3643_v55  ;;  %v851_v38 = vsel %vm789_vm5, %v3643_v55, %v3641_v35  ;;  %v1519_v61 = vstv %s2818_s23  ;;  %s3107_s23 = smov 76  }
 0x1d1   : > { %1351 = vrot.lane.b32.xlu0 %v1345_v47, %s3097_s5  ;;  %1329 = vrot.lane.b32.xlu1 %v1323_v20, %s3098_s8  ;;  %5208 = vst [vmem:[#allocation47_spill] sm:$0xff] %v3978_v46  ;;  %v826_v20 = vadd.f32 %v821_v15, %v3902_v4  ;;  %v856_v4 = vadd.f32 %v851_v38, %v3916_v48  ;;  %v4039_v15 = vsel %vm227_vm3, %v3350_v0, 0.0  ;;  %vm994_vm0 = vcmask 490496  }
 0x1d2   : > { %5212 = vst [vmem:[#allocation51_spill] sm:$0xff] %v4039_v15  ;;  %v4055_v38 = vsel %vm229_vm10, %v3437_v34, 0.0  ;;  %v2011_v5 = vstv %s2838_s20  ;;  %vm1087_vm3 = vcmask 875520   ;;  %s3110_s20 = smov 106  }
 0x1d3   : > { %v925_v39 = vpop.permute.xlu0 %924  ;;  %v902_v41 = vpop.permute.xlu1 %901  ;;  %5214 = vst [vmem:[#allocation53_spill] sm:$0xff] %v4055_v38 }
 0x1d4   : > { %v906_v33 = vsel %vm905_vm1, %v900_v26, %v902_v41  ;;  %v907_v3 = vsel %vm905_vm1, %v902_v41, %v3943_v23  ;;  %v1387_v26 = vmul.f32 %v1385_v9, %v3462_v40 }
 0x1d5   : > { %v3964_v50 = vadd.f32 %v906_v33, %v795_v36  ;;  %v3966_v60 = vadd.f32 %v907_v3, %v796_v14  ;;  %1355 = vrot.lane.b32.xlu0 %v1347_v8, %s3097_s5  ;;  %1333 = vrot.lane.b32.xlu1 %v1325_v32, %s3098_s8  ;;  %v1386_v8 = vmul.f32 %v1385_v9, %v3978_v46  ;;  %v1430_v14 = vstv %s2814_s22  ;;  %s2846_s8 = sld [smem:[#allocation4 + $0x5f]] }
 0x1d6   : > { %v1432_v36 = vmul.f32 %v1430_v14, %v3462_v40  ;;  %v1388_v32 = vmul.f32 %v1385_v9, %v3447_v37  ;;  %v1520_v9 = vmul.f32 %v1519_v61, %v3978_v46  ;;  %s2854_s22 = sld [smem:[#allocation4 + $0x37]] }
 0x1d7   : > { %v945_v21 = vpop.permute.xlu0 %944  ;;  %v923_v13 = vpop.permute.xlu1 %922 }
 0x1d8   : > { %v928_v2 = vsel %vm905_vm1, %v923_v13, %v925_v39 }
 0x1d9   : > { %v3981_v47 = vadd.f32 %v928_v2, %v825_v63  ;;  %1394 = vrot.lane.b32.xlu0 %v1387_v26, %s3099_s26  ;;  %1353 = vrot.lane.b32.xlu1 %v1346_v28, %s3097_s5  ;;  %v1522_v28 = vmul.f32 %v1519_v61, %v3447_v37  ;;  %v1433_v2 = vmul.f32 %v1430_v14, %v3447_v37  ;;  %s3103_s5 = smov 110  }
 0x1db   : > { %v3990_v25 = vpop.permute.xlu0 %948  ;;  %v3993_v1 = vpop.permute.xlu1 %926 }
 0x1dc   : > { %5209 = vst [vmem:[#allocation48_spill] sm:$0xff] %v3993_v1  ;;  %v929_v58 = vsel %vm905_vm1, %v925_v39, %v3993_v1  ;;  %v855_v39 = vadd.f32 %v850_v27, %v734_v22  ;;  %v1611_v22 = vstv %s2822_s27  ;;  %v1703_v27 = vstv %s2826_s28  ;;  %s2858_s27 = sld [smem:[#allocation4 + $0x53]]  ;;  %s3108_s28 = smov 123  }
 0x1dd   : > { %v4000_v41 = vadd.f32 %v929_v58, %v826_v20  ;;  %1415 = vrot.lane.b32.xlu0 %v1409_v6, %s3099_s26  ;;  %1392 = vrot.lane.b32.xlu1 %v1386_v8, %s3099_s26  ;;  %v1613_v8 = vmul.f32 %v1611_v22, %v4039_v15  ;;  %v1521_v58 = vmul.f32 %v1519_v61, %v3462_v40 }
 0x1df   : > { %v4010_v42 = vpop.permute.xlu0 %968  ;;  %v947_v16 = vpop.permute.xlu1 %946 }
 0x1e0   : > { %v950_v33 = vsel %vm905_vm1, %v945_v21, %v947_v16  ;;  %v951_v3 = vsel %vm905_vm1, %v947_v16, %v3990_v25  ;;  %v1431_v21 = vmul.f32 %v1430_v14, %v3978_v46  ;;  %v4050_v14 = vsel %vm226_vm4, %v3437_v34, 0.0 }
 0x1e1   : > { %v4018_v17 = vadd.f32 %v950_v33, %v855_v39  ;;  %v4020_v55 = vadd.f32 %v951_v3, %v856_v4  ;;  %1439 = vrot.lane.b32.xlu0 %v1432_v36, %s3099_s26  ;;  %1396 = vrot.lane.b32.xlu1 %v1388_v32, %s3099_s26  ;;  %5213 = vst [vmem:[#allocation52_spill] sm:$0xff] %v4050_v14 }
 0x1e2   : > { %v1704_v3 = vmul.f32 %v1703_v27, %v4055_v38  ;;  %v1612_v61 = vmul.f32 %v1611_v22, %v4050_v14 }
 0x1e3   : > { %v989_v48 = vpop.permute.xlu0 %988  ;;  %v4024_v13 = vpop.permute.xlu1 %966 }
 0x1e5   : > { %1526 = vrot.lane.b32.xlu0 %v1520_v9, %s3100_s30  ;;  %1437 = vrot.lane.b32.xlu1 %v1431_v21, %s3099_s26 }
 0x1e7   : > { %v4030_v63 = vpop.permute.xlu0 %992  ;;  %v4032_v26 = vpop.permute.xlu1 %970 }
 0x1e8   : > { %5210 = vst [vmem:[#allocation49_spill] sm:$0xff] %v4030_v63  ;;  %5211 = vst [vmem:[#allocation50_spill] sm:$0xff] %v4032_v26  ;;  %v4122_v26 = vsel %vm232_vm7, %v3437_v34, 0.0  ;;  %vm1064_vm7 = vcmask 351232  }
 0x1e9   : > { %1530 = vrot.lane.b32.xlu0 %v1522_v28, %s3100_s30  ;;  %1441 = vrot.lane.b32.xlu1 %v1433_v2, %s3099_s26  ;;  %v4089_v2 = vsel %vm230_vm14, %v3350_v0, 0.0  ;;  %5223 = vst [vmem:[#allocation61_spill] sm:$0xff] %v4122_v26  ;;  %vm1557_vm14 = vcmask 1039360  }
 0x1ea   : > { %5218 = vst [vmem:[#allocation57_spill] sm:$0xff] %v4089_v2 }
 0x1eb   : > { %v4043_v20 = vpop.permute.xlu0 %1013  ;;  %v991_v6 = vpop.permute.xlu1 %990 }
 0x1ec   : > { %v995_v4 = vsel %vm994_vm0, %v989_v48, %v991_v6  ;;  %v996_v16 = vsel %vm994_vm0, %v991_v6, %v4030_v63  ;;  %v4071_v48 = vsel %vm228_vm6, %v3429_v31, 0.0  ;;  %v1793_v6 = vstv %s2830_s4  ;;  %s3109_s4 = smov 42  }
 0x1ed   : > { %v1000_v39 = vadd.f32 %v995_v4, %v3964_v50  ;;  %v1001_v36 = vadd.f32 %v996_v16, %v3966_v60  ;;  %1620 = vrot.lane.b32.xlu0 %v1613_v8, %s3101_s17  ;;  %1528 = vrot.lane.b32.xlu1 %v1521_v58, %s3100_s30  ;;  %5215 = vst [vmem:[#allocation54_spill] sm:$0xff] %v4071_v48  ;;  %v4076_v50 = vsel %vm231_vm12, %v3429_v31, 0.0  ;;  %v1890_v8 = vstv %s2834_s6  ;;  %s2816_s6 = sld [smem:[#allocation4 + $0x4d]] }
 0x1ee   : > { %5216 = vst [vmem:[#allocation55_spill] sm:$0xff] %v4076_v50  ;;  %v1706_v21 = vmul.f32 %v1703_v27, %v4076_v50  ;;  %v1614_v28 = vmul.f32 %v1611_v22, %v4071_v48  ;;  %v1795_v16 = vmul.f32 %v1793_v6, %v4089_v2  ;;  %v4097_v22 = vld [vmem:[#allocation3] sm:$0x7]  ;;  %v1794_v23 = vmul.f32 %v1793_v6, %v4055_v38 }
 0x1ef   : > { %v4064_v32 = vpop.permute.xlu0 %1033  ;;  %v1012_v33 = vpop.permute.xlu1 %1011  ;;  %v2012_v57 = vmul.f32 %v4097_v22, %v2011_v5  ;;  %vm5270_vm6 = vcmask 105472   ;;  %vm1465_vm12 = vcmask 654336  }
 0x1f0   : > { %v1017_v5 = vsel %vm994_vm0, %v1012_v33, %v4043_v20  ;;  %v2120_v33 = vmul.f32 %v2119_v54, %v4122_v26 }
 0x1f1   : > { %1710 = vrot.lane.b32.xlu0 %v1704_v3, %s3102_s3  ;;  %1618 = vrot.lane.b32.xlu1 %v1612_v61, %s3101_s17  ;;  %v1705_v3 = vmul.f32 %v1703_v27, %v4089_v2  ;;  %v1891_v61 = vmul.f32 %v4097_v22, %v1890_v8 }
 0x1f3   : > { %v4080_v60 = vpop.permute.xlu0 %1037  ;;  %v4082_v9 = vpop.permute.xlu1 %1015 }
 0x1f4   : > { %5217 = vst [vmem:[#allocation56_spill] sm:$0xff] %v4082_v9 }
 0x1f5   : > { %1714 = vrot.lane.b32.xlu0 %v1706_v21, %s3102_s3  ;;  %1622 = vrot.lane.b32.xlu1 %v1614_v28, %s3101_s17  ;;  %v1896_v28 = vrot.slane %v1891_v61, %v3266_v24 }
 0x1f7   : > { %v4093_v58 = vpop.permute.xlu0 %1060  ;;  %v1036_v4 = vpop.permute.xlu1 %1035 }
 0x1f8   : > { %5219 = vst [vmem:[#allocation58_spill] sm:$0xff] %v4093_v58 }
 0x1f9   : > { %1802 = vrot.lane.b32.xlu0 %v1795_v16, %s3103_s5  ;;  %1712 = vrot.lane.b32.xlu1 %v1705_v3, %s3102_s3  ;;  %v1904_v16 = vrot.slane %v1891_v61, %v3276_v30  ;;  %v1796_v3 = vmul.f32 %v1793_v6, %v4076_v50 }
 0x1fb   : > { %v1082_v63 = vpop.permute.xlu0 %1081  ;;  %v4102_v21 = vpop.permute.xlu1 %1058 }
 0x1fd   : > { %1905 = vrot.lane.b32.xlu0 %v1896_v28, %s3104_s7  ;;  %1800 = vrot.lane.b32.xlu1 %v1794_v23, %s3103_s5  ;;  %v5222_v28 = vld [vmem:[#allocation15_spill] sm:$0xff] }
 0x1fe   : > { %v2021_v29 = vrot.slane %v2012_v57, %v5222_v28  ;;  %v1900_v23 = vrot.slane %v1891_v61, %v5222_v28  ;;  %v1022_v61 = vadd.f32 %v1017_v5, %v3981_v47 }
 0x1ff   : > { %v4108_v27 = vpop.permute.xlu0 %1085  ;;  %v4110_v8 = vpop.permute.xlu1 %1062 }
 0x200   : > { %5220 = vst [vmem:[#allocation59_spill] sm:$0xff] %v4108_v27  ;;  %5221 = vst [vmem:[#allocation60_spill] sm:$0xff] %v4110_v8 }
 0x201   : > { %1909 = vrot.lane.b32.xlu0 %v1904_v16, %s3104_s7  ;;  %1804 = vrot.lane.b32.xlu1 %v1796_v3, %s3103_s5 }
 0x203   : > { %v1107_v62 = vpop.permute.xlu0 %1106  ;;  %v1084_v1 = vpop.permute.xlu1 %1083 }
 0x204   : > { %v1088_v6 = vsel %vm1087_vm3, %v1082_v63, %v1084_v1  ;;  %v1089_v16 = vsel %vm1087_vm3, %v1084_v1, %v4108_v27  ;;  %v2017_v63 = vrot.slane %v2012_v57, %v3266_v24  ;;  %v4141_v1 = vsel %vm234_vm8, %v3429_v31, 0.0 }
 0x205   : > { %v4129_v3 = vadd.f32 %v1088_v6, %v1000_v39  ;;  %v4131_v58 = vadd.f32 %v1089_v16, %v1001_v36  ;;  %2028 = vrot.lane.b32.xlu0 %v2021_v29, %s3105_s14  ;;  %1907 = vrot.lane.b32.xlu1 %v1900_v23, %s3104_s7  ;;  %5224 = vst [vmem:[#allocation62_spill] sm:$0xff] %v4141_v1  ;;  %v2208_v16 = vstv %s2846_s8  ;;  %vm1223_vm8 = vcmask 211968   ;;  %s2820_s8 = sld [smem:[#allocation4 + $0x39]] }
 0x206   : > { %v1018_v39 = vsel %vm994_vm0, %v4043_v20, %v4082_v9  ;;  %v2122_v6 = vmul.f32 %v2119_v54, %v4141_v1  ;;  %v2025_v20 = vrot.slane %v2012_v57, %v3276_v30  ;;  %v2209_v45 = vmul.f32 %v2208_v16, %v4122_v26 }
 0x207   : > { %v1127_v8 = vpop.permute.xlu0 %1126  ;;  %v1105_v56 = vpop.permute.xlu1 %1104  ;;  %v1023_v47 = vadd.f32 %v1018_v39, %v4000_v41  ;;  %v1040_v41 = vsel %vm994_vm0, %v1036_v4, %v4080_v60 }
 0x208   : > { %v1110_v29 = vsel %vm1087_vm3, %v1105_v56, %v1107_v62  ;;  %v4161_v56 = vsel %vm233_vm9, %v3350_v0, 0.0  ;;  %v1045_v51 = vadd.f32 %v1040_v41, %v4020_v55  ;;  %vm1268_vm9 = vcmask 736256  }
 0x209   : > { %v4147_v36 = vadd.f32 %v1110_v29, %v1022_v61  ;;  %2126 = vrot.lane.b32.xlu0 %v2120_v33, %s3106_s21  ;;  %2026 = vrot.lane.b32.xlu1 %v2017_v63, %s3105_s14  ;;  %5226 = vst [vmem:[#allocation64_spill] sm:$0xff] %v4161_v56  ;;  %v1039_v61 = vsel %vm994_vm0, %v4064_v32, %v1036_v4  ;;  %vm1941_vm0 = vcmask 760832  }
 0x20a   : > { %v1044_v57 = vadd.f32 %v1039_v61, %v4018_v17  ;;  %v2210_v32 = vmul.f32 %v2208_v16, %v4161_v56  ;;  %v2121_v4 = vmul.f32 %v2119_v54, %v4161_v56  ;;  %v2300_v17 = vstv %s2850_s19  ;;  %s2821_s19 = sld [smem:[#allocation4 + $0x40]] }
 0x20b   : > { %v4152_v23 = vpop.permute.xlu0 %1130  ;;  %v4154_v5 = vpop.permute.xlu1 %1108 }
 0x20c   : > { %5225 = vst [vmem:[#allocation63_spill] sm:$0xff] %v4154_v5  ;;  %v1111_v33 = vsel %vm1087_vm3, %v1107_v62, %v4154_v5  ;;  %v5230_v5 = vld [vmem:[#allocation23_spill] sm:$0xff] }
 0x20d   : > { %v4169_v63 = vadd.f32 %v1111_v33, %v1023_v47  ;;  %2130 = vrot.lane.b32.xlu0 %v2122_v6, %s3106_s21  ;;  %2030 = vrot.lane.b32.xlu1 %v2025_v20, %s3105_s14  ;;  %v4185_v47 = vsel %vm235_vm11, %v3437_v34, 0.0  ;;  %v4200_v34 = vsel %vm237_vm13, %v3429_v31, 0.0  ;;  %vm5258_vm11 = vcmask 384000  }
 0x20e   : > { %v2301_v20 = vmul.f32 %v2300_v17, %v4185_v47  ;;  %v2303_v33 = vmul.f32 %v2300_v17, %v4200_v34  ;;  %vm5261_vm13 = vcmask 244736   ;;  %vm5266_vm4 = vmmov %vm5258_vm11 }
 0x20f   : > { %v4175_v0 = vpop.permute.xlu0 %1150  ;;  %v1129_v39 = vpop.permute.xlu1 %1128  ;;  %vm5271_vm10 = vmmov %vm5261_vm13 }
 0x210   : > { %v1132_v29 = vsel %vm1087_vm3, %v1127_v8, %v1129_v39  ;;  %v1133_v62 = vsel %vm1087_vm3, %v1129_v39, %v4152_v23  ;;  %v5228_v39 = vld [vmem:[#allocation21_spill] sm:$0xff] }
 0x211   : > { %v4187_v55 = vadd.f32 %v1132_v29, %v1044_v57  ;;  %v4189_v6 = vadd.f32 %v1133_v62, %v1045_v51  ;;  %2217 = vrot.lane.b32.xlu0 %v2210_v32, %s3107_s23  ;;  %2128 = vrot.lane.b32.xlu1 %v2121_v4, %s3106_s21  ;;  %v2211_v57 = vmul.f32 %v2208_v16, %v4141_v1  ;;  %v2392_v51 = vstv %s2854_s22  ;;  %v5229_v4 = vld [vmem:[#allocation17_spill] sm:$0xff]  ;;  %s2825_s22 = sld [smem:[#allocation4 + $0x5c]] }
 0x212   : > { %v2394_v32 = vmul.f32 %v2392_v51, %v5228_v39  ;;  %v2302_v29 = vmul.f32 %v2300_v17, %v5229_v4 }
 0x213   : > { %v1171_v54 = vpop.permute.xlu0 %1170  ;;  %v4193_v8 = vpop.permute.xlu1 %1148 }
 0x215   : > { %2307 = vrot.lane.b32.xlu0 %v2301_v20, %s3108_s28  ;;  %2215 = vrot.lane.b32.xlu1 %v2209_v45, %s3107_s23  ;;  %v2482_v45 = vstv %s2858_s27  ;;  %s2828_s27 = sld [smem:[#allocation4 + $0x41]] }
 0x216   : > { %v2483_v17 = vmul.f32 %v2482_v45, %v5230_v5 }
 0x217   : > { %v4204_v61 = vpop.permute.xlu0 %1174  ;;  %v4206_v41 = vpop.permute.xlu1 %1152 }
 0x218   : > { %5227 = vst [vmem:[#allocation65_spill] sm:$0xff] %v4204_v61 }
 0x219   : > { %2311 = vrot.lane.b32.xlu0 %v2303_v33, %s3108_s28  ;;  %2219 = vrot.lane.b32.xlu1 %v2211_v57, %s3107_s23 }
 0x21b   : > { %v1195_v44 = vpop.permute.xlu0 %1194  ;;  %v1173_v31 = vpop.permute.xlu1 %1172 }
 0x21c   : > { %v1176_v62 = vsel %vm1064_vm7, %v1171_v54, %v1173_v31  ;;  %v1177_v20 = vsel %vm1064_vm7, %v1173_v31, %v4204_v61  ;;  %v2393_v54 = vmul.f32 %v2392_v51, %v5230_v5  ;;  %v5256_v5 = vld [vmem:[#allocation38_spill] sm:$0xff] }
 0x21d   : > { %v1181_v16 = vadd.f32 %v1176_v62, %v4129_v3  ;;  %v1182_v27 = vadd.f32 %v1177_v20, %v4131_v58  ;;  %2401 = vrot.lane.b32.xlu0 %v2394_v32, %s3109_s4  ;;  %2309 = vrot.lane.b32.xlu1 %v2302_v29, %s3108_s28  ;;  %v857_v3 = vadd.f32 %v3641_v35, %v3882_v43  ;;  %v5232_v62 = vld [vmem:[#allocation24_spill] sm:$0xff] }
 0x21e   : > { %v2485_v20 = vmul.f32 %v2482_v45, %v5232_v62 }
 0x21f   : > { %v4221_v33 = vpop.permute.xlu0 %1217  ;;  %v1193_v57 = vpop.permute.xlu1 %1192  ;;  %v957_v31 = vadd.f32 %v3990_v25, %v857_v3 }
 0x220   : > { %v1198_v9 = vsel %vm1064_vm7, %v1193_v57, %v1195_v44  ;;  %v2395_v57 = vmul.f32 %v2392_v51, %v5232_v62  ;;  %v2484_v51 = vmul.f32 %v2482_v45, %v5228_v39 }
 0x221   : > { %v1203_v58 = vadd.f32 %v1198_v9, %v4147_v36  ;;  %2489 = vrot.lane.b32.xlu0 %v2483_v17, %s3110_s20  ;;  %2399 = vrot.lane.b32.xlu1 %v2393_v54, %s3109_s4  ;;  %v1046_v35 = vadd.f32 %v4080_v60, %v957_v31  ;;  %v1475_v60 = vstv %s2816_s6  ;;  %v5234_v54 = vld [vmem:[#allocation25_spill] sm:$0xff]  ;;  %v1497_v31 = vstv %s2817_s15  ;;  %s3111_s6 = smov 63   ;;  %s2829_s15 = sld [smem:[#allocation4 + $0x48]] }
 0x222   : > { %v1477_v45 = vmul.f32 %v1475_v60, %v3462_v40 }
 0x223   : > { %v1222_v32 = vpop.permute.xlu0 %1221  ;;  %v4232_v29 = vpop.permute.xlu1 %1196  ;;  %v1139_v25 = vadd.f32 %v4152_v23, %v1046_v35  ;;  %v1476_v35 = vmul.f32 %v1475_v60, %v3978_v46 }
 0x224   : > { %5231 = vst [vmem:[#allocation21_spill] sm:$0xff] %v4232_v29  ;;  %v1199_v61 = vsel %vm1064_vm7, %v1195_v44, %v4232_v29 }
 0x225   : > { %v1204_v43 = vadd.f32 %v1199_v61, %v4169_v63  ;;  %2493 = vrot.lane.b32.xlu0 %v2485_v20, %s3110_s20  ;;  %2403 = vrot.lane.b32.xlu1 %v2395_v57, %s3109_s4  ;;  %v1498_v57 = vmul.f32 %v1497_v31, %v3978_v46 }
 0x227   : > { %v4243_v9 = vpop.permute.xlu0 %1242  ;;  %v1220_v36 = vpop.permute.xlu1 %1219 }
 0x228   : > { %v1224_v44 = vsel %vm1223_vm8, %v4221_v33, %v1220_v36  ;;  %v1225_v17 = vsel %vm1223_vm8, %v1220_v36, %v1222_v32  ;;  %v5235_v32 = vld [vmem:[#allocation26_spill] sm:$0xff] }
 0x229   : > { %v1230_v63 = vadd.f32 %v1224_v44, %v4189_v6  ;;  %v4250_v61 = vadd.f32 %v1225_v17, %v1139_v25  ;;  %1419 = vrot.lane.b32.xlu0 %v5234_v54, %s3099_s26  ;;  %2491 = vrot.lane.b32.xlu1 %v2484_v51, %s3110_s20  ;;  %v1500_v51 = vmul.f32 %v1497_v31, %v3447_v37 }
 0x22a   : > { %v1478_v44 = vmul.f32 %v1475_v60, %v3447_v37  ;;  %v1589_v37 = vstv %s2821_s19  ;;  %s2833_s19 = sld [smem:[#allocation4 + $0x34]] }
 0x22b   : > { %5233 = vst [vmem:[#allocation17_spill] sm:$0xff] %v4250_v61  ;;  %v1263_v23 = vpop.permute.xlu0 %1262  ;;  %v4255_v3 = vpop.permute.xlu1 %1240  ;;  %v1499_v61 = vmul.f32 %v1497_v31, %v3462_v40 }
 0x22d   : > { %1484 = vrot.lane.b32.xlu0 %v1477_v45, %s3100_s30  ;;  %1417 = vrot.lane.b32.xlu1 %v5235_v32, %s3099_s26  ;;  %v1567_v45 = vstv %s2820_s8  ;;  %s2824_s26 = sld [smem:[#allocation4 + $0x55]] }
 0x22e   : > { %v1569_v46 = vmul.f32 %v1567_v45, %v4039_v15  ;;  %s2832_s8 = sld [smem:[#allocation4 + $0x5d]] }
 0x22f   : > { %v4261_v6 = vpop.permute.xlu0 %1266  ;;  %v4263_v20 = vpop.permute.xlu1 %1244 }
 0x230   : > { %5236 = vst [vmem:[#allocation25_spill] sm:$0xff] %v4261_v6 }
 0x231   : > { %1504 = vrot.lane.b32.xlu0 %v1498_v57, %s3100_s30  ;;  %1482 = vrot.lane.b32.xlu1 %v1476_v35, %s3100_s30 }
 0x233   : > { %v1288_v25 = vpop.permute.xlu0 %1287  ;;  %v1265_v36 = vpop.permute.xlu1 %1264 }
 0x234   : > { %v1269_v17 = vsel %vm1268_vm9, %v1263_v23, %v1265_v36  ;;  %v1270_v54 = vsel %vm1268_vm9, %v1265_v36, %v4261_v6  ;;  %v1590_v36 = vmul.f32 %v1589_v37, %v4050_v14 }
 0x235   : > { %v1274_v32 = vadd.f32 %v1269_v17, %v1181_v16  ;;  %v1275_v29 = vadd.f32 %v1270_v54, %v1182_v27  ;;  %1508 = vrot.lane.b32.xlu0 %v1500_v51, %s3100_s30  ;;  %1486 = vrot.lane.b32.xlu1 %v1478_v44, %s3100_s30  ;;  %v1568_v51 = vmul.f32 %v1567_v45, %v4050_v14 }
 0x236   : > { %v1592_v17 = vmul.f32 %v1589_v37, %v4071_v48  ;;  %v1570_v54 = vmul.f32 %v1567_v45, %v4071_v48  ;;  %v1591_v45 = vmul.f32 %v1589_v37, %v4039_v15 }
 0x237   : > { %v1308_v57 = vpop.permute.xlu0 %1307  ;;  %v1286_v35 = vpop.permute.xlu1 %1285 }
 0x238   : > { %v1291_v60 = vsel %vm1268_vm9, %v1286_v35, %v1288_v25 }
 0x239   : > { %v4279_v23 = vadd.f32 %v1291_v60, %v1203_v58  ;;  %1576 = vrot.lane.b32.xlu0 %v1569_v46, %s3101_s17  ;;  %1506 = vrot.lane.b32.xlu1 %v1499_v61, %s3100_s30  ;;  %v1229_v46 = vadd.f32 %v4221_v33, %v4187_v55 }
 0x23b   : > { %5237 = vst [vmem:[#allocation26_spill] sm:$0xff] %v4279_v23  ;;  %v4283_v27 = vpop.permute.xlu0 %1311  ;;  %v4285_v16 = vpop.permute.xlu1 %1289 }
 0x23c   : > { %5238 = vst [vmem:[#allocation66_spill] sm:$0xff] %v4283_v27  ;;  %5239 = vst [vmem:[#allocation67_spill] sm:$0xff] %v4285_v16  ;;  %v1292_v31 = vsel %vm1268_vm9, %v1288_v25, %v4285_v16  ;;  %v1656_v25 = vstv %s2824_s26  ;;  %s2836_s26 = sld [smem:[#allocation4 + $0x49]] }
 0x23d   : > { %v4291_v44 = vadd.f32 %v1292_v31, %v1204_v43  ;;  %1596 = vrot.lane.b32.xlu0 %v1590_v36, %s3101_s17  ;;  %1574 = vrot.lane.b32.xlu1 %v1568_v51, %s3101_s17  ;;  %v1658_v51 = vmul.f32 %v1656_v25, %v4039_v15 }
 0x23f   : > { %5240 = vst [vmem:[#allocation68_spill] sm:$0xff] %v4291_v44  ;;  %v4297_v58 = vpop.permute.xlu0 %1331  ;;  %v1310_v61 = vpop.permute.xlu1 %1309  ;;  %v1771_v44 = vstv %s2829_s15  ;;  %s2841_s15 = sld [smem:[#allocation4 + $0x3c]] }
 0x240   : > { %v1313_v35 = vsel %vm1268_vm9, %v1308_v57, %v1310_v61  ;;  %v1314_v43 = vsel %vm1268_vm9, %v1310_v61, %v4283_v27  ;;  %v1678_v57 = vstv %s2825_s22  ;;  %v1657_v61 = vmul.f32 %v1656_v25, %v4050_v14  ;;  %s2837_s22 = sld [smem:[#allocation4 + $0x50]] }
 0x241   : > { %v4304_v60 = vadd.f32 %v1313_v35, %v1229_v46  ;;  %v4306_v36 = vadd.f32 %v1314_v43, %v1230_v63  ;;  %1600 = vrot.lane.b32.xlu0 %v1592_v17, %s3101_s17  ;;  %1578 = vrot.lane.b32.xlu1 %v1570_v54, %s3101_s17  ;;  %v1679_v46 = vmul.f32 %v1678_v57, %v4050_v14 }
 0x242   : > { %v1681_v54 = vmul.f32 %v1678_v57, %v4071_v48  ;;  %v1659_v35 = vmul.f32 %v1656_v25, %v4071_v48  ;;  %v1951_v48 = vstv %s2836_s26  ;;  %s2845_s26 = sld [smem:[#allocation4 + $0x58]] }
 0x243   : > { %5241 = vst [vmem:[#allocation69_spill] sm:$0xff] %v4304_v60  ;;  %5242 = vst [vmem:[#allocation70_spill] sm:$0xff] %v4306_v36  ;;  %v1352_v55 = vpop.permute.xlu0 %1351  ;;  %v4310_v33 = vpop.permute.xlu1 %1329 }
 0x245   : > { %1665 = vrot.lane.b32.xlu0 %v1658_v51, %s3111_s6  ;;  %1598 = vrot.lane.b32.xlu1 %v1591_v45, %s3101_s17  ;;  %v1749_v45 = vstv %s2828_s27  ;;  %s2840_s27 = sld [smem:[#allocation4 + $0x35]] }
 0x246   : > { %v1751_v25 = vmul.f32 %v1749_v45, %v4089_v2  ;;  %v1981_v16 = vstv %s2837_s22  ;;  %s2848_s22 = sld [smem:[#allocation4 + $0x3d]] }
 0x247   : > { %v4316_v63 = vpop.permute.xlu0 %1355  ;;  %v4318_v31 = vpop.permute.xlu1 %1333 }
 0x248   : > { %5243 = vst [vmem:[#allocation71_spill] sm:$0xff] %v4316_v63 }
 0x249   : > { %1685 = vrot.lane.b32.xlu0 %v1679_v46, %s3111_s6  ;;  %1663 = vrot.lane.b32.xlu1 %v1657_v61, %s3111_s6 }
 0x24b   : > { %v4324_v37 = vpop.permute.xlu0 %1394  ;;  %v1354_v17 = vpop.permute.xlu1 %1353 }
 0x24c   : > { %5244 = vst [vmem:[#allocation72_spill] sm:$0xff] %v4324_v37  ;;  %v1357_v43 = vsel %vm1223_vm8, %v1352_v55, %v1354_v17  ;;  %v1358_v51 = vsel %vm1223_vm8, %v1354_v17, %v4316_v63  ;;  %v1680_v55 = vmul.f32 %v1678_v57, %v4039_v15  ;;  %v1772_v17 = vmul.f32 %v1771_v44, %v4055_v38 }
 0x24d   : > { %v4331_v6 = vadd.f32 %v1357_v43, %v1274_v32  ;;  %v4333_v60 = vadd.f32 %v1358_v51, %v1275_v29  ;;  %1689 = vrot.lane.b32.xlu0 %v1681_v54, %s3111_s6  ;;  %1667 = vrot.lane.b32.xlu1 %v1659_v35, %s3111_s6  ;;  %v1750_v54 = vmul.f32 %v1749_v45, %v4055_v38 }
 0x24e   : > { %v1774_v43 = vmul.f32 %v1771_v44, %v4076_v50  ;;  %v1752_v51 = vmul.f32 %v1749_v45, %v4076_v50 }
 0x24f   : > { %5245 = vst [vmem:[#allocation73_spill] sm:$0xff] %v4331_v6  ;;  %5246 = vst [vmem:[#allocation74_spill] sm:$0xff] %v4333_v60  ;;  %v4337_v46 = vpop.permute.xlu0 %1415  ;;  %v4339_v61 = vpop.permute.xlu1 %1392  ;;  %v1773_v6 = vmul.f32 %v1771_v44, %v4089_v2 }
 0x250   : > { %5247 = vst [vmem:[#allocation75_spill] sm:$0xff] %v4337_v46  ;;  %5248 = vst [vmem:[#allocation76_spill] sm:$0xff] %v4339_v61  ;;  %v2097_v61 = vstv %s2841_s15  ;;  %s4528_s15 = sld [smem:[#allocation4 + $0x60]] }
 0x251   : > { %1758 = vrot.lane.b32.xlu0 %v1751_v25, %s3103_s5  ;;  %1687 = vrot.lane.b32.xlu1 %v1680_v55, %s3111_s6  ;;  %v1837_v25 = vstv %s2832_s8  ;;  %v1859_v55 = vstv %s2833_s19  ;;  %s2766_s8 = sld [smem:[#allocation4 + $0x15]]  ;;  %v2100_v40 = vmul.f32 %v2097_v61, %v4141_v1 }
 0x252   : > { %v1860_v63 = vmul.f32 %v4097_v22, %v1859_v55  ;;  %v1838_v15 = vmul.f32 %v1837_v25, %v4055_v38  ;;  %s2844_s19 = sld [smem:[#allocation4 + $0x51]] }
 0x253   : > { %v4345_v29 = vpop.permute.xlu0 %1439  ;;  %v4347_v32 = vpop.permute.xlu1 %1396 }
 0x254   : > { %5249 = vst [vmem:[#allocation77_spill] sm:$0xff] %v4347_v32  ;;  %v1869_v37 = vrot.slane %v1860_v63, %v5222_v28  ;;  %v1982_v32 = vmul.f32 %v4097_v22, %v1981_v16 }
 0x255   : > { %1778 = vrot.lane.b32.xlu0 %v1772_v17, %s3103_s5  ;;  %1756 = vrot.lane.b32.xlu1 %v1750_v54, %s3103_s5  ;;  %v1839_v54 = vmul.f32 %v1837_v25, %v4089_v2  ;;  %v1952_v2 = vmul.f32 %v4097_v22, %v1951_v48 }
 0x257   : > { %v4353_v57 = vpop.permute.xlu0 %1526  ;;  %v4355_v35 = vpop.permute.xlu1 %1437 }
 0x258   : > { %v2164_v62 = vstv %s2844_s19  ;;  %s3112_s19 = smov 59  }
 0x259   : > { %1782 = vrot.lane.b32.xlu0 %v1774_v43, %s3103_s5  ;;  %1760 = vrot.lane.b32.xlu1 %v1752_v51, %s3103_s5  ;;  %v1865_v51 = vrot.slane %v1860_v63, %v3266_v24 }
 0x25b   : > { %v4361_v60 = vpop.permute.xlu0 %1530  ;;  %v4363_v17 = vpop.permute.xlu1 %1441 }
 0x25d   : > { %1846 = vrot.lane.b32.xlu0 %v1839_v54, %s3102_s3  ;;  %1780 = vrot.lane.b32.xlu1 %v1773_v6, %s3103_s5  ;;  %v1873_v54 = vrot.slane %v1860_v63, %v3276_v30  ;;  %v1840_v6 = vmul.f32 %v1837_v25, %v4076_v50  ;;  %v1995_v63 = vrot.slane %v1982_v32, %v3276_v30 }
 0x25f   : > { %v4370_v45 = vpop.permute.xlu0 %1620  ;;  %v4372_v43 = vpop.permute.xlu1 %1528 }
 0x261   : > { %1874 = vrot.lane.b32.xlu0 %v1865_v51, %s3104_s7  ;;  %1844 = vrot.lane.b32.xlu1 %v1838_v15, %s3102_s3  ;;  %v1961_v15 = vrot.slane %v1952_v2, %v5222_v28 }
 0x263   : > { %v4378_v44 = vpop.permute.xlu0 %1710  ;;  %v4380_v55 = vpop.permute.xlu1 %1618 }
 0x265   : > { %1878 = vrot.lane.b32.xlu0 %v1873_v54, %s3104_s7  ;;  %1848 = vrot.lane.b32.xlu1 %v1840_v6, %s3102_s3  ;;  %v1987_v54 = vrot.slane %v1982_v32, %v3266_v24  ;;  %v1957_v6 = vrot.slane %v1952_v2, %v3266_v24 }
 0x267   : > { %v4387_v38 = vpop.permute.xlu0 %1714  ;;  %v4389_v51 = vpop.permute.xlu1 %1622 }
 0x269   : > { %1968 = vrot.lane.b32.xlu0 %v1961_v15, %s3105_s14  ;;  %1876 = vrot.lane.b32.xlu1 %v1869_v37, %s3104_s7  ;;  %v1965_v37 = vrot.slane %v1952_v2, %v3276_v30  ;;  %v2074_v15 = vstv %s2840_s27  ;;  %v285_v2 = vstv %s2766_s8  ;;  %s2849_s27 = sld [smem:[#allocation4 + $0x44]] }
 0x26a   : > { %v2075_v23 = vmul.f32 %v2074_v15, %v4122_v26  ;;  %v286_v14 = vmul.f32 %v285_v2, %v3407_v19  ;;  %v2077_v27 = vmul.f32 %v2074_v15, %v4141_v1  ;;  %s4562_s8 = sld [smem:[#allocation4 + $0x45]] }
 0x26b   : > { %v4396_v48 = vpop.permute.xlu0 %1802  ;;  %v4398_v25 = vpop.permute.xlu1 %1712 }
 0x26d   : > { %1996 = vrot.lane.b32.xlu0 %v1987_v54, %s3105_s14  ;;  %1966 = vrot.lane.b32.xlu1 %v1957_v6, %s3105_s14  ;;  %v2076_v54 = vmul.f32 %v2074_v15, %v4161_v56  ;;  %v1991_v6 = vrot.slane %v1982_v32, %v5222_v28  ;;  %v5251_v32 = vld [vmem:[#allocation39_spill] sm:$0xff]  ;;  %v2099_v15 = vmul.f32 %v2097_v61, %v4161_v56 }
 0x26f   : > { %v4404_v22 = vpop.permute.xlu0 %1905  ;;  %v4406_v16 = vpop.permute.xlu1 %1800 }
 0x271   : > { %2000 = vrot.lane.b32.xlu0 %v1995_v63, %s3105_s14  ;;  %1970 = vrot.lane.b32.xlu1 %v1965_v37, %s3105_s14  ;;  %v2098_v37 = vmul.f32 %v2097_v61, %v4122_v26 }
 0x273   : > { %v4412_v24 = vpop.permute.xlu0 %1909  ;;  %v4414_v50 = vpop.permute.xlu1 %1804 }
 0x274   : > { %5250 = vst [vmem:[#allocation78_spill] sm:$0xff] %v4414_v50 }
 0x275   : > { %2083 = vrot.lane.b32.xlu0 %v2076_v54, %s3106_s21  ;;  %1998 = vrot.lane.b32.xlu1 %v1991_v6, %s3105_s14  ;;  %v465_v54 = vsel %vm398_vm15, %v3779_v59, %v5251_v32  ;;  %v5252_v6 = vld [vmem:[#allocation36_spill] sm:$0xff]  ;;  %v646_v59 = vsel %vm579_vm2, %v3920_v7, %v3884_v53 }
 0x276   : > { %v381_v28 = vadd.f32 %v5252_v6, %v286_v14 }
 0x277   : > { %v4420_v30 = vpop.permute.xlu0 %2028  ;;  %v4422_v63 = vpop.permute.xlu1 %1907 }
 0x278   : > { %v470_v19 = vadd.f32 %v465_v54, %v381_v28  ;;  %v5257_v28 = vld [vmem:[#allocation34_spill] sm:$0xff]  ;;  %v2186_v54 = vstv %s2845_s26  ;;  %s4581_s26 = sld [smem:[#allocation4 + $0x4c]] }
 0x279   : > { %2104 = vrot.lane.b32.xlu0 %v2098_v37, %s3106_s21  ;;  %2081 = vrot.lane.b32.xlu1 %v2075_v23, %s3106_s21  ;;  %v2187_v61 = vmul.f32 %v2186_v54, %v4122_v26 }
 0x27a   : > { %v562_v14 = vadd.f32 %v3841_v10, %v470_v19 }
 0x27b   : > { %v4433_v36 = vpop.permute.xlu0 %2126  ;;  %v4435_v46 = vpop.permute.xlu1 %2026 }
 0x27c   : > { %5253 = vst [vmem:[#allocation39_spill] sm:$0xff] %v4433_v36  ;;  %v2166_v36 = vmul.f32 %v2164_v62, %v4161_v56  ;;  %v651_v50 = vadd.f32 %v646_v59, %v562_v14  ;;  %v5263_v14 = vld [vmem:[#allocation28_spill] sm:$0xff] }
 0x27d   : > { %2108 = vrot.lane.b32.xlu0 %v2100_v40, %s3106_s21  ;;  %2085 = vrot.lane.b32.xlu1 %v2077_v27, %s3106_s21  ;;  %v377_v40 = vsel %vm5258_vm11, %v5257_v28, %v5256_v5  ;;  %v288_v27 = vmul.f32 %v285_v2, %v3383_v12  ;;  %v558_v5 = vsel %vm5261_vm13, %v3816_v52, %v3847_v18  ;;  %v5262_v12 = vld [vmem:[#allocation41_spill] sm:$0xff]  ;;  %vm2428_vm11 = vcmask 867328  }
 0x27e   : > { %v2167_v18 = vmul.f32 %v2164_v62, %v4141_v1  ;;  %vm2405_vm13 = vcmask 343040  }
 0x27f   : > { %v4445_v23 = vpop.permute.xlu0 %2130  ;;  %v4447_v37 = vpop.permute.xlu1 %2030  ;;  %v383_v7 = vadd.f32 %v377_v40, %v288_v27 }
 0x280   : > { %5254 = vst [vmem:[#allocation36_spill] sm:$0xff] %v4445_v23  ;;  %5255 = vst [vmem:[#allocation79_spill] sm:$0xff] %v4447_v37  ;;  %v2165_v23 = vmul.f32 %v2164_v62, %v4122_v26  ;;  %v5267_v62 = vld [vmem:[#allocation19_spill] sm:$0xff] }
 0x281   : > { %2173 = vrot.lane.b32.xlu0 %v2166_v36, %s3107_s23  ;;  %2106 = vrot.lane.b32.xlu1 %v2099_v15, %s3106_s21  ;;  %v472_v59 = vadd.f32 %v5262_v12, %v383_v7  ;;  %v764_v36 = vadd.f32 %v5263_v14, %v651_v50  ;;  %v5264_v15 = vld [vmem:[#allocation32_spill] sm:$0xff]  ;;  %v972_v50 = vsel %vm905_vm1, %v4024_v13, %v4010_v42  ;;  %v2256_v7 = vstv %s2848_s22  ;;  %s4488_s21 = sld [smem:[#allocation4 + $0x59]] }
 0x282   : > { %v880_v40 = vsel %vm789_vm5, %v5264_v15, %v3926_v49  ;;  %v287_v15 = vmul.f32 %v285_v2, %v5267_v62  ;;  %v1154_v2 = vsel %vm1087_vm3, %v4193_v8, %v4175_v0  ;;  %s4638_s22 = sld [smem:[#allocation4 + $0x61]] }
 0x283   : > { %v4457_v19 = vpop.permute.xlu0 %2217  ;;  %v4459_v37 = vpop.permute.xlu1 %2128  ;;  %v564_v27 = vadd.f32 %v558_v5, %v472_v59  ;;  %v376_v5 = vsel %vm5266_vm4, %v5252_v6, %v5257_v28  ;;  %v2278_v59 = vstv %s2849_s27  ;;  %v466_v6 = vsel %vm398_vm15, %v5251_v32, %v5262_v12  ;;  %v5272_v12 = vld [vmem:[#allocation46_spill] sm:$0xff]  ;;  %vm5276_vm15 = vmmov %vm5270_vm6  ;;  %s2815_s27 = sld [smem:[#allocation4 + $0x46]] }
 0x284   : > { %5259 = vst [vmem:[#allocation38_spill] sm:$0xff] %v4457_v19  ;;  %5260 = vst [vmem:[#allocation34_spill] sm:$0xff] %v4459_v37  ;;  %v2189_v37 = vmul.f32 %v2186_v54, %v4141_v1  ;;  %v382_v28 = vadd.f32 %v376_v5, %v287_v15  ;;  %v2279_v62 = vmul.f32 %v2278_v59, %v4185_v47  ;;  %v5273_v15 = vld [vmem:[#allocation60_spill] sm:$0xff]  ;;  %vm1646_vm4 = vcmask 515072  }
 0x285   : > { %2193 = vrot.lane.b32.xlu0 %v2187_v61, %s3107_s23  ;;  %2171 = vrot.lane.b32.xlu1 %v2165_v23, %s3107_s23  ;;  %v885_v61 = vadd.f32 %v880_v40, %v764_v36  ;;  %v653_v23 = vadd.f32 %v3928_v11, %v564_v27  ;;  %v2258_v36 = vmul.f32 %v2256_v7, %v5229_v4  ;;  %v5268_v40 = vld [vmem:[#allocation29_spill] sm:$0xff]  ;;  %v5269_v27 = vld [vmem:[#allocation27_spill] sm:$0xff] }
 0x286   : > { %v647_v5 = vsel %vm579_vm2, %v3884_v53, %v3928_v11  ;;  %v2281_v53 = vmul.f32 %v2278_v59, %v4200_v34  ;;  %v2259_v11 = vmul.f32 %v2256_v7, %v4200_v34  ;;  %vm1398_vm2 = vcmask 130048  }
 0x287   : > { %v4473_v19 = vpop.permute.xlu0 %2307  ;;  %v4475_v26 = vpop.permute.xlu1 %2215  ;;  %v977_v1 = vadd.f32 %v972_v50, %v885_v61 }
 0x288   : > { %5265 = vst [vmem:[#allocation41_spill] sm:$0xff] %v4473_v19 }
 0x289   : > { %2197 = vrot.lane.b32.xlu0 %v2189_v37, %s3107_s23  ;;  %2175 = vrot.lane.b32.xlu1 %v2167_v18, %s3107_s23  ;;  %v2188_v37 = vmul.f32 %v2186_v54, %v4161_v56  ;;  %v760_v18 = vsel %vm5270_vm6, %v5269_v27, %v5268_v40  ;;  %v1070_v61 = vadd.f32 %v4102_v21, %v977_v1  ;;  %vm2335_vm6 = vcmask 482304  }
 0x28a   : > { %v766_v50 = vadd.f32 %v760_v18, %v653_v23  ;;  %v557_v54 = vsel %vm5271_vm10, %v3841_v10, %v3816_v52  ;;  %v471_v40 = vadd.f32 %v466_v6, %v382_v28  ;;  %v2257_v1 = vmul.f32 %v2256_v7, %v4185_v47  ;;  %v5275_v18 = vld [vmem:[#allocation50_spill] sm:$0xff] }
 0x28b   : > { %v4491_v19 = vpop.permute.xlu0 %2311  ;;  %v4493_v13 = vpop.permute.xlu1 %2219  ;;  %v1159_v56 = vadd.f32 %v1154_v2, %v1070_v61  ;;  %v1335_v10 = vsel %vm1268_vm9, %v4310_v33, %v4297_v58  ;;  %v2345_v28 = vstv %s4488_s21  ;;  %s2819_s21 = sld [smem:[#allocation4 + $0x32]]  ;;  %vm2556_vm10 = vcmask 916480  }
 0x28c   : > { %v887_v32 = vadd.f32 %v5272_v12, %v766_v50 }
 0x28d   : > { %2265 = vrot.lane.b32.xlu0 %v2258_v36, %s3108_s28  ;;  %2195 = vrot.lane.b32.xlu1 %v2188_v37, %s3107_s23  ;;  %v5274_v36 = vld [vmem:[#allocation58_spill] sm:$0xff]  ;;  %v563_v37 = vadd.f32 %v557_v54, %v471_v40  ;;  %v1251_v2 = vadd.f32 %v4255_v3, %v1159_v56  ;;  %v1247_v56 = vsel %vm1223_vm8, %v4243_v9, %v4263_v20 }
 0x28e   : > { %v1066_v52 = vsel %vm1064_vm7, %v5274_v36, %v5273_v15  ;;  %v979_v6 = vadd.f32 %v5275_v18, %v887_v32  ;;  %v2347_v32 = vmul.f32 %v2345_v28, %v5229_v4  ;;  %v881_v20 = vsel %vm789_vm5, %v3926_v49, %v5272_v12 }
 0x28f   : > { %v4514_v8 = vpop.permute.xlu0 %2401  ;;  %v4516_v23 = vpop.permute.xlu1 %2309  ;;  %v652_v50 = vadd.f32 %v647_v5, %v563_v37  ;;  %v1340_v33 = vadd.f32 %v1335_v10, %v1251_v2  ;;  %v2280_v5 = vmul.f32 %v2278_v59, %v5229_v4  ;;  %v973_v49 = vsel %vm905_vm1, %v4010_v42, %v5275_v18 }
 0x290   : > { %v1072_v61 = vadd.f32 %v1066_v52, %v979_v6  ;;  %vm1739_vm5 = vcmask 900096   ;;  %vm1716_vm1 = vcmask 375808  }
 0x291   : > { %2285 = vrot.lane.b32.xlu0 %v2279_v62, %s3108_s28  ;;  %2263 = vrot.lane.b32.xlu1 %v2257_v1, %s3108_s28  ;;  %v1532_v62 = vsel %vm1465_vm12, %v4353_v57, %v4372_v43  ;;  %v1448_v7 = vadd.f32 %v4355_v35, %v1340_v33  ;;  %v759_v1 = vsel %vm5276_vm15, %v5263_v14, %v5269_v27  ;;  %v2367_v14 = vstv %s4528_s15  ;;  %s3113_s15 = smov 112  }
 0x292   : > { %v1161_v40 = vadd.f32 %v4206_v41, %v1072_v61  ;;  %v1624_v57 = vsel %vm1557_vm14, %v4380_v55, %v4370_v45  ;;  %v765_v52 = vadd.f32 %v759_v1, %v652_v50  ;;  %v1444_v55 = vsel %vm1398_vm2, %v4345_v29, %v4363_v17 }
 0x293   : > { %v4537_v15 = vpop.permute.xlu0 %2489  ;;  %v4539_v54 = vpop.permute.xlu1 %2399  ;;  %v1537_v37 = vadd.f32 %v1532_v62, %v1448_v7  ;;  %v2368_v50 = vmul.f32 %v2367_v14, %v4185_v47  ;;  %v2346_v61 = vmul.f32 %v2345_v28, %v4185_v47  ;;  %v1155_v33 = vsel %vm1087_vm3, %v4175_v0, %v4206_v41 }
 0x294   : > { %v1253_v10 = vadd.f32 %v1247_v56, %v1161_v40  ;;  %v886_v59 = vadd.f32 %v881_v20, %v765_v52  ;;  %v1246_v62 = vsel %vm1223_vm8, %v4255_v3, %v4243_v9  ;;  %v2370_v40 = vmul.f32 %v2367_v14, %v4200_v34 }
 0x295   : > { %2289 = vrot.lane.b32.xlu0 %v2281_v53, %s3108_s28  ;;  %2267 = vrot.lane.b32.xlu1 %v2259_v11, %s3108_s28  ;;  %v1629_v12 = vadd.f32 %v1624_v57, %v1537_v37  ;;  %v1065_v53 = vsel %vm1064_vm7, %v4102_v21, %v5274_v36  ;;  %v1806_v21 = vsel %vm1739_vm5, %v4406_v16, %v4396_v48  ;;  %v2438_v41 = vstv %s4562_s8  ;;  %s4739_s8 = sld [smem:[#allocation4 + $0x4e]] }
 0x296   : > { %v1342_v27 = vadd.f32 %v4318_v31, %v1253_v10  ;;  %v978_v42 = vadd.f32 %v973_v49, %v886_v59  ;;  %v2348_v0 = vmul.f32 %v2345_v28, %v4200_v34  ;;  %v1336_v57 = vsel %vm1268_vm9, %v4297_v58, %v4318_v31 }
 0x297   : > { %v4564_v6 = vpop.permute.xlu0 %2493  ;;  %v4566_v2 = vpop.permute.xlu1 %2403  ;;  %v1722_v56 = vadd.f32 %v4378_v44, %v1629_v12  ;;  %v1718_v9 = vsel %vm1716_vm1, %v4398_v25, %v4387_v38  ;;  %vm1880_vm3 = vcmask 236544   ;;  %v2032_v58 = vsel %vm1941_vm0, %v4435_v46, %v4420_v30 }
 0x298   : > { %v1450_v17 = vadd.f32 %v1444_v55, %v1342_v27  ;;  %v1071_v36 = vadd.f32 %v1065_v53, %v978_v42  ;;  %v2440_v31 = vmul.f32 %v2438_v41, %v5228_v39  ;;  %v2460_v52 = vstv %s4581_s26  ;;  %v5277_v27 = vld [vmem:[#allocation78_spill] sm:$0xff]  ;;  %s4755_s26 = sld [smem:[#allocation4 + $0x3a]] }
 0x299   : > { %2354 = vrot.lane.b32.xlu0 %v2347_v32, %s3112_s19  ;;  %2287 = vrot.lane.b32.xlu1 %v2280_v5, %s3108_s28  ;;  %v1811_v32 = vadd.f32 %v1806_v21, %v1722_v56  ;;  %v1443_v5 = vsel %vm1398_vm2, %v4355_v35, %v4345_v29  ;;  %v2369_v59 = vmul.f32 %v2367_v14, %v5229_v4  ;;  %vm2087_vm7 = vcmask 97280   ;;  %v5279_v21 = vld [vmem:[#allocation36_spill] sm:$0xff] }
 0x29a   : > { %v1160_v7 = vadd.f32 %v1155_v33, %v1071_v36  ;;  %v1539_v16 = vadd.f32 %v4361_v60, %v1450_v17  ;;  %v1533_v29 = vsel %vm1465_vm12, %v4372_v43, %v4361_v60  ;;  %v1912_v46 = vsel %vm1880_vm3, %v4422_v63, %v4412_v24  ;;  %v5278_v43 = vld [vmem:[#allocation23_spill] sm:$0xff]  ;;  %v5280_v36 = vld [vmem:[#allocation34_spill] sm:$0xff] }
 0x29b   : > { %v4583_v18 = vpop.permute.xlu0 %1419  ;;  %v4585_v11 = vpop.permute.xlu1 %2491  ;;  %v1916_v37 = vadd.f32 %v4404_v22, %v1811_v32  ;;  %vm2154_vm8 = vcmask 621568   ;;  %v1625_v60 = vsel %vm1557_vm14, %v4370_v45, %v4389_v51  ;;  %v2461_v14 = vmul.f32 %v2460_v52, %v5278_v43  ;;  %v5281_v45 = vld [vmem:[#allocation38_spill] sm:$0xff] }
 0x29c   : > { %v1252_v3 = vadd.f32 %v1246_v62, %v1160_v7  ;;  %v1631_v28 = vadd.f32 %v4389_v51, %v1539_v16  ;;  %vm2246_vm9 = vcmask 1006592   ;;  %v1717_v33 = vsel %vm1716_vm1, %v4378_v44, %v4398_v25  ;;  %v5283_v7 = vld [vmem:[#allocation39_spill] sm:$0xff]  ;;  %v5284_v25 = vld [vmem:[#allocation41_spill] sm:$0xff] }
 0x29d   : > { %2374 = vrot.lane.b32.xlu0 %v2368_v50, %s3112_s19  ;;  %2352 = vrot.lane.b32.xlu1 %v2346_v61, %s3112_s19  ;;  %v2037_v53 = vadd.f32 %v2032_v58, %v1916_v37  ;;  %v2439_v61 = vmul.f32 %v2438_v41, %v5278_v43  ;;  %v2133_v56 = vsel %vm2087_vm7, %v5280_v36, %v5279_v21 }
 0x29e   : > { %v1341_v38 = vadd.f32 %v1336_v57, %v1252_v3  ;;  %v1724_v10 = vadd.f32 %v1718_v9, %v1631_v28  ;;  %v2221_v51 = vsel %vm2154_vm8, %v4475_v26, %v5281_v45  ;;  %v1807_v44 = vsel %vm1739_vm5, %v4396_v48, %v5277_v27  ;;  %v5285_v57 = vld [vmem:[#allocation24_spill] sm:$0xff] }
 0x29f   : > { %v4605_v1 = vpop.permute.xlu0 %1484  ;;  %v4607_v20 = vpop.permute.xlu1 %1417  ;;  %v2137_v16 = vadd.f32 %v5283_v7, %v2037_v53  ;;  %v2313_v32 = vsel %vm2246_vm9, %v5284_v25, %v4516_v23  ;;  %v2463_v26 = vmul.f32 %v2460_v52, %v5285_v57  ;;  %v2526_v48 = vstv %s4638_s22  ;;  %s4799_s22 = sld [smem:[#allocation4 + $0x56]] }
 0x2a0   : > { %v1449_v35 = vadd.f32 %v1443_v5, %v1341_v38  ;;  %v1813_v12 = vadd.f32 %v5277_v27, %v1724_v10  ;;  %v1911_v38 = vsel %vm1880_vm3, %v4404_v22, %v4422_v63  ;;  %v2528_v22 = vmul.f32 %v2526_v48, %v5228_v39 }
 0x2a1   : > { %2378 = vrot.lane.b32.xlu0 %v2370_v40, %s3112_s19  ;;  %2356 = vrot.lane.b32.xlu1 %v2348_v0, %s3112_s19  ;;  %v5282_v40 = vld [vmem:[#allocation79_spill] sm:$0xff]  ;;  %v2226_v28 = vadd.f32 %v2221_v51, %v2137_v16  ;;  %v2462_v63 = vmul.f32 %v2460_v52, %v5228_v39  ;;  %v2132_v27 = vsel %vm2087_vm7, %v5283_v7, %v5280_v36  ;;  %v5288_v16 = vld [vmem:[#allocation17_spill] sm:$0xff] }
 0x2a2   : > { %v1538_v42 = vadd.f32 %v1533_v29, %v1449_v35  ;;  %v1918_v24 = vadd.f32 %v1912_v46, %v1813_v12  ;;  %v2033_v29 = vsel %vm1941_vm0, %v4420_v30, %v5282_v40  ;;  %v2407_v12 = vsel %vm2405_vm13, %v4514_v8, %v4566_v2 }
 0x2a3   : > { %v4627_v49 = vpop.permute.xlu0 %1504  ;;  %v4629_v55 = vpop.permute.xlu1 %1482  ;;  %v2495_v30 = vsel %vm2428_vm11, %v4537_v15, %v4585_v11  ;;  %v2222_v52 = vsel %vm2154_vm8, %v5281_v45, %v4493_v13  ;;  %v2527_v15 = vmul.f32 %v2526_v48, %v5278_v43  ;;  %v2314_v21 = vsel %vm2246_vm9, %v4516_v23, %v4491_v19 }
 0x2a4   : > { %v1630_v62 = vadd.f32 %v1625_v60, %v1538_v42  ;;  %v2039_v0 = vadd.f32 %v5282_v40, %v1918_v24  ;;  %v1422_v51 = vsel %vm1398_vm2, %v4607_v20, %v4583_v18  ;;  %v2529_v23 = vmul.f32 %v2526_v48, %v5285_v57  ;;  %v5286_v40 = vld [vmem:[#allocation43_spill] sm:$0xff]  ;;  %v5290_v18 = vld [vmem:[#allocation48_spill] sm:$0xff] }
 0x2a5   : > { %2447 = vrot.lane.b32.xlu0 %v2440_v31, %s3110_s20  ;;  %2376 = vrot.lane.b32.xlu1 %v2369_v59, %s3112_s19  ;;  %v2441_v31 = vmul.f32 %v2438_v41, %v5285_v57  ;;  %v2318_v59 = vadd.f32 %v2313_v32, %v2226_v28 }
 0x2a6   : > { %v1723_v9 = vadd.f32 %v1717_v33, %v1630_v62  ;;  %v2139_v3 = vadd.f32 %v2133_v56, %v2039_v0  ;;  %v5287_v0 = vld [vmem:[#allocation31_spill] sm:$0xff] }
 0x2a7   : > { %v4647_v17 = vpop.permute.xlu0 %1508  ;;  %v4649_v50 = vpop.permute.xlu1 %1486  ;;  %v2411_v60 = vadd.f32 %v4539_v54, %v2318_v59  ;;  %v827_v7 = vadd.f32 %v5287_v0, %v5286_v40  ;;  %v5303_v0 = vld [vmem:[#allocation67_spill] sm:$0xff] }
 0x2a8   : > { %v1812_v10 = vadd.f32 %v1807_v44, %v1723_v9  ;;  %v2228_v37 = vadd.f32 %v4493_v13, %v2139_v3  ;;  %v2406_v13 = vsel %vm2405_vm13, %v4539_v54, %v4514_v8  ;;  %v5289_v44 = vld [vmem:[#allocation66_spill] sm:$0xff]  ;;  %v2496_v8 = vsel %vm2428_vm11, %v4585_v11, %v4564_v6 }
 0x2a9   : > { %2467 = vrot.lane.b32.xlu0 %v2461_v14, %s3110_s20  ;;  %2445 = vrot.lane.b32.xlu1 %v2439_v61, %s3110_s20  ;;  %v2500_v24 = vadd.f32 %v2495_v30, %v2411_v60  ;;  %v1320_v25 = vadd.f32 %v5289_v44, %v5288_v16  ;;  %v1452_v54 = vstv %s2815_s27  ;;  %v5296_v60 = vld [vmem:[#allocation47_spill] sm:$0xff]  ;;  %v1633_v16 = vstv %s4739_s8 }
 0x2aa   : > { %v1917_v46 = vadd.f32 %v1911_v38, %v1812_v10  ;;  %v2320_v14 = vadd.f32 %v4491_v19, %v2228_v37  ;;  %v5291_v38 = vld [vmem:[#allocation22_spill] sm:$0xff]  ;;  %v5292_v10 = vld [vmem:[#allocation56_spill] sm:$0xff] }
 0x2ab   : > { %v4672_v5 = vpop.permute.xlu0 %1576  ;;  %v4674_v58 = vpop.permute.xlu1 %1506  ;;  %v1428_v9 = vadd.f32 %v1422_v51, %v1320_v25  ;;  %v1454_v48 = vmul.f32 %v1452_v54, %v5291_v38  ;;  %v5302_v51 = vld [vmem:[#allocation72_spill] sm:$0xff] }
 0x2ac   : > { %v2038_v53 = vadd.f32 %v2033_v29, %v1917_v46  ;;  %v2413_v2 = vadd.f32 %v2407_v12, %v2320_v14  ;;  %v1544_v29 = vstv %s2819_s21  ;;  %v5294_v46 = vld [vmem:[#allocation63_spill] sm:$0xff]  ;;  %v5295_v12 = vld [vmem:[#allocation70_spill] sm:$0xff]  ;;  %v1453_v14 = vmul.f32 %v1452_v54, %v5296_v60 }
 0x2ad   : > { %2471 = vrot.lane.b32.xlu0 %v2463_v26, %s3110_s20  ;;  %2449 = vrot.lane.b32.xlu1 %v2441_v31, %s3110_s20  ;;  %v935_v26 = vadd.f32 %v5290_v18, %v827_v7  ;;  %v1517_v59 = vadd.f32 %v4647_v17, %v1428_v9  ;;  %v5304_v18 = vld [vmem:[#allocation20_spill] sm:$0xff]  ;;  %v5305_v9 = vld [vmem:[#allocation54_spill] sm:$0xff] }
 0x2ae   : > { %v2138_v42 = vadd.f32 %v2132_v27, %v2038_v53  ;;  %v2502_v45 = vadd.f32 %v4564_v6, %v2413_v2  ;;  %v5293_v6 = vld [vmem:[#allocation75_spill] sm:$0xff]  ;;  %v5298_v2 = vld [vmem:[#allocation21_spill] sm:$0xff] }
 0x2af   : > { %v4687_v41 = vpop.permute.xlu0 %1596  ;;  %v4689_v35 = vpop.permute.xlu1 %1574  ;;  %v1024_v37 = vadd.f32 %v5292_v10, %v935_v26  ;;  %v1421_v11 = vsel %vm1398_vm2, %v5293_v6, %v4607_v20  ;;  %v1455_v26 = vmul.f32 %v1452_v54, %v5304_v18 }
 0x2b0   : > { %v2227_v36 = vadd.f32 %v2222_v52, %v2138_v42  ;;  %v1427_v30 = vadd.f32 %v1421_v11, %v5295_v12  ;;  %v5297_v52 = vld [vmem:[#allocation52_spill] sm:$0xff] }
 0x2b1   : > { %2535 = vrot.lane.b32.xlu0 %v2528_v22, %s3109_s4  ;;  %2469 = vrot.lane.b32.xlu1 %v2462_v63, %s3110_s20  ;;  %v1117_v22 = vadd.f32 %v5294_v46, %v1024_v37  ;;  %v1511_v63 = vsel %vm1465_vm12, %v4674_v58, %v4647_v17  ;;  %v1545_v42 = vmul.f32 %v1544_v29, %v5297_v52  ;;  %v5306_v37 = vld [vmem:[#allocation68_spill] sm:$0xff] }
 0x2b2   : > { %v2319_v56 = vadd.f32 %v2314_v21, %v2227_v36  ;;  %v5299_v36 = vld [vmem:[#allocation26_spill] sm:$0xff]  ;;  %v1516_v40 = vadd.f32 %v1511_v63, %v1427_v30  ;;  %v5307_v30 = vld [vmem:[#allocation51_spill] sm:$0xff] }
 0x2b3   : > { %v1601_v61 = vpop.permute.xlu0 %1600  ;;  %v4709_v33 = vpop.permute.xlu1 %1578  ;;  %v1635_v60 = vmul.f32 %v1633_v16, %v5307_v30 }
 0x2b4   : > { %v2412_v32 = vadd.f32 %v2406_v13, %v2319_v56  ;;  %v1609_v27 = vadd.f32 %v1601_v61, %v1517_v59  ;;  %v5300_v13 = vld [vmem:[#allocation76_spill] sm:$0xff] }
 0x2b5   : > { %2533 = vrot.lane.b32.xlu1 %v2527_v15, %s3109_s4  ;;  %2568 = vrot.lane.b32.xlu0 %v2500_v24, %s3113_s15  ;;  %v1205_v24 = vadd.f32 %v5298_v2, %v1117_v22  ;;  %v1488_v15 = vsel %vm1465_vm12, %v4629_v55, %v4605_v1  ;;  %v1404_v56 = vadd.f32 %v5300_v13, %v5299_v36  ;;  %v5308_v2 = vld [vmem:[#allocation69_spill] sm:$0xff] }
 0x2b6   : > { %v2501_v3 = vadd.f32 %v2496_v8, %v2412_v32  ;;  %v1399_v55 = vsel %vm1398_vm2, %v5300_v13, %v5302_v51  ;;  %v1581_v22 = vsel %vm1557_vm14, %v4672_v5, %v4709_v33  ;;  %v1634_v13 = vmul.f32 %v1633_v16, %v5297_v52 }
 0x2b7   : > { %v4724_v62 = vpop.permute.xlu0 %1665  ;;  %v4726_v19 = vpop.permute.xlu1 %1598  ;;  %v1298_v7 = vadd.f32 %v5303_v0, %v1205_v24  ;;  %v1493_v44 = vadd.f32 %v1488_v15, %v1404_v56  ;;  %v1405_v11 = vadd.f32 %v1399_v55, %v5306_v37  ;;  %v5309_v56 = vld [vmem:[#allocation53_spill] sm:$0xff]  ;;  %v5310_v55 = vld [vmem:[#allocation55_spill] sm:$0xff] }
 0x2b8   : > { %v1603_v17 = vsel %vm1557_vm14, %v4726_v19, %v1601_v61  ;;  %v1580_v61 = vsel %vm1557_vm14, %v4689_v35, %v4672_v5 }
 0x2b9   : > { %2537 = vrot.lane.b32.xlu1 %v2529_v23, %s3109_s4  ;;  %2572 = vrot.lane.b32.xlu0 %v2502_v45, %s3113_s15  ;;  %v5301_v45 = vld [vmem:[#allocation77_spill] sm:$0xff]  ;;  %v1608_v25 = vadd.f32 %v1603_v17, %v1516_v40  ;;  %v1585_v59 = vadd.f32 %v1580_v61, %v1493_v44  ;;  %v1815_v44 = vstv %s4799_s22 }
 0x2ba   : > { %v1400_v23 = vsel %vm1398_vm2, %v5302_v51, %v5301_v45 }
 0x2bb   : > { %v4741_v28 = vpop.permute.xlu0 %1685  ;;  %v1664_v31 = vpop.permute.xlu1 %1663  ;;  %v1406_v38 = vadd.f32 %v1400_v23, %v1298_v7  ;;  %v1636_v7 = vmul.f32 %v1633_v16, %v5305_v9 }
 0x2bc   : > { %v1669_v10 = vsel %vm1646_vm4, %v1664_v31, %v4724_v62 }
 0x2bd   : > { %2570 = vrot.lane.b32.xlu1 %v2501_v3, %s3113_s15  ;;  %1461 = vrot.lane.b32.xlu0 %v1454_v48, %s3100_s30  ;;  %v1547_v3 = vmul.f32 %v1544_v29, %v5305_v9  ;;  %v1489_v48 = vsel %vm1465_vm12, %v4605_v1, %v4649_v50  ;;  %v1495_v54 = vadd.f32 %v4649_v50, %v1406_v38  ;;  %v1726_v1 = vstv %s4755_s26  ;;  %v2973_v38 = vld [vmem:[#allocation3] sm:$0x7]  ;;  %s2654_s26 = scalar_lea.sflag [#allocation6], %s3236_s29 }
 0x2be   : > { %v1494_v63 = vadd.f32 %v1489_v48, %v1405_v11  ;;  %v1727_v45 = vmul.f32 %v1726_v1, %v5309_v56  ;;  %v1729_v61 = vmul.f32 %v1726_v1, %v5310_v55 }
 0x2bf   : > { %v1690_v53 = vpop.permute.xlu0 %1689  ;;  %v1668_v20 = vpop.permute.xlu1 %1667  ;;  %v1587_v50 = vadd.f32 %v4709_v33, %v1495_v54  ;;  %v5312_v54 = vld [vmem:[#allocation14_spill] sm:$0xff] }
 0x2c0   : > { %v1698_v21 = vadd.f32 %v1690_v53, %v1609_v27  ;;  %v1674_v27 = vadd.f32 %v1669_v10, %v1585_v59  ;;  %v1670_v5 = vsel %vm1646_vm4, %v4724_v62, %v1668_v20  ;;  %v1586_v24 = vadd.f32 %v1581_v22, %v1494_v63 }
 0x2c1   : > { %1459 = vrot.lane.b32.xlu1 %v1453_v14, %s3100_s30  ;;  %1551 = vrot.lane.b32.xlu0 %v1545_v42, %s3101_s17  ;;  %v1510_v14 = vsel %vm1465_vm12, %v4627_v49, %v4674_v58  ;;  %v1602_v49 = vsel %vm1557_vm14, %v4687_v41, %v4726_v19  ;;  %v1676_v58 = vadd.f32 %v1668_v20, %v1587_v50 }
 0x2c2   : > { %v1675_v62 = vadd.f32 %v1670_v5, %v1586_v24 }
 0x2c3   : > { %v1759_v8 = vpop.permute.xlu0 %1758  ;;  %v1688_v32 = vpop.permute.xlu1 %1687 }
 0x2c4   : > { %v1692_v35 = vsel %vm1646_vm4, %v1688_v32, %v1690_v53  ;;  %v1546_v53 = vmul.f32 %v1544_v29, %v5307_v30  ;;  %v1426_v29 = vadd.f32 %v5293_v6, %v5308_v2  ;;  %v1691_v6 = vsel %vm1646_vm4, %v4741_v28, %v1688_v32 }
 0x2c5   : > { %v1697_v46 = vadd.f32 %v1692_v35, %v1608_v25  ;;  %1463 = vrot.lane.b32.xlu1 %v1455_v26, %s3100_s30  ;;  %1555 = vrot.lane.b32.xlu0 %v1547_v3, %s3101_s17  ;;  %s4808_s30 = sld [smem:[#allocation4 + $0x42]]  ;;  %v5311_v3 = vld [vmem:[#allocation57_spill] sm:$0xff] }
 0x2c6   : > { %v1515_v33 = vadd.f32 %v1510_v14, %v1426_v29  ;;  %v1728_v16 = vmul.f32 %v1726_v1, %v5311_v3  ;;  %v1817_v9 = vmul.f32 %v1815_v44, %v5311_v3 }
 0x2c7   : > { %v1779_v31 = vpop.permute.xlu0 %1778  ;;  %v1757_v12 = vpop.permute.xlu1 %1756 }
 0x2c8   : > { %v1762_v42 = vsel %vm1739_vm5, %v1757_v12, %v1759_v8  ;;  %v1607_v0 = vadd.f32 %v1602_v49, %v1515_v33  ;;  %v5314_v49 = vld [vmem:[#allocation15_spill] sm:$0xff] }
 0x2c9   : > { %v1767_v15 = vadd.f32 %v1762_v42, %v1674_v27  ;;  %1553 = vrot.lane.b32.xlu1 %v1546_v53, %s3101_s17  ;;  %1642 = vrot.lane.b32.xlu0 %v1635_v60, %s3111_s6  ;;  %s4830_s17 = sld [smem:[#allocation4 + $0x5e]]  ;;  %v1818_v53 = vmul.f32 %v1815_v44, %v5310_v55  ;;  %v5313_v60 = vld [vmem:[#allocation16_spill] sm:$0xff] }
 0x2ca   : > { %v1696_v19 = vadd.f32 %v1691_v6, %v1607_v0 }
 0x2cb   : > { %v1783_v17 = vpop.permute.xlu0 %1782  ;;  %v1761_v36 = vpop.permute.xlu1 %1760  ;;  %v1920_v25 = vstv %s4808_s30 }
 0x2cc   : > { %v1791_v51 = vadd.f32 %v1783_v17, %v1698_v21  ;;  %v1763_v23 = vsel %vm1739_vm5, %v1759_v8, %v1761_v36  ;;  %v1769_v40 = vadd.f32 %v1761_v36, %v1676_v58  ;;  %v1921_v48 = vmul.f32 %v2973_v38, %v1920_v25 }
 0x2cd   : > { %v1768_v41 = vadd.f32 %v1763_v23, %v1675_v62  ;;  %1640 = vrot.lane.b32.xlu1 %v1634_v13, %s3111_s6  ;;  %1733 = vrot.lane.b32.xlu0 %v1727_v45, %s3103_s5 }
 0x2ce   : > { %v1926_v22 = vrot.slane %v1921_v48, %v5312_v54  ;;  %v1934_v14 = vrot.slane %v1921_v48, %v5313_v60  ;;  %v1930_v58 = vrot.slane %v1921_v48, %v5314_v49 }
 0x2cf   : > { %v1847_v20 = vpop.permute.xlu0 %1846  ;;  %v1781_v52 = vpop.permute.xlu1 %1780  ;;  %v2041_v27 = vstv %s4830_s17 }
 0x2d0   : > { %v1784_v28 = vsel %vm1739_vm5, %v1779_v31, %v1781_v52  ;;  %v1785_v21 = vsel %vm1739_vm5, %v1781_v52, %v1783_v17  ;;  %v2042_v50 = vmul.f32 %v2973_v38, %v2041_v27 }
 0x2d1   : > { %v1789_v8 = vadd.f32 %v1784_v28, %v1696_v19  ;;  %v1790_v32 = vadd.f32 %v1785_v21, %v1697_v46  ;;  %1644 = vrot.lane.b32.xlu1 %v1636_v7, %s3111_s6  ;;  %1737 = vrot.lane.b32.xlu0 %v1729_v61, %s3103_s5  ;;  %v1816_v46 = vmul.f32 %v1815_v44, %v5309_v56  ;;  %s2843_s6 = sld [smem:[#allocation4 + $0x4a]]  ;;  %v5315_v56 = vld [vmem:[#allocation61_spill] sm:$0xff]  ;;  %v5316_v19 = vld [vmem:[#allocation62_spill] sm:$0xff]  ;;  %v5317_v21 = vld [vmem:[#allocation64_spill] sm:$0xff] }
 0x2d2   : > { %v2051_v33 = vrot.slane %v2042_v50, %v5314_v49  ;;  %v2047_v13 = vrot.slane %v2042_v50, %v5312_v54 }
 0x2d3   : > { %v1875_v18 = vpop.permute.xlu0 %1874  ;;  %v1845_v26 = vpop.permute.xlu1 %1844 }
 0x2d4   : > { %v1886_v10 = vadd.f32 %v1875_v18, %v1789_v8  ;;  %v1850_v35 = vsel %vm1716_vm1, %v1845_v26, %v1847_v20 }
 0x2d5   : > { %v4837_v37 = vadd.f32 %v1850_v35, %v1767_v15  ;;  %1735 = vrot.lane.b32.xlu1 %v1728_v16, %s3103_s5  ;;  %1824 = vrot.lane.b32.xlu0 %v1817_v9, %s3102_s3  ;;  %s2847_s5 = sld [smem:[#allocation4 + $0x36]] }
 0x2d7   : > { %v1879_v11 = vpop.permute.xlu0 %1878  ;;  %v1849_v59 = vpop.permute.xlu1 %1848  ;;  %v2141_v62 = vstv %s2843_s6 }
 0x2d8   : > { %v1851_v1 = vsel %vm1716_vm1, %v1847_v20, %v1849_v59  ;;  %v4844_v63 = vadd.f32 %v1849_v59, %v1769_v40  ;;  %v2142_v45 = vmul.f32 %v2141_v62, %v5315_v56  ;;  %v2144_v20 = vmul.f32 %v2141_v62, %v5316_v19 }
 0x2d9   : > { %v1856_v31 = vadd.f32 %v1851_v1, %v1768_v41  ;;  %1822 = vrot.lane.b32.xlu1 %v1816_v46, %s3102_s3  ;;  %1935 = vrot.lane.b32.xlu0 %v1926_v22, %s3105_s14  ;;  %v2055_v41 = vrot.slane %v2042_v50, %v5313_v60  ;;  %v2143_v44 = vmul.f32 %v2141_v62, %v5317_v21 }
 0x2db   : > { %v4849_v12 = vpop.permute.xlu0 %1968  ;;  %v1877_v30 = vpop.permute.xlu1 %1876  ;;  %v2233_v7 = vstv %s2847_s5 }
 0x2dc   : > { %v1881_v5 = vsel %vm1880_vm3, %v1875_v18, %v1877_v30  ;;  %v1882_v42 = vsel %vm1880_vm3, %v1877_v30, %v1879_v11  ;;  %v2235_v25 = vmul.f32 %v2233_v7, %v5229_v4  ;;  %v2234_v26 = vmul.f32 %v2233_v7, %v4185_v47 }
 0x2dd   : > { %v4855_v2 = vadd.f32 %v1881_v5, %v1790_v32  ;;  %v1888_v29 = vadd.f32 %v1882_v42, %v1791_v51  ;;  %1826 = vrot.lane.b32.xlu1 %v1818_v53, %s3102_s3  ;;  %1939 = vrot.lane.b32.xlu0 %v1934_v14, %s3105_s14  ;;  %s2851_s3 = sld [smem:[#allocation4 + $0x52]]  ;;  %v2236_v38 = vmul.f32 %v2233_v7, %v4200_v34 }
 0x2df   : > { %v1997_v24 = vpop.permute.xlu0 %1996  ;;  %v4859_v15 = vpop.permute.xlu1 %1966 }
 0x2e0   : > { %v1972_v62 = vsel %vm1941_vm0, %v4859_v15, %v4849_v12 }
 0x2e1   : > { %1937 = vrot.lane.b32.xlu1 %v1930_v58, %s3105_s14  ;;  %2058 = vrot.lane.b32.xlu0 %v2051_v33, %s3104_s7  ;;  %s2855_s14 = sld [smem:[#allocation4 + $0x3e]]  ;;  %v1977_v56 = vadd.f32 %v1972_v62, %v4837_v37 }
 0x2e3   : > { %v4865_v17 = vpop.permute.xlu0 %2000  ;;  %v4867_v36 = vpop.permute.xlu1 %1970  ;;  %v2322_v8 = vstv %s2851_s3 }
 0x2e4   : > { %v4872_v6 = vadd.f32 %v4865_v17, %v1888_v29  ;;  %v1973_v51 = vsel %vm1941_vm0, %v4849_v12, %v4867_v36  ;;  %v2323_v3 = vmul.f32 %v2322_v8, %v4185_v47  ;;  %v2325_v48 = vmul.f32 %v2322_v8, %v4200_v34 }
 0x2e5   : > { %v4877_v23 = vadd.f32 %v1973_v51, %v1856_v31  ;;  %2056 = vrot.lane.b32.xlu1 %v2047_v13, %s3104_s7  ;;  %2148 = vrot.lane.b32.xlu0 %v2142_v45, %s3107_s23  ;;  %v2324_v11 = vmul.f32 %v2322_v8, %v5229_v4 }
 0x2e7   : > { %v4881_v40 = vpop.permute.xlu0 %2083  ;;  %v4883_v0 = vpop.permute.xlu1 %1998 }
 0x2e8   : > { %v2002_v52 = vsel %vm1941_vm0, %v1997_v24, %v4883_v0  ;;  %v2003_v12 = vsel %vm1941_vm0, %v4883_v0, %v4865_v17 }
 0x2e9   : > { %v4889_v55 = vadd.f32 %v2002_v52, %v1886_v10  ;;  %2060 = vrot.lane.b32.xlu1 %v2055_v41, %s3104_s7  ;;  %2152 = vrot.lane.b32.xlu0 %v2144_v20, %s3107_s23  ;;  %s2859_s7 = sld [smem:[#allocation4 + $0x5a]]  ;;  %v2415_v10 = vstv %s2855_s14  ;;  %v1979_v52 = vadd.f32 %v4867_v36, %v4844_v63  ;;  %v2008_v8 = vadd.f32 %v2003_v12, %v4855_v2 }
 0x2ea   : > { %v2417_v59 = vmul.f32 %v2415_v10, %v5228_v39  ;;  %v2416_v22 = vmul.f32 %v2415_v10, %v5278_v43  ;;  %v2418_v31 = vmul.f32 %v2415_v10, %v5285_v57 }
 0x2eb   : > { %v4893_v61 = vpop.permute.xlu0 %2104  ;;  %v4895_v28 = vpop.permute.xlu1 %2081 }
 0x2ec   : > { %v2093_v51 = vadd.f32 %v4895_v28, %v1977_v56  ;;  %v2088_v37 = vsel %vm2087_vm7, %v4895_v28, %v4881_v40 }
 0x2ed   : > { %2150 = vrot.lane.b32.xlu1 %v2143_v44, %s3107_s23  ;;  %2242 = vrot.lane.b32.xlu0 %v2235_v25, %s3108_s28  ;;  %v2094_v63 = vadd.f32 %v2088_v37, %v4877_v23  ;;  %s3114_s23 = smov 96  }
 0x2ef   : > { %v4901_v32 = vpop.permute.xlu0 %2108  ;;  %v2086_v18 = vpop.permute.xlu1 %2085  ;;  %v2504_v46 = vstv %s2859_s7 }
 0x2f0   : > { %v2505_v1 = vmul.f32 %v2504_v46, %v5278_v43  ;;  %v2507_v30 = vmul.f32 %v2504_v46, %v5285_v57  ;;  %v2506_v14 = vmul.f32 %v2504_v46, %v5228_v39  ;;  %v2089_v41 = vsel %vm2087_vm7, %v4881_v40, %v2086_v18 }
 0x2f1   : > { %2240 = vrot.lane.b32.xlu1 %v2234_v26, %s3108_s28  ;;  %2329 = vrot.lane.b32.xlu0 %v2323_v3, %s3112_s19  ;;  %v2095_v21 = vadd.f32 %v2089_v41, %v1979_v52  ;;  %v2115_v3 = vadd.f32 %v4893_v61, %v4889_v55 }
 0x2f3   : > { %v2174_v16 = vpop.permute.xlu0 %2173  ;;  %v4907_v9 = vpop.permute.xlu1 %2106 }
 0x2f4   : > { %v2110_v17 = vsel %vm2087_vm7, %v4893_v61, %v4907_v9  ;;  %v2111_v2 = vsel %vm2087_vm7, %v4907_v9, %v4901_v32 }
 0x2f5   : > { %2244 = vrot.lane.b32.xlu1 %v2236_v38, %s3108_s28  ;;  %2333 = vrot.lane.b32.xlu0 %v2325_v48, %s3112_s19  ;;  %s3116_s28 = smov 115  }
 0x2f7   : > { %v4913_v35 = vpop.permute.xlu0 %2193  ;;  %v2172_v47 = vpop.permute.xlu1 %2171 }
 0x2f8   : > { %v2177_v45 = vsel %vm2154_vm8, %v2172_v47, %v2174_v16 }
 0x2f9   : > { %2331 = vrot.lane.b32.xlu1 %v2324_v11, %s3112_s19  ;;  %2424 = vrot.lane.b32.xlu0 %v2417_v59, %s3110_s20  ;;  %v2182_v7 = vadd.f32 %v2177_v45, %v2093_v51  ;;  %v2116_v11 = vadd.f32 %v2110_v17, %v2008_v8 }
 0x2fb   : > { %v4919_v54 = vpop.permute.xlu0 %2197  ;;  %v2176_v34 = vpop.permute.xlu1 %2175 }
 0x2fc   : > { %v2178_v44 = vsel %vm2154_vm8, %v2174_v16, %v2176_v34  ;;  %v2184_v40 = vadd.f32 %v2176_v34, %v2095_v21 }
 0x2fd   : > { %2422 = vrot.lane.b32.xlu1 %v2416_v22, %s3110_s20  ;;  %2511 = vrot.lane.b32.xlu0 %v2505_v1, %s3109_s4  ;;  %v2183_v23 = vadd.f32 %v2178_v44, %v2094_v63 }
 0x2ff   : > { %v2266_v27 = vpop.permute.xlu0 %2265  ;;  %v2196_v4 = vpop.permute.xlu1 %2195 }
 0x300   : > { %v2199_v38 = vsel %vm2154_vm8, %v4913_v35, %v2196_v4  ;;  %v2200_v48 = vsel %vm2154_vm8, %v2196_v4, %v4919_v54 }
 0x301   : > { %2426 = vrot.lane.b32.xlu1 %v2418_v31, %s3110_s20  ;;  %2515 = vrot.lane.b32.xlu0 %v2507_v30, %s3109_s4  ;;  %v2204_v22 = vadd.f32 %v2199_v38, %v2115_v3  ;;  %v2205_v1 = vadd.f32 %v2200_v48, %v2116_v11  ;;  %v5318_v38 = vld [vmem:[#allocation18_spill] sm:$0xff]  ;;  %v5319_v48 = vld [vmem:[#allocation37_spill] sm:$0xff]  ;;  %s2870_s20 = sshll.u32 %s3154_s13, 5  ;;  %s3117_s13 = smov [#allocation9]  }
 0x302   : > { %v5320_v11 = vld [vmem:[#allocation33_spill] sm:$0xff]  ;;  %s5044_s8 = scalar_lea.hbm %s5083_s2, %s2870_s20  ;;  %s3017_s30 = sshll.u32 %s3117_s13, 4  ;;  %s3018_s30 = int_to_ptr.vmem [resolvable:$false] %s3017_s30 }
 0x303   : > { %v2286_v53 = vpop.permute.xlu0 %2285  ;;  %v2264_v60 = vpop.permute.xlu1 %2263  ;;  %s3019_s17 = scalar_lea.vmem %s3018_s30, 64 }
 0x304   : > { %v2269_v15 = vsel %vm2246_vm9, %v2264_v60, %v2266_v27 }
 0x305   : > { %2513 = vrot.lane.b32.xlu1 %v2506_v14, %s3109_s4  ;;  %v2274_v36 = vadd.f32 %v2269_v15, %v2182_v7  ;;  %v2117_v14 = vadd.f32 %v2111_v2, %v4872_v6  ;;  %s2760_s4 = sshll.u32 %s3236_s29, 1 }
 0x306   : > { %s171_s19 = scalar_lea.vmem [#allocation9], %s2760_s4 }
 0x307   : > { %v4931_v43 = vpop.permute.xlu0 %2289  ;;  %v2268_v50 = vpop.permute.xlu1 %2267  ;;  %s2668_s27 = sshll.u32 %s171_s19, 4  ;;  %s2669_s27 = int_to_ptr.vmem [resolvable:$true] %s2668_s27 }
 0x308   : > { %v2270_v0 = vsel %vm2246_vm9, %v2266_v27, %v2268_v50  ;;  %v2276_v10 = vadd.f32 %v2268_v50, %v2184_v40  ;;  %s3013_s22 = scalar_lea.vmem %s2669_s27, 32  ;;  %p3020_p11 = scmp.lt.s32.totalorder %s2669_s27, %s3018_s30 }
 0x309   : > { %v2275_v59 = vadd.f32 %v2270_v0, %v2183_v23  ;;  %p3014_p6 = scmp.ne.s32.totalorder %s2669_s27, %s3013_s22  ;;  %p3021_p0 = scmp.lt.s32.totalorder %s3019_s17, %s3013_s22 }
 0x30b   : > { %v2355_v5 = vpop.permute.xlu0 %2354  ;;  %v2288_v42 = vpop.permute.xlu1 %2287  ;;  %p3015_p7 = pnand %p3014_p6, %p5336_p8  ;;  %p3022_p3 = por %p3021_p0, %p3020_p11 }
 0x30c   : > { %v2291_v46 = vsel %vm2246_vm9, %v2286_v53, %v2288_v42  ;;  %v2292_v32 = vsel %vm2246_vm9, %v2288_v42, %v4931_v43 }
 0x30d   : > { %v2296_v50 = vadd.f32 %v2291_v46, %v2204_v22  ;;  %v5321_v46 = vld [vmem:[#allocation35_spill] sm:$0xff]  ;;  %p3016_p10 = pneg %p3015_p7 }
 0x30f   : > { %v2375_v29 = vpop.permute.xlu0 %2374  ;;  %v2353_v24 = vpop.permute.xlu1 %2352  ;;  %p3023_p5 = pnand %p3022_p3, %p3016_p10 }
 0x310   : > { %v2358_v25 = vsel %vm2335_vm6, %v2353_v24, %v2355_v5 }
 0x311   : > { %v2363_v16 = vadd.f32 %v2358_v25, %v2274_v36 }
 0x313   : > { %v4933_v49 = vpop.permute.xlu0 %2378  ;;  %v2357_v57 = vpop.permute.xlu1 %2356 }
 0x314   : > { %v2359_v47 = vsel %vm2335_vm6, %v2355_v5, %v2357_v57  ;;  %v2365_v9 = vadd.f32 %v2357_v57, %v2276_v10  ;;  %v2297_v5 = vadd.f32 %v2292_v32, %v2205_v1  ;;  %v264_v10 = vmul.f32 %v5319_v48, %v5318_v38  ;;  %v5322_v32 = vld [vmem:[#allocation40_spill] sm:$0xff] }
 0x315   : > { %v2364_v27 = vadd.f32 %v2359_v47, %v2275_v59  ;;  %v5324_v1 = vld [vmem:[#allocation44_spill] sm:$0xff] }
 0x316   : > { %v313_v59 = vadd.f32 %v5320_v11, %v264_v10 }
 0x317   : > { %v2448_v58 = vpop.permute.xlu0 %2447  ;;  %v2377_v33 = vpop.permute.xlu1 %2376 }
 0x318   : > { %v2380_v30 = vsel %vm2335_vm6, %v2375_v29, %v2377_v33  ;;  %v2381_v53 = vsel %vm2335_vm6, %v2377_v33, %v4933_v49  ;;  %v2206_v33 = vadd.f32 %v4919_v54, %v2117_v14 }
 0x319   : > { %v2386_v56 = vadd.f32 %v2381_v53, %v2297_v5  ;;  %v5327_v5 = vld [vmem:[#allocation49_spill] sm:$0xff] }
 0x31a   : > { %v2298_v6 = vadd.f32 %v4931_v43, %v2206_v33 }
 0x31b   : > { %v2468_v13 = vpop.permute.xlu0 %2467  ;;  %v2446_v39 = vpop.permute.xlu1 %2445 }
 0x31c   : > { %v2451_v28 = vsel %vm2428_vm11, %v2446_v39, %v2448_v58  ;;  %v2385_v39 = vadd.f32 %v2380_v30, %v2296_v50  ;;  %v2387_v37 = vadd.f32 %v4933_v49, %v2298_v6  ;;  %v5325_v30 = vld [vmem:[#allocation30_spill] sm:$0xff]  ;;  %v5331_v6 = vld [vmem:[#allocation71_spill] sm:$0xff] }
 0x31d   : > { %v2456_v55 = vadd.f32 %v2451_v28, %v2363_v16 }
 0x31f   : > { %v4943_v19 = vpop.permute.xlu0 %2471  ;;  %v2450_v20 = vpop.permute.xlu1 %2449 }
 0x320   : > { %v2452_v34 = vsel %vm2428_vm11, %v2448_v58, %v2450_v20  ;;  %v2458_v60 = vadd.f32 %v2450_v20, %v2365_v9  ;;  %v2480_v7 = vadd.f32 %v4943_v19, %v2387_v37 }
 0x321   : > { %v2457_v42 = vadd.f32 %v2452_v34, %v2364_v27 }
 0x323   : > { %v2536_v18 = vpop.permute.xlu0 %2535  ;;  %v2470_v26 = vpop.permute.xlu1 %2469 }
 0x324   : > { %v2473_v57 = vsel %vm2428_vm11, %v2468_v13, %v2470_v26  ;;  %v2474_v58 = vsel %vm2428_vm11, %v2470_v26, %v4943_v19 }
 0x325   : > { %v2478_v51 = vadd.f32 %v2473_v57, %v2385_v39  ;;  %v2479_v41 = vadd.f32 %v2474_v58, %v2386_v56  ;;  %v5328_v57 = vld [vmem:[#allocation59_spill] sm:$0xff]  ;;  %v5330_v39 = vld [vmem:[#allocation25_spill] sm:$0xff] }
 0x327   : > { %v2534_v61 = vpop.permute.xlu1 %2533  ;;  %v2569_v31 = vpop.permute.xlu0 %2568 }
 0x328   : > { %v2539_v35 = vsel %vm2405_vm13, %v2534_v61, %v2536_v18 }
 0x329   : > { %v2544_v4 = vadd.f32 %v2539_v35, %v2456_v55  ;;  %v406_v55 = vadd.f32 %v5321_v46, %v313_v59  ;;  %v5323_v35 = vld [vmem:[#allocation42_spill] sm:$0xff] }
 0x32b   : > { %v2538_v24 = vpop.permute.xlu1 %2537  ;;  %2550 = vrot.lane.b32.xlu1 %v2544_v4, %s3113_s15  ;;  %v2573_v20 = vpop.permute.xlu0 %2572  ;;  %v494_v9 = vadd.f32 %v5322_v32, %v406_v55 }
 0x32c   : > { %v2540_v29 = vsel %vm2405_vm13, %v2536_v18, %v2538_v24  ;;  %v2546_v62 = vadd.f32 %v2538_v24, %v2458_v60  ;;  %v2581_v43 = vadd.f32 %v2573_v20, %v2480_v7  ;;  %v5326_v60 = vld [vmem:[#allocation45_spill] sm:$0xff] }
 0x32d   : > { %v2545_v45 = vadd.f32 %v2540_v29, %v2457_v42  ;;  %v587_v22 = vadd.f32 %v5323_v35, %v494_v9  ;;  %v5329_v29 = vld [vmem:[#allocation65_spill] sm:$0xff]  ;;  %v5333_v9 = vld [vmem:[#allocation74_spill] sm:$0xff] }
 0x32e   : > { %v5332_v7 = vld [vmem:[#allocation73_spill] sm:$0xff] }
 0x32f   : > { %v2571_v52 = vpop.permute.xlu1 %2570  ;;  %2552 = vrot.lane.b32.xlu0 %v2545_v45, %s3113_s15  ;;  %2554 = vrot.lane.b32.xlu1 %v2546_v62, %s3113_s15  ;;  %v1462_v44 = vpop.permute.xlu0 %1461  ;;  %v675_v27 = vadd.f32 %v5324_v1, %v587_v22 }
 0x330   : > { %v2574_v13 = vsel %vm2556_vm10, %v2569_v31, %v2571_v52  ;;  %v2575_v12 = vsel %vm2556_vm10, %v2571_v52, %v2573_v20 }
 0x331   : > { %v2579_v54 = vadd.f32 %v2574_v13, %v2478_v51  ;;  %v2580_v15 = vadd.f32 %v2575_v12, %v2479_v41  ;;  %v797_v53 = vadd.f32 %v5325_v30, %v675_v27 }
 0x333   : > { %v1460_v21 = vpop.permute.xlu1 %1459  ;;  %2585 = vrot.lane.b32.xlu0 %v2579_v54, %s3114_s23  ;;  %2587 = vrot.lane.b32.xlu1 %v2580_v15, %s3114_s23  ;;  %v1552_v8 = vpop.permute.xlu0 %1551  ;;  %v913_v14 = vadd.f32 %v5326_v60, %v797_v53 }
 0x334   : > { %v1466_v12 = vsel %vm1465_vm12, %v1460_v21, %v1462_v44 }
 0x335   : > { %v1002_v42 = vadd.f32 %v5327_v5, %v913_v14 }
 0x337   : > { %2589 = vrot.lane.b32.xlu0 %v2581_v43, %s3114_s23  ;;  %v1464_v25 = vpop.permute.xlu1 %1463  ;;  %v1556_v36 = vpop.permute.xlu0 %1555  ;;  %v1095_v58 = vadd.f32 %v5328_v57, %v1002_v42  ;;  %v1471_v43 = vadd.f32 %v1466_v12, %v5332_v7 }
 0x338   : > { %v1467_v48 = vsel %vm1465_vm12, %v1462_v44, %v1464_v25  ;;  %vm2591_vm12 = vcmask 785408  }
 0x339   : > { %v1183_v62 = vadd.f32 %v5329_v29, %v1095_v58  ;;  %v1472_v21 = vadd.f32 %v1467_v48, %v5333_v9 }
 0x33b   : > { %v1554_v63 = vpop.permute.xlu1 %1553  ;;  %v1643_v26 = vpop.permute.xlu0 %1642  ;;  %v1276_v56 = vadd.f32 %v5330_v39, %v1183_v62 }
 0x33c   : > { %v1558_v15 = vsel %vm1557_vm14, %v1552_v8, %v1554_v63  ;;  %v1559_v46 = vsel %vm1557_vm14, %v1554_v63, %v1556_v36  ;;  %vm2647_vm14 = vcmask 941056  }
 0x33d   : > { %v1364_v51 = vadd.f32 %v5331_v6, %v1276_v56  ;;  %v1563_v59 = vadd.f32 %v1558_v15, %v1471_v43  ;;  %v1564_v27 = vadd.f32 %v1559_v46, %v1472_v21 }
 0x33f   : > { %v1641_v18 = vpop.permute.xlu1 %1640  ;;  %v1734_v40 = vpop.permute.xlu0 %1733  ;;  %v1473_v41 = vadd.f32 %v1464_v25, %v1364_v51 }
 0x340   : > { %v1647_v10 = vsel %vm1646_vm4, %v1641_v18, %v1643_v26 }
 0x341   : > { %v1565_v13 = vadd.f32 %v1556_v36, %v1473_v41  ;;  %v1652_v35 = vadd.f32 %v1647_v10, %v1563_v59 }
 0x343   : > { %v1645_v17 = vpop.permute.xlu1 %1644  ;;  %v1738_v0 = vpop.permute.xlu0 %1737 }
 0x344   : > { %v1654_v37 = vadd.f32 %v1645_v17, %v1565_v13  ;;  %v1648_v8 = vsel %vm1646_vm4, %v1643_v26, %v1645_v17 }
 0x345   : > { %v1653_v63 = vadd.f32 %v1648_v8, %v1564_v27 }
 0x346   : > { %v1747_v11 = vadd.f32 %v1738_v0, %v1654_v37 }
 0x347   : > { %v1736_v49 = vpop.permute.xlu1 %1735  ;;  %v1825_v3 = vpop.permute.xlu0 %1824 }
 0x348   : > { %v1740_v55 = vsel %vm1739_vm5, %v1734_v40, %v1736_v49  ;;  %v1741_v25 = vsel %vm1739_vm5, %v1736_v49, %v1738_v0 }
 0x349   : > { %v1745_v30 = vadd.f32 %v1740_v55, %v1652_v35  ;;  %v1746_v5 = vadd.f32 %v1741_v25, %v1653_v63 }
 0x34b   : > { %v1823_v28 = vpop.permute.xlu1 %1822  ;;  %v1936_v2 = vpop.permute.xlu0 %1935 }
 0x34c   : > { %v1828_v1 = vsel %vm1716_vm1, %v1823_v28, %v1825_v3 }
 0x34d   : > { %v1833_v36 = vadd.f32 %v1828_v1, %v1745_v30 }
 0x34f   : > { %v1827_v19 = vpop.permute.xlu1 %1826  ;;  %v1940_v16 = vpop.permute.xlu0 %1939 }
 0x350   : > { %v1835_v32 = vadd.f32 %v1827_v19, %v1747_v11  ;;  %v1829_v40 = vsel %vm1716_vm1, %v1825_v3, %v1827_v19 }
 0x351   : > { %v1834_v57 = vadd.f32 %v1829_v40, %v1746_v5  ;;  %v3115_v40 = vmov 1966171168  }
 0x352   : > { %v1949_v18 = vadd.f32 %v1940_v16, %v1835_v32 }
 0x353   : > { %v1938_v23 = vpop.permute.xlu1 %1937  ;;  %v2059_v61 = vpop.permute.xlu0 %2058 }
 0x354   : > { %v1942_v53 = vsel %vm1941_vm0, %v1936_v2, %v1938_v23  ;;  %v1943_v17 = vsel %vm1941_vm0, %v1938_v23, %v1940_v16 }
 0x355   : > { %v1947_v42 = vadd.f32 %v1942_v53, %v1833_v36  ;;  %v1948_v62 = vadd.f32 %v1943_v17, %v1834_v57 }
 0x357   : > { %v2057_v47 = vpop.permute.xlu1 %2056  ;;  %v2149_v4 = vpop.permute.xlu0 %2148 }
 0x358   : > { %v2062_v60 = vsel %vm1880_vm3, %v2057_v47, %v2059_v61 }
 0x359   : > { %v2067_v58 = vadd.f32 %v2062_v60, %v1947_v42  ;;  %v2623_v60 = vunpack.c.l.s4 %v3115_v40 }
 0x35b   : > { %v2061_v34 = vpop.permute.xlu1 %2060  ;;  %v2153_v50 = vpop.permute.xlu0 %2152 }
 0x35c   : > { %v2069_v14 = vadd.f32 %v2061_v34, %v1949_v18  ;;  %v2063_v0 = vsel %vm1880_vm3, %v2059_v61, %v2061_v34 }
 0x35d   : > { %v2068_v56 = vadd.f32 %v2063_v0, %v1948_v62 }
 0x35e   : > { %v2162_v2 = vadd.f32 %v2153_v50, %v2069_v14  ;;  %v2624_v14 = vunpack.c.0.s8 %v2623_v60 }
 0x35f   : > { %v2151_v31 = vpop.permute.xlu1 %2150  ;;  %v2243_v33 = vpop.permute.xlu0 %2242 }
 0x360   : > { %v2155_v28 = vsel %vm2154_vm8, %v2149_v4, %v2151_v31  ;;  %v2156_v19 = vsel %vm2154_vm8, %v2151_v31, %v2153_v50 }
 0x361   : > { %v2160_v3 = vadd.f32 %v2155_v28, %v2067_v58  ;;  %v2161_v41 = vadd.f32 %v2156_v19, %v2068_v56 }
 0x363   : > { %v2241_v24 = vpop.permute.xlu1 %2240  ;;  %v2330_v20 = vpop.permute.xlu0 %2329 }
 0x364   : > { %v2247_v29 = vsel %vm2246_vm9, %v2241_v24, %v2243_v33 }
 0x365   : > { %v2252_v6 = vadd.f32 %v2247_v29, %v2160_v3  ;;  %v5335_v3 = vlaneseq }
 0x367   : > { %v2245_v45 = vpop.permute.xlu1 %2244  ;;  %v2334_v54 = vpop.permute.xlu0 %2333  ;;  %vm2650_vm15 = vcmp.lt.s32.totalorder %v5335_v3, 256 }
 0x368   : > { %v2254_v47 = vadd.f32 %v2245_v45, %v2162_v2  ;;  %v2248_v4 = vsel %vm2246_vm9, %v2243_v33, %v2245_v45 }
 0x369   : > { %v2253_v12 = vadd.f32 %v2248_v4, %v2161_v41 }
 0x36a   : > { %v2343_v34 = vadd.f32 %v2334_v54, %v2254_v47 }
 0x36b   : > { %v2332_v52 = vpop.permute.xlu1 %2331  ;;  %v2425_v22 = vpop.permute.xlu0 %2424 }
 0x36c   : > { %v2336_v39 = vsel %vm2335_vm6, %v2330_v20, %v2332_v52  ;;  %v2337_v24 = vsel %vm2335_vm6, %v2332_v52, %v2334_v54 }
 0x36d   : > { %v2341_v61 = vadd.f32 %v2336_v39, %v2252_v6  ;;  %v2342_v43 = vadd.f32 %v2337_v24, %v2253_v12 }
 0x36f   : > { %v2423_v38 = vpop.permute.xlu1 %2422  ;;  %v2512_v26 = vpop.permute.xlu0 %2511 }
 0x370   : > { %v2429_v51 = vsel %vm2428_vm11, %v2423_v38, %v2425_v22 }
 0x371   : > { %v2434_v31 = vadd.f32 %v2429_v51, %v2341_v61 }
 0x373   : > { %v2427_v44 = vpop.permute.xlu1 %2426  ;;  %v2516_v23 = vpop.permute.xlu0 %2515 }
 0x374   : > { %v2430_v20 = vsel %vm2428_vm11, %v2425_v22, %v2427_v44  ;;  %v2436_v15 = vadd.f32 %v2427_v44, %v2343_v34 }
 0x375   : > { %v2435_v38 = vadd.f32 %v2430_v20, %v2342_v43 }
 0x376   : > { %v2524_v54 = vadd.f32 %v2516_v23, %v2436_v15 }
 0x377   : > { %v2514_v49 = vpop.permute.xlu1 %2513 }
 0x378   : > { %v2517_v13 = vsel %vm2405_vm13, %v2512_v26, %v2514_v49  ;;  %v2518_v45 = vsel %vm2405_vm13, %v2514_v49, %v2516_v23  ;;  %v5334_v26 = vld [vmem:[#allocation13_spill] sm:$0xff] }
 0x379   : > { %v2522_v33 = vadd.f32 %v2517_v13, %v2434_v31  ;;  %v2523_v46 = vadd.f32 %v2518_v45, %v2435_v38  ;;  %v2627_v17 = vsub.s32 %v2624_v14, %v5334_v26 }
 0x39d   : > { %v2551_v16 = vpop.permute.xlu1 %2550 }
 0x3a1   : > { %v2553_v50 = vpop.permute.xlu0 %2552  ;;  %v2555_v37 = vpop.permute.xlu1 %2554 }
 0x3a2   : > { %v2557_v7 = vsel %vm2556_vm10, %v2551_v16, %v2553_v50  ;;  %v2558_v11 = vsel %vm2556_vm10, %v2553_v50, %v2555_v37  ;;  %v2564_v32 = vadd.f32 %v2555_v37, %v2524_v54 }
 0x3a3   : > { %v2562_v48 = vadd.f32 %v2557_v7, %v2522_v33  ;;  %v2563_v9 = vadd.f32 %v2558_v11, %v2523_v46 }
 0x3a5   : > { %v2586_v10 = vpop.permute.xlu0 %2585  ;;  %v2588_v52 = vpop.permute.xlu1 %2587 }
 0x3a6   : > { %v2592_v59 = vsel %vm2591_vm12, %v2586_v10, %v2588_v52 }
 0x3a7   : > { %v2597_v55 = vadd.f32 %v2592_v59, %v2562_v48 }
 0x3a9   : > { %v2861_v21 = vmul.f32 -1.442695, %v2597_v55  ;;  %v2590_v35 = vpop.permute.xlu0 %2589 }
 0x3aa   : > { %v2593_v22 = vsel %vm2591_vm12, %v2588_v52, %v2590_v35  ;;  %v2599_v8 = vadd.f32 %v2590_v35, %v2564_v32 }
 0x3ab   : > { %2960 = vpow2.f32 %v2861_v21  ;;  %v2598_v1 = vadd.f32 %v2593_v22, %v2563_v9 }
 0x3ac   : > { %v2863_v27 = vmul.f32 -1.442695, %v2599_v8 }
 0x3ad   : > { %v2862_v30 = vmul.f32 -1.442695, %v2598_v1 }
 0x3ae   : > { %2962 = vpow2.f32 %v2863_v27 }
 0x3af   : > { %2964 = vpow2.f32 %v2862_v30 }
 0x3b8   : > { %v2961_v44 = vpop.eup %2960 }
 0x3b9   : > { %v2609_v25 = vadd.f32 1.0, %v2961_v44 }
 0x3bb   : > { %v2963_v18 = vpop.eup %2962  ;;  %2966 = vrcp.f32 %v2609_v25 }
 0x3bc   : > { %v2965_v53 = vpop.eup %2964  ;;  %v2611_v63 = vadd.f32 1.0, %v2963_v18 }
 0x3bd   : > { %v2610_v36 = vadd.f32 1.0, %v2965_v53 }
 0x3be   : > { %2968 = vrcp.f32 %v2611_v63 }
 0x3bf   : > { %2970 = vrcp.f32 %v2610_v36 }
 0x3c8   : > { %v2967_v5 = vpop.eup %2966 }
 0x3cb   : > { %v2969_v42 = vpop.eup %2968 }
 0x3cc   : > { %v2971_v28 = vpop.eup %2970  ;;  %v2635_v49 = vrot.slane %v2969_v42, %v2627_v17 }
 0x3cd   : > { %v2621_v57 = vcombine.low %v2967_v5, %v2971_v28 }
 0x3cf   : > { %v2628_v58 = vrot.slane %v2621_v57, %v2627_v17 }
 0x3d1   : > { %v2636_v0 = vcombine.low %v2628_v58, %v2635_v49 }
 0x3d3   : > { %v2643_v2 = vrot.slane %v2636_v0, %v2627_v17 }
 0x3d5   : > { %2644 = vrot.lane.b32.xlu1 %v2643_v2, %s3116_s28 }
 0x447   : > { %v2645_v29 = vpop.permute.xlu1 %2644 }
 0x448   : > { %v2646_v62 = vrot.slane %v2645_v29, 1 }
 0x44a   : > { %v2648_v19 = vsel %vm2647_vm14, %v2645_v29, %v2646_v62 }
 0x44b   : > { %2652 = vst.msk [vmem:[%s171_s19] sm:$0x3] %vm2650_vm15, %v2648_v19 }
 0x44c   : > { %3026 = shalt.err (!%p3023_p5)
}
 0x44d   : > { %s3027_s6 = scalar_lea.hbm %s5044_s8, 32  ;;  %s3031_s3 = scalar_lea.hbm %s5083_s2, 64 }
 0x44e   : > { %p3028_p2 = scmp.ne.s32.totalorder %s5044_s8, %s3027_s6  ;;  %p3032_p9 = scmp.lt.s32.totalorder %s5044_s8, %s5083_s2 }
 0x44f   : > { %p3033_p1 = scmp.lt.s32.totalorder %s3031_s3, %s3027_s6 }
 0x450   : > { %p3029_p12 = pnand %p3028_p2, %p5336_p8 }
 0x451   : > { %p3034_p4 = por %p3033_p1, %p3032_p9 }
 0x452   : > { %p3030_p13 = pneg %p3029_p12 }
 0x454   : > { %p3035_p6 = pnand %p3034_p4, %p3030_p13 }
 0x456   : > { %3038 = shalt.err (!%p3035_p6)
}
 0x457   : > { %2877 = dma.vmem_to_hbm [thread:$0]  (%p5336_p8), %s2669_s27, 32, %s5044_s8, %s2654_s26  }
 0x458 PF: > { %s2680_s23 = sand.u32 1, %s3069_s9   ;;  %p5337_p7 = scmp.ne.s32.totalorder %s5164_s16, 0 }
 0x459   : > { %p5338_p10 = scmp.ge.s32.totalorder %s3081_s12, 2  ;;  %s2681_s28 = scalar_lea.sflag [#allocation6], %s2680_s23 }
 0x45b   : > { %p2888_p11 = pnand %p5338_p10, %p5337_p7 }
 0x45d   : > { %p2889_p0 = pneg %p2888_p11 }
 0x45f   : > { %3064 = dma.done.wait (%p2889_p0), %s2681_s28, 32  }
 0x460   : > { %3066 = vsyncadd (%p2889_p0), %s2681_s28, 4294967264  ;;  %p16_p3 = scmp.ge.s32.totalorder %s3179_s18, 4   ;;  %s5339_s9 = smov %s3073_s10 }
 0x461   : > { %s5340_s10 = smov %s3077_s11  ;;  %s5341_s11 = smov %s3196_s24 }
 0x462   : > { %s5342_s12 = smov %s3179_s18  ;;  %18 = sbr.rel (!%p16_p3) target bundleno = 6 (0x6), region = 81 }
 0x467   :  { %2686 = vsyncpa [#allocation5], 1 }
 0x468   :  { %2688 = vsyncpa [#allocation5 + $0x1], 1 }
 0x469   :  { %2689 = vsyncpa [#allocation6], 1 }
 0x46a   :  { %2691 = vsyncpa [#allocation6 + $0x1], 1 }
 0x46b   :  { %2692 = vsyncpa [#allocation7], 1 }
 0x46c   :  { %2694 = vsyncpa [#allocation7 + $0x1], 1 }

</bundles_post_ra>
